<compile_context>
chip_gen: v5e
topology: v5e:2x2
jax: 0.10.0
libtpu: 0.0.40
codegen_flags: <defaults>
</compile_context>

<pallas_src>
import functools

import jax
import jax.numpy as jnp
from jax import lax
from jax.experimental import pallas as pl
from jax.experimental.pallas import tpu as pltpu


# ----------------------------------------------------------------------------
# Helpers
# ----------------------------------------------------------------------------
def _choose_time_block(T, B, E, H, cap=None, vmem_budget=8 << 20):
    """Time-block size: VMEM-budgeted, multiple of 8, capped for full unroll."""
    # bytes streamed per time step: double-buffered bf16 x blocks (both
    # directions) + both directions' f32 output rows.
    per_step = 2 * (2 * B * E * 2 + 2 * B * H * 4)
    t_blk = max(8, min(vmem_budget // max(per_step, 1), 32))
    if cap is not None:
        t_blk = min(t_blk, max(int(cap), 1))
    t_blk = max(8, (t_blk // 8) * 8)
    if T <= t_blk:
        return T          # single full block, no tail masking needed
    return t_blk


def _vmem_limit_bytes():
    """~3/4 of VMEM: ~96 MiB on v5e/v6e (128 MiB), ~48 MiB on v7x (64 MiB)."""
    try:
        cap = pltpu.get_tpu_info().vmem_capacity_bytes
    except Exception:
        cap = 128 << 20
    return int(max(32 << 20, min(cap - cap // 4, 100 << 20)))


def _merge_dir_weights(dirs, d_in, H):
    """Build merged, gate-interleaved weights for both directions.

    Column layout (width 8*H): [i_f i_b f_f f_b g_f g_b o_f o_b], each block H
    wide, so gate slices line up with the merged state layout [h_fwd | h_bwd].

    Returns: w_ih_fwd (d_in, 8H) bf16, w_ih_bwd (d_in, 8H) bf16,
             w_hh_merged (2H, 8H) bf16 (block-diagonal per direction),
             bias_merged (1, 8H) f32.
    """
    G2 = 8 * H
    w_ih_m = []
    w_hh_m = jnp.zeros((2 * H, G2), jnp.float32)
    bias_m = jnp.zeros((G2,), jnp.float32)
    for d, p in enumerate(dirs):                       # d: 0 = fwd, 1 = bwd
        w_d = jnp.zeros((d_in, G2), jnp.float32)
        for k in range(4):                             # PyTorch gate order i,f,g,o
            col = (2 * k + d) * H
            w_d = w_d.at[:, col:col + H].set(p["w_ih"][k * H:(k + 1) * H, :].T)
            w_hh_m = w_hh_m.at[d * H:(d + 1) * H, col:col + H].set(
                p["w_hh"][k * H:(k + 1) * H, :].T)
            bias_m = bias_m.at[col:col + H].set(
                p["b_ih"][k * H:(k + 1) * H] + p["b_hh"][k * H:(k + 1) * H])
        w_ih_m.append(w_d.astype(jnp.bfloat16))
    return (w_ih_m[0], w_ih_m[1], w_hh_m.astype(jnp.bfloat16), bias_m[None, :])


# ----------------------------------------------------------------------------
# Pallas kernel: one grid step = one time block of BOTH directions.
# ----------------------------------------------------------------------------
def _bilstm_kernel(xf_ref, xb_ref, wih_f_ref, wih_b_ref, whh_ref, bias_ref,
                   of_ref, ob_ref, h_scr, c_scr, *,
                   t_blk, hidden, seq_len, seq_pad):
    """
    xf_ref   : (t_blk*B, E)  bf16  x rows for the forward-walk time block
    xb_ref   : (t_blk*B, E)  bf16  x rows for the backward-walk time block
    wih_*    : (E, 8H)       bf16  input-projection weights (merged gate layout)
    whh_ref  : (2H, 8H)      bf16  block-diagonal recurrent weights (resident)
    bias_ref : (1, 8H)       f32   b_ih + b_hh for both directions
    of_ref   : (t_blk, B, H) f32   forward hidden states (natural time order)
    ob_ref   : (t_blk, B, H) f32   backward hidden states (natural time order)
    h_scr/c_scr : (B, 2H)    f32   [fwd | bwd] recurrent state, persists over grid
    """
    tb = pl.program_id(0)
    H = hidden
    B = h_scr.shape[0]
    G2 = whh_ref.shape[1]                    # 8 * H

    @pl.when(tb == 0)
    def _():
        h_scr[...] = jnp.zeros_like(h_scr)
        c_scr[...] = jnp.zeros_like(c_scr)

    # ---- fused input projection for the whole block: independent of h, so it
    #      sits off the serial recurrence path.  bf16 operands, f32 accumulate;
    #      bias folded in once per block.  Each direction's weights occupy only
    #      that direction's gate columns, so the per-step add merges them. ----
    gxf = jnp.dot(xf_ref[...], wih_f_ref[...],
                  preferred_element_type=jnp.float32) + bias_ref[...]
    gxb = jnp.dot(xb_ref[...], wih_b_ref[...],
                  preferred_element_type=jnp.float32)

    whh = whh_ref[...]                       # resident bf16 (2H, 8H)

    # Lane masks, hoisted out of the step loop.
    lane = lax.broadcasted_iota(jnp.int32, (B, G2), 1)
    g_lane = (lane >= 4 * H) & (lane < 6 * H)          # tanh (g) gate columns
    needs_mask = seq_pad != seq_len                    # static Python bool
    if needs_mask:
        fwd_lane = lax.broadcasted_iota(jnp.int32, (B, 2 * H), 1) < H

    h_t = h_scr[...]
    c_t = c_scr[...]
    base = tb * t_blk

    for r in range(t_blk):                   # statically unrolled recurrence
        rb = t_blk - 1 - r                   # backward direction walks block reversed
        gx = gxf[r * B:(r + 1) * B] + gxb[rb * B:(rb + 1) * B]
        # Single bf16 MXU matmul per step for BOTH directions (block-diag weight).
        pre = gx + jnp.dot(h_t.astype(jnp.bfloat16), whh,
                           preferred_element_type=jnp.float32)
        # One sigmoid + one tanh over the whole 8H slab, then a lane select.
        act = jnp.where(g_lane, jnp.tanh(pre), jax.nn.sigmoid(pre))
        i_g = act[:, 0 * H:2 * H]            # [i_fwd | i_bwd]
        f_g = act[:, 2 * H:4 * H]
        g_g = act[:, 4 * H:6 * H]
        o_g = act[:, 6 * H:8 * H]
        c_new = f_g * c_t + i_g * g_g
        h_new = o_g * jnp.tanh(c_new)

        if needs_mask:
            # Padded tail steps must not touch the recurrent state
            # (sigmoid(0)=0.5 would corrupt it); mask per direction.
            s = base + r
            ok = jnp.where(fwd_lane, s < seq_len, s >= seq_pad - seq_len)
            c_t = jnp.where(ok, c_new, c_t)
            h_t = jnp.where(ok, h_new, h_t)
        else:
            c_t, h_t = c_new, h_new

        of_ref[r] = h_t[:, :H].astype(of_ref.dtype)
        ob_ref[rb] = h_t[:, H:].astype(ob_ref.dtype)

    h_scr[...] = h_t
    c_scr[...] = c_t


# ----------------------------------------------------------------------------
# One bidirectional LSTM layer (both directions in a single pallas_call).
# ----------------------------------------------------------------------------
def _bidir_lstm_layer(x_tm, wih_f, wih_b, whh_m, bias_m, *, seq_len, t_blk):
    """
    x_tm : (Tpad, B, E) f32 time-major input (already padded to Tpad)
    returns (Tpad, B, 2H) f32 with [h_fwd | h_bwd] in natural time order.
    """
    Tpad, B, E = x_tm.shape
    H = whh_m.shape[0] // 2
    G2 = whh_m.shape[1]
    n_tb = Tpad // t_blk

    # Flatten time x batch so the kernel's fused projection is one 2-D matmul
    # per direction per block; bf16 halves the streamed x bytes.
    x2d = x_tm.reshape(Tpad * B, E).astype(jnp.bfloat16)

    kernel = functools.partial(_bilstm_kernel, t_blk=t_blk, hidden=H,
                               seq_len=seq_len, seq_pad=Tpad)

    cost = pl.CostEstimate(
        flops=2 * Tpad * B * G2 * (2 * E + 2 * H),
        transcendentals=Tpad * B * (2 * G2 + 2 * H),
        bytes_accessed=(2 * Tpad * B * E * 2        # x streamed once per direction (bf16)
                        + 2 * Tpad * B * H * 4      # both direction outputs (f32)
                        + (2 * E + 2 * H) * G2 * 2  # resident bf16 weights
                        + G2 * 4),
    )

    out_f, out_b = pl.pallas_call(
        kernel,
        out_shape=(jax.ShapeDtypeStruct((Tpad, B, H), jnp.float32),
                   jax.ShapeDtypeStruct((Tpad, B, H), jnp.float32)),
        grid_spec=pltpu.PrefetchScalarGridSpec(
            num_scalar_prefetch=0,
            grid=(n_tb,),
            in_specs=[
                # forward-walk x blocks (ascending time blocks)
                pl.BlockSpec((t_blk * B, E), lambda tb: (tb, 0)),
                # backward-walk x blocks (descending time blocks) - same array
                pl.BlockSpec((t_blk * B, E), lambda tb: (n_tb - 1 - tb, 0)),
                pl.BlockSpec((E, G2), lambda tb: (0, 0)),        # W_ih fwd (resident)
                pl.BlockSpec((E, G2), lambda tb: (0, 0)),        # W_ih bwd (resident)
                pl.BlockSpec((2 * H, G2), lambda tb: (0, 0)),    # W_hh merged (resident)
                pl.BlockSpec((1, G2), lambda tb: (0, 0)),        # bias (resident)
            ],
            out_specs=[
                pl.BlockSpec((t_blk, B, H), lambda tb: (tb, 0, 0)),
                pl.BlockSpec((t_blk, B, H), lambda tb: (n_tb - 1 - tb, 0, 0)),
            ],
            scratch_shapes=[
                pltpu.VMEM((B, 2 * H), jnp.float32),   # h state [fwd | bwd]
                pltpu.VMEM((B, 2 * H), jnp.float32),   # c state
            ],
        ),
        compiler_params=pltpu.CompilerParams(
            dimension_semantics=("arbitrary",),        # serial recurrence over time
            vmem_limit_bytes=_vmem_limit_bytes(),
        ),
        cost_estimate=cost,
    )(x2d, x2d, wih_f, wih_b, whh_m, bias_m)

    return jnp.concatenate([out_f, out_b], axis=-1)    # (Tpad, B, 2H)


# ----------------------------------------------------------------------------
# Parameter construction (PyTorch-style uniform(-1/sqrt(H), 1/sqrt(H)))
# ----------------------------------------------------------------------------
def init_params(key, emb_size, hidden_size, vocab_size, pad_idx, num_layers=2):
    params = {}
    k_emb, key = jax.random.split(key)
    emb = jax.random.normal(k_emb, (vocab_size, emb_size), jnp.float32)
    emb = emb.at[pad_idx].set(0.0)                   # padding_idx row is zero
    params["embedding"] = emb

    bound = 1.0 / float(jnp.sqrt(jnp.float32(hidden_size)))
    layers = []
    for layer in range(num_layers):
        d_in = emb_size if layer == 0 else 2 * hidden_size
        dirs = []
        for _direction in range(2):                  # forward, backward
            key, k1, k2, k3, k4 = jax.random.split(key, 5)
            dirs.append({
                "w_ih": jax.random.uniform(k1, (4 * hidden_size, d_in), jnp.float32,
                                           -bound, bound),
                "w_hh": jax.random.uniform(k2, (4 * hidden_size, hidden_size), jnp.float32,
                                           -bound, bound),
                "b_ih": jax.random.uniform(k3, (4 * hidden_size,), jnp.float32, -bound, bound),
                "b_hh": jax.random.uniform(k4, (4 * hidden_size,), jnp.float32, -bound, bound),
            })
        layers.append(dirs)
    params["lstm"] = layers
    return params


# ----------------------------------------------------------------------------
# Full encoder forward
# ----------------------------------------------------------------------------
@functools.partial(jax.jit, static_argnames=("t_blk_cap",))
def lstm_encoder_forward(params, x_ids, t_blk_cap=None):
    """x_ids: (B, T) int32 token ids  ->  (B, T, 2*hidden_size) float32."""
    emb = params["embedding"][x_ids]                 # (B, T, E) gather (plain JAX glue)
    B, T, E = emb.shape
    h = jnp.transpose(emb, (1, 0, 2))                # (T, B, E) time-major
    H = params["lstm"][0][0]["w_hh"].shape[1]

    t_blk = _choose_time_block(T, B, E, H, cap=t_blk_cap)
    n_tb = -(-T // t_blk)
    Tpad = n_tb * t_blk
    if Tpad != T:
        # Zero-pad to whole blocks; padded steps are masked inside the kernel.
        h = jnp.pad(h, ((0, Tpad - T), (0, 0), (0, 0)))

    for dirs in params["lstm"]:
        d_in = h.shape[-1]
        wih_f, wih_b, whh_m, bias_m = _merge_dir_weights(dirs, d_in, H)
        h = _bidir_lstm_layer(h, wih_f, wih_b, whh_m, bias_m,
                              seq_len=T, t_blk=t_blk)     # (Tpad, B, 2H)

    return jnp.transpose(h[:T], (1, 0, 2))           # (B, T, 2H)


# ----------------------------------------------------------------------------
# Pure-JAX f32 reference (lax.scan) for correctness checking
# ----------------------------------------------------------------------------
def _ref_direction(x_seq, w_ih, w_hh, b_ih, b_hh):
    H = w_hh.shape[1]
    B = x_seq.shape[1]
    w_ih_t, w_hh_t = w_ih.T, w_hh.T
    bias = (b_ih + b_hh)[None, :]

    def step(carry, x_t):
        h, c = carry
        gates = x_t @ w_ih_t + h @ w_hh_t + bias
        i_g = jax.nn.sigmoid(gates[:, 0 * H:1 * H])
        f_g = jax.nn.sigmoid(gates[:, 1 * H:2 * H])
        g_g = jnp.tanh(gates[:, 2 * H:3 * H])
        o_g = jax.nn.sigmoid(gates[:, 3 * H:4 * H])
        c = f_g * c + i_g * g_g
        h = o_g * jnp.tanh(c)
        return (h, c), h

    init = (jnp.zeros((B, H), jnp.float32), jnp.zeros((B, H), jnp.float32))
    _, hs = lax.scan(step, init, x_seq)
    return hs


def lstm_encoder_reference(params, x_ids):
    emb = params["embedding"][x_ids]
    h = jnp.transpose(emb, (1, 0, 2))
    for dirs in params["lstm"]:
        f, b = dirs
        fwd = _ref_direction(h, f["w_ih"], f["w_hh"], f["b_ih"], f["b_hh"])
        bwd = _ref_direction(h[::-1], b["w_ih"], b["w_hh"], b["b_ih"], b["b_hh"])[::-1]
        h = jnp.concatenate([fwd, bwd], axis=-1)
    return jnp.transpose(h, (1, 0, 2))


# ----------------------------------------------------------------------------
if __name__ == "__main__":
    EMB, HIDDEN = 16, 32
    VOCAB, PAD_IDX = 20, 0

    key = jax.random.PRNGKey(0)
    k_params, k_ids, k_ids2 = jax.random.split(key, 3)
    params = init_params(k_params, EMB, HIDDEN, VOCAB, PAD_IDX)

    # --- canonical small test: B=2, T=8 (single time block) ---
    B, T = 2, 8
    x = jax.random.randint(k_ids, (B, T), 1, VOCAB, dtype=jnp.int32)
    x = x.at[0, T - 2:].set(PAD_IDX)
    x = x.at[1, T - 3:].set(PAD_IDX)

    out = jax.block_until_ready(lstm_encoder_forward(params, x))
    ref = lstm_encoder_reference(params, x)
    assert out.shape == (B, T, 2 * HIDDEN), out.shape
    err = float(jnp.max(jnp.abs(out - ref)))
    # bf16 matmul operands (f32 accumulate/carry) -> loosened tolerance.
    assert err < 3e-2, "mismatch vs reference, max abs diff = %g" % err

    # --- ragged-T test: multi-block grid + in-kernel tail masking path ---
    B2, T2 = 3, 19
    x2 = jax.random.randint(k_ids2, (B2, T2), 1, VOCAB, dtype=jnp.int32)
    x2 = x2.at[0, T2 - 4:].set(PAD_IDX)
    out2 = jax.block_until_ready(lstm_encoder_forward(params, x2, t_blk_cap=8))
    ref2 = lstm_encoder_reference(params, x2)
    assert out2.shape == (B2, T2, 2 * HIDDEN), out2.shape
    err2 = float(jnp.max(jnp.abs(out2 - ref2)))
    assert err2 < 3e-2, "ragged-T mismatch vs reference, max abs diff = %g" % err2

    print("KERNEL_OK")
</pallas_src>

<mosaic_0001>
module attributes {stable_mosaic.version = 11 : i64} {
  func.func @_bilstm_kernel(%arg0: i32, %arg1: memref<16x16xbf16, #tpu.memory_space<vmem>>, %arg2: memref<16x16xbf16, #tpu.memory_space<vmem>>, %arg3: memref<16x256xbf16, #tpu.memory_space<vmem>>, %arg4: memref<16x256xbf16, #tpu.memory_space<vmem>>, %arg5: memref<64x256xbf16, #tpu.memory_space<vmem>>, %arg6: memref<1x256xf32, #tpu.memory_space<vmem>>, %arg7: memref<8x2x32xf32, #tpu.memory_space<vmem>>, %arg8: memref<8x2x32xf32, #tpu.memory_space<vmem>>, %arg9: memref<2x64xf32, #tpu.memory_space<vmem>>, %arg10: memref<2x64xf32, #tpu.memory_space<vmem>>) attributes {dimension_semantics = [#tpu.dimension_semantics<arbitrary>], iteration_bounds = array<i64: 1>, scalar_prefetch = 0 : i64, scratch_operands = 2 : i64, tpu.core_type = #tpu.core_type<tc>, window_params = [{transform_indices = @transform_0, window_bounds = array<i64: 16, 16>}, {transform_indices = @transform_1, window_bounds = array<i64: 16, 16>}, {pipeline_mode = #tpu.pipeline_mode<synchronous>, transform_indices = @transform_2, window_bounds = array<i64: 16, 256>}, {pipeline_mode = #tpu.pipeline_mode<synchronous>, transform_indices = @transform_3, window_bounds = array<i64: 16, 256>}, {pipeline_mode = #tpu.pipeline_mode<synchronous>, transform_indices = @transform_4, window_bounds = array<i64: 64, 256>}, {pipeline_mode = #tpu.pipeline_mode<synchronous>, transform_indices = @transform_5, window_bounds = array<i64: 1, 256>}, {transform_indices = @transform_6, window_bounds = array<i64: 8, 2, 32>}, {transform_indices = @transform_7, window_bounds = array<i64: 8, 2, 32>}]} {
    %c0_i32 = arith.constant 0 : i32
    %0 = arith.cmpi eq, %arg0, %c0_i32 : i32
    %1 = arith.extui %0 : i1 to i32
    %c0_i32_0 = arith.constant 0 : i32
    %2 = arith.cmpi ne, %1, %c0_i32_0 : i32
    scf.if %2 {
      %cst_78 = arith.constant 0.000000e+00 : f32
      %263 = vector.broadcast %cst_78 : f32 to vector<2x64xf32>
      %c0_79 = arith.constant 0 : index
      %c0_80 = arith.constant 0 : index
      %264 = vector.load %arg9[%c0_79, %c0_80] : memref<2x64xf32, #tpu.memory_space<vmem>>, vector<2x64xf32>
      tpu.vector_store %arg9[%c0_79, %c0_80], %263 {strides = array<i32>} : memref<2x64xf32, #tpu.memory_space<vmem>>, vector<2x64xf32>,
      %cst_81 = arith.constant 0.000000e+00 : f32
      %265 = vector.broadcast %cst_81 : f32 to vector<2x64xf32>
      %c0_82 = arith.constant 0 : index
      %c0_83 = arith.constant 0 : index
      %266 = vector.load %arg10[%c0_82, %c0_83] : memref<2x64xf32, #tpu.memory_space<vmem>>, vector<2x64xf32>
      tpu.vector_store %arg10[%c0_82, %c0_83], %265 {strides = array<i32>} : memref<2x64xf32, #tpu.memory_space<vmem>>, vector<2x64xf32>,
    } else {
    }
    %c0 = arith.constant 0 : index
    %c0_1 = arith.constant 0 : index
    %3 = vector.load %arg1[%c0, %c0_1] : memref<16x16xbf16, #tpu.memory_space<vmem>>, vector<16x16xbf16>
    %c0_2 = arith.constant 0 : index
    %c0_3 = arith.constant 0 : index
    %4 = vector.load %arg3[%c0_2, %c0_3] : memref<16x256xbf16, #tpu.memory_space<vmem>>, vector<16x256xbf16>
    %cst = arith.constant dense<0.000000e+00> : vector<16x256xf32>
    %5 = tpu.matmul %3, %4, %cst {dimension_numbers = #tpu.dot_dimension_numbers<[1], [0], [0], [1], [0, 0, 1, 1], [], []>} : vector<16x16xbf16>, vector<16x256xbf16>, vector<16x256xf32> -> vector<16x256xf32>
    %c0_4 = arith.constant 0 : index
    %c0_5 = arith.constant 0 : index
    %6 = vector.load %arg6[%c0_4, %c0_5] : memref<1x256xf32, #tpu.memory_space<vmem>>, vector<1x256xf32>
    %7 = vector.broadcast %6 : vector<1x256xf32> to vector<16x256xf32>
    %8 = arith.addf %5, %7 : vector<16x256xf32>
    %c0_6 = arith.constant 0 : index
    %c0_7 = arith.constant 0 : index
    %9 = vector.load %arg2[%c0_6, %c0_7] : memref<16x16xbf16, #tpu.memory_space<vmem>>, vector<16x16xbf16>
    %c0_8 = arith.constant 0 : index
    %c0_9 = arith.constant 0 : index
    %10 = vector.load %arg4[%c0_8, %c0_9] : memref<16x256xbf16, #tpu.memory_space<vmem>>, vector<16x256xbf16>
    %cst_10 = arith.constant dense<0.000000e+00> : vector<16x256xf32>
    %11 = tpu.matmul %9, %10, %cst_10 {dimension_numbers = #tpu.dot_dimension_numbers<[1], [0], [0], [1], [0, 0, 1, 1], [], []>} : vector<16x16xbf16>, vector<16x256xbf16>, vector<16x256xf32> -> vector<16x256xf32>
    %c0_11 = arith.constant 0 : index
    %c0_12 = arith.constant 0 : index
    %12 = vector.load %arg5[%c0_11, %c0_12] : memref<64x256xbf16, #tpu.memory_space<vmem>>, vector<64x256xbf16>
    %13 = tpu.iota {dimensions = array<i32: 1>} : vector<2x256xi32>
    %c128_i32 = arith.constant 128 : i32
    %14 = vector.broadcast %c128_i32 : i32 to vector<2x256xi32>
    %15 = arith.cmpi sge, %13, %14 : vector<2x256xi32>
    %c192_i32 = arith.constant 192 : i32
    %16 = vector.broadcast %c192_i32 : i32 to vector<2x256xi32>
    %17 = arith.cmpi slt, %13, %16 : vector<2x256xi32>
    %18 = arith.andi %15, %17 : vector<2x256xi1>
    %c0_13 = arith.constant 0 : index
    %c0_14 = arith.constant 0 : index
    %19 = vector.load %arg9[%c0_13, %c0_14] : memref<2x64xf32, #tpu.memory_space<vmem>>, vector<2x64xf32>
    %c0_15 = arith.constant 0 : index
    %c0_16 = arith.constant 0 : index
    %20 = vector.load %arg10[%c0_15, %c0_16] : memref<2x64xf32, #tpu.memory_space<vmem>>, vector<2x64xf32>
    %21 = vector.extract_strided_slice %8 {offsets = [0, 0], sizes = [2, 256], strides = [1, 1]} : vector<16x256xf32> to vector<2x256xf32>
    %22 = vector.extract_strided_slice %11 {offsets = [14, 0], sizes = [2, 256], strides = [1, 1]} : vector<16x256xf32> to vector<2x256xf32>
    %23 = arith.addf %21, %22 : vector<2x256xf32>
    %24 = arith.truncf %19 : vector<2x64xf32> to vector<2x64xbf16>
    %cst_17 = arith.constant dense<0.000000e+00> : vector<2x256xf32>
    %25 = tpu.matmul %24, %12, %cst_17 {dimension_numbers = #tpu.dot_dimension_numbers<[1], [0], [0], [1], [0, 0, 1, 1], [], []>} : vector<2x64xbf16>, vector<64x256xbf16>, vector<2x256xf32> -> vector<2x256xf32>
    %26 = arith.addf %23, %25 : vector<2x256xf32>
    %27 = math.tanh %26 : vector<2x256xf32>
    %28 = arith.negf %26 : vector<2x256xf32>
    %29 = math.exp %28 : vector<2x256xf32>
    %cst_18 = arith.constant 1.000000e+00 : f32
    %30 = vector.broadcast %cst_18 : f32 to vector<2x256xf32>
    %31 = arith.addf %30, %29 : vector<2x256xf32>
    %32 = arith.divf %30, %31 : vector<2x256xf32>
    %33 = arith.select %18, %27, %32 : vector<2x256xi1>, vector<2x256xf32>
    %34 = vector.extract_strided_slice %33 {offsets = [0, 0], sizes = [2, 64], strides = [1, 1]} : vector<2x256xf32> to vector<2x64xf32>
    %35 = vector.extract_strided_slice %33 {offsets = [0, 64], sizes = [2, 64], strides = [1, 1]} : vector<2x256xf32> to vector<2x64xf32>
    %36 = vector.extract_strided_slice %33 {offsets = [0, 128], sizes = [2, 64], strides = [1, 1]} : vector<2x256xf32> to vector<2x64xf32>
    %37 = vector.extract_strided_slice %33 {offsets = [0, 192], sizes = [2, 64], strides = [1, 1]} : vector<2x256xf32> to vector<2x64xf32>
    %38 = arith.mulf %35, %20 : vector<2x64xf32>
    %39 = arith.mulf %34, %36 : vector<2x64xf32>
    %40 = arith.addf %38, %39 : vector<2x64xf32>
    %41 = math.tanh %40 : vector<2x64xf32>
    %42 = arith.mulf %37, %41 : vector<2x64xf32>
    %43 = vector.extract_strided_slice %42 {offsets = [0, 0], sizes = [2, 32], strides = [1, 1]} : vector<2x64xf32> to vector<2x32xf32>
    %c0_19 = arith.constant 0 : index
    %c0_20 = arith.constant 0 : index
    %c0_21 = arith.constant 0 : index
    %44 = vector.load %arg7[%c0_19, %c0_20, %c0_21] : memref<8x2x32xf32, #tpu.memory_space<vmem>>, vector<1x2x32xf32>
    %45 = vector.shape_cast %44 : vector<1x2x32xf32> to vector<2x32xf32>
    %46 = vector.shape_cast %43 : vector<2x32xf32> to vector<1x2x32xf32>
    tpu.vector_store %arg7[%c0_19, %c0_20, %c0_21], %46 {strides = array<i32>} : memref<8x2x32xf32, #tpu.memory_space<vmem>>, vector<1x2x32xf32>,
    %47 = vector.extract_strided_slice %42 {offsets = [0, 32], sizes = [2, 32], strides = [1, 1]} : vector<2x64xf32> to vector<2x32xf32>
    %c7 = arith.constant 7 : index
    %c0_22 = arith.constant 0 : index
    %c0_23 = arith.constant 0 : index
    %48 = vector.load %arg8[%c7, %c0_22, %c0_23] : memref<8x2x32xf32, #tpu.memory_space<vmem>>, vector<1x2x32xf32>
    %49 = vector.shape_cast %48 : vector<1x2x32xf32> to vector<2x32xf32>
    %50 = vector.shape_cast %47 : vector<2x32xf32> to vector<1x2x32xf32>
    tpu.vector_store %arg8[%c7, %c0_22, %c0_23], %50 {strides = array<i32>} : memref<8x2x32xf32, #tpu.memory_space<vmem>>, vector<1x2x32xf32>,
    %51 = vector.extract_strided_slice %8 {offsets = [2, 0], sizes = [2, 256], strides = [1, 1]} : vector<16x256xf32> to vector<2x256xf32>
    %52 = vector.extract_strided_slice %11 {offsets = [12, 0], sizes = [2, 256], strides = [1, 1]} : vector<16x256xf32> to vector<2x256xf32>
    %53 = arith.addf %51, %52 : vector<2x256xf32>
    %54 = arith.truncf %42 : vector<2x64xf32> to vector<2x64xbf16>
    %cst_24 = arith.constant dense<0.000000e+00> : vector<2x256xf32>
    %55 = tpu.matmul %54, %12, %cst_24 {dimension_numbers = #tpu.dot_dimension_numbers<[1], [0], [0], [1], [0, 0, 1, 1], [], []>} : vector<2x64xbf16>, vector<64x256xbf16>, vector<2x256xf32> -> vector<2x256xf32>
    %56 = arith.addf %53, %55 : vector<2x256xf32>
    %57 = math.tanh %56 : vector<2x256xf32>
    %58 = arith.negf %56 : vector<2x256xf32>
    %59 = math.exp %58 : vector<2x256xf32>
    %cst_25 = arith.constant 1.000000e+00 : f32
    %60 = vector.broadcast %cst_25 : f32 to vector<2x256xf32>
    %61 = arith.addf %60, %59 : vector<2x256xf32>
    %62 = arith.divf %60, %61 : vector<2x256xf32>
    %63 = arith.select %18, %57, %62 : vector<2x256xi1>, vector<2x256xf32>
    %64 = vector.extract_strided_slice %63 {offsets = [0, 0], sizes = [2, 64], strides = [1, 1]} : vector<2x256xf32> to vector<2x64xf32>
    %65 = vector.extract_strided_slice %63 {offsets = [0, 64], sizes = [2, 64], strides = [1, 1]} : vector<2x256xf32> to vector<2x64xf32>
    %66 = vector.extract_strided_slice %63 {offsets = [0, 128], sizes = [2, 64], strides = [1, 1]} : vector<2x256xf32> to vector<2x64xf32>
    %67 = vector.extract_strided_slice %63 {offsets = [0, 192], sizes = [2, 64], strides = [1, 1]} : vector<2x256xf32> to vector<2x64xf32>
    %68 = arith.mulf %65, %40 : vector<2x64xf32>
    %69 = arith.mulf %64, %66 : vector<2x64xf32>
    %70 = arith.addf %68, %69 : vector<2x64xf32>
    %71 = math.tanh %70 : vector<2x64xf32>
    %72 = arith.mulf %67, %71 : vector<2x64xf32>
    %73 = vector.extract_strided_slice %72 {offsets = [0, 0], sizes = [2, 32], strides = [1, 1]} : vector<2x64xf32> to vector<2x32xf32>
    %c1 = arith.constant 1 : index
    %c0_26 = arith.constant 0 : index
    %c0_27 = arith.constant 0 : index
    %74 = vector.load %arg7[%c1, %c0_26, %c0_27] : memref<8x2x32xf32, #tpu.memory_space<vmem>>, vector<1x2x32xf32>
    %75 = vector.shape_cast %74 : vector<1x2x32xf32> to vector<2x32xf32>
    %76 = vector.shape_cast %73 : vector<2x32xf32> to vector<1x2x32xf32>
    tpu.vector_store %arg7[%c1, %c0_26, %c0_27], %76 {strides = array<i32>} : memref<8x2x32xf32, #tpu.memory_space<vmem>>, vector<1x2x32xf32>,
    %77 = vector.extract_strided_slice %72 {offsets = [0, 32], sizes = [2, 32], strides = [1, 1]} : vector<2x64xf32> to vector<2x32xf32>
    %c6 = arith.constant 6 : index
    %c0_28 = arith.constant 0 : index
    %c0_29 = arith.constant 0 : index
    %78 = vector.load %arg8[%c6, %c0_28, %c0_29] : memref<8x2x32xf32, #tpu.memory_space<vmem>>, vector<1x2x32xf32>
    %79 = vector.shape_cast %78 : vector<1x2x32xf32> to vector<2x32xf32>
    %80 = vector.shape_cast %77 : vector<2x32xf32> to vector<1x2x32xf32>
    tpu.vector_store %arg8[%c6, %c0_28, %c0_29], %80 {strides = array<i32>} : memref<8x2x32xf32, #tpu.memory_space<vmem>>, vector<1x2x32xf32>,
    %81 = vector.extract_strided_slice %8 {offsets = [4, 0], sizes = [2, 256], strides = [1, 1]} : vector<16x256xf32> to vector<2x256xf32>
    %82 = vector.extract_strided_slice %11 {offsets = [10, 0], sizes = [2, 256], strides = [1, 1]} : vector<16x256xf32> to vector<2x256xf32>
    %83 = arith.addf %81, %82 : vector<2x256xf32>
    %84 = arith.truncf %72 : vector<2x64xf32> to vector<2x64xbf16>
    %cst_30 = arith.constant dense<0.000000e+00> : vector<2x256xf32>
    %85 = tpu.matmul %84, %12, %cst_30 {dimension_numbers = #tpu.dot_dimension_numbers<[1], [0], [0], [1], [0, 0, 1, 1], [], []>} : vector<2x64xbf16>, vector<64x256xbf16>, vector<2x256xf32> -> vector<2x256xf32>
    %86 = arith.addf %83, %85 : vector<2x256xf32>
    %87 = math.tanh %86 : vector<2x256xf32>
    %88 = arith.negf %86 : vector<2x256xf32>
    %89 = math.exp %88 : vector<2x256xf32>
    %cst_31 = arith.constant 1.000000e+00 : f32
    %90 = vector.broadcast %cst_31 : f32 to vector<2x256xf32>
    %91 = arith.addf %90, %89 : vector<2x256xf32>
    %92 = arith.divf %90, %91 : vector<2x256xf32>
    %93 = arith.select %18, %87, %92 : vector<2x256xi1>, vector<2x256xf32>
    %94 = vector.extract_strided_slice %93 {offsets = [0, 0], sizes = [2, 64], strides = [1, 1]} : vector<2x256xf32> to vector<2x64xf32>
    %95 = vector.extract_strided_slice %93 {offsets = [0, 64], sizes = [2, 64], strides = [1, 1]} : vector<2x256xf32> to vector<2x64xf32>
    %96 = vector.extract_strided_slice %93 {offsets = [0, 128], sizes = [2, 64], strides = [1, 1]} : vector<2x256xf32> to vector<2x64xf32>
    %97 = vector.extract_strided_slice %93 {offsets = [0, 192], sizes = [2, 64], strides = [1, 1]} : vector<2x256xf32> to vector<2x64xf32>
    %98 = arith.mulf %95, %70 : vector<2x64xf32>
    %99 = arith.mulf %94, %96 : vector<2x64xf32>
    %100 = arith.addf %98, %99 : vector<2x64xf32>
    %101 = math.tanh %100 : vector<2x64xf32>
    %102 = arith.mulf %97, %101 : vector<2x64xf32>
    %103 = vector.extract_strided_slice %102 {offsets = [0, 0], sizes = [2, 32], strides = [1, 1]} : vector<2x64xf32> to vector<2x32xf32>
    %c2 = arith.constant 2 : index
    %c0_32 = arith.constant 0 : index
    %c0_33 = arith.constant 0 : index
    %104 = vector.load %arg7[%c2, %c0_32, %c0_33] : memref<8x2x32xf32, #tpu.memory_space<vmem>>, vector<1x2x32xf32>
    %105 = vector.shape_cast %104 : vector<1x2x32xf32> to vector<2x32xf32>
    %106 = vector.shape_cast %103 : vector<2x32xf32> to vector<1x2x32xf32>
    tpu.vector_store %arg7[%c2, %c0_32, %c0_33], %106 {strides = array<i32>} : memref<8x2x32xf32, #tpu.memory_space<vmem>>, vector<1x2x32xf32>,
    %107 = vector.extract_strided_slice %102 {offsets = [0, 32], sizes = [2, 32], strides = [1, 1]} : vector<2x64xf32> to vector<2x32xf32>
    %c5 = arith.constant 5 : index
    %c0_34 = arith.constant 0 : index
    %c0_35 = arith.constant 0 : index
    %108 = vector.load %arg8[%c5, %c0_34, %c0_35] : memref<8x2x32xf32, #tpu.memory_space<vmem>>, vector<1x2x32xf32>
    %109 = vector.shape_cast %108 : vector<1x2x32xf32> to vector<2x32xf32>
    %110 = vector.shape_cast %107 : vector<2x32xf32> to vector<1x2x32xf32>
    tpu.vector_store %arg8[%c5, %c0_34, %c0_35], %110 {strides = array<i32>} : memref<8x2x32xf32, #tpu.memory_space<vmem>>, vector<1x2x32xf32>,
    %111 = vector.extract_strided_slice %8 {offsets = [6, 0], sizes = [2, 256], strides = [1, 1]} : vector<16x256xf32> to vector<2x256xf32>
    %112 = vector.extract_strided_slice %11 {offsets = [8, 0], sizes = [2, 256], strides = [1, 1]} : vector<16x256xf32> to vector<2x256xf32>
    %113 = arith.addf %111, %112 : vector<2x256xf32>
    %114 = arith.truncf %102 : vector<2x64xf32> to vector<2x64xbf16>
    %cst_36 = arith.constant dense<0.000000e+00> : vector<2x256xf32>
    %115 = tpu.matmul %114, %12, %cst_36 {dimension_numbers = #tpu.dot_dimension_numbers<[1], [0], [0], [1], [0, 0, 1, 1], [], []>} : vector<2x64xbf16>, vector<64x256xbf16>, vector<2x256xf32> -> vector<2x256xf32>
    %116 = arith.addf %113, %115 : vector<2x256xf32>
    %117 = math.tanh %116 : vector<2x256xf32>
    %118 = arith.negf %116 : vector<2x256xf32>
    %119 = math.exp %118 : vector<2x256xf32>
    %cst_37 = arith.constant 1.000000e+00 : f32
    %120 = vector.broadcast %cst_37 : f32 to vector<2x256xf32>
    %121 = arith.addf %120, %119 : vector<2x256xf32>
    %122 = arith.divf %120, %121 : vector<2x256xf32>
    %123 = arith.select %18, %117, %122 : vector<2x256xi1>, vector<2x256xf32>
    %124 = vector.extract_strided_slice %123 {offsets = [0, 0], sizes = [2, 64], strides = [1, 1]} : vector<2x256xf32> to vector<2x64xf32>
    %125 = vector.extract_strided_slice %123 {offsets = [0, 64], sizes = [2, 64], strides = [1, 1]} : vector<2x256xf32> to vector<2x64xf32>
    %126 = vector.extract_strided_slice %123 {offsets = [0, 128], sizes = [2, 64], strides = [1, 1]} : vector<2x256xf32> to vector<2x64xf32>
    %127 = vector.extract_strided_slice %123 {offsets = [0, 192], sizes = [2, 64], strides = [1, 1]} : vector<2x256xf32> to vector<2x64xf32>
    %128 = arith.mulf %125, %100 : vector<2x64xf32>
    %129 = arith.mulf %124, %126 : vector<2x64xf32>
    %130 = arith.addf %128, %129 : vector<2x64xf32>
    %131 = math.tanh %130 : vector<2x64xf32>
    %132 = arith.mulf %127, %131 : vector<2x64xf32>
    %133 = vector.extract_strided_slice %132 {offsets = [0, 0], sizes = [2, 32], strides = [1, 1]} : vector<2x64xf32> to vector<2x32xf32>
    %c3 = arith.constant 3 : index
    %c0_38 = arith.constant 0 : index
    %c0_39 = arith.constant 0 : index
    %134 = vector.load %arg7[%c3, %c0_38, %c0_39] : memref<8x2x32xf32, #tpu.memory_space<vmem>>, vector<1x2x32xf32>
    %135 = vector.shape_cast %134 : vector<1x2x32xf32> to vector<2x32xf32>
    %136 = vector.shape_cast %133 : vector<2x32xf32> to vector<1x2x32xf32>
    tpu.vector_store %arg7[%c3, %c0_38, %c0_39], %136 {strides = array<i32>} : memref<8x2x32xf32, #tpu.memory_space<vmem>>, vector<1x2x32xf32>,
    %137 = vector.extract_strided_slice %132 {offsets = [0, 32], sizes = [2, 32], strides = [1, 1]} : vector<2x64xf32> to vector<2x32xf32>
    %c4 = arith.constant 4 : index
    %c0_40 = arith.constant 0 : index
    %c0_41 = arith.constant 0 : index
    %138 = vector.load %arg8[%c4, %c0_40, %c0_41] : memref<8x2x32xf32, #tpu.memory_space<vmem>>, vector<1x2x32xf32>
    %139 = vector.shape_cast %138 : vector<1x2x32xf32> to vector<2x32xf32>
    %140 = vector.shape_cast %137 : vector<2x32xf32> to vector<1x2x32xf32>
    tpu.vector_store %arg8[%c4, %c0_40, %c0_41], %140 {strides = array<i32>} : memref<8x2x32xf32, #tpu.memory_space<vmem>>, vector<1x2x32xf32>,
    %141 = vector.extract_strided_slice %8 {offsets = [8, 0], sizes = [2, 256], strides = [1, 1]} : vector<16x256xf32> to vector<2x256xf32>
    %142 = vector.extract_strided_slice %11 {offsets = [6, 0], sizes = [2, 256], strides = [1, 1]} : vector<16x256xf32> to vector<2x256xf32>
    %143 = arith.addf %141, %142 : vector<2x256xf32>
    %144 = arith.truncf %132 : vector<2x64xf32> to vector<2x64xbf16>
    %cst_42 = arith.constant dense<0.000000e+00> : vector<2x256xf32>
    %145 = tpu.matmul %144, %12, %cst_42 {dimension_numbers = #tpu.dot_dimension_numbers<[1], [0], [0], [1], [0, 0, 1, 1], [], []>} : vector<2x64xbf16>, vector<64x256xbf16>, vector<2x256xf32> -> vector<2x256xf32>
    %146 = arith.addf %143, %145 : vector<2x256xf32>
    %147 = math.tanh %146 : vector<2x256xf32>
    %148 = arith.negf %146 : vector<2x256xf32>
    %149 = math.exp %148 : vector<2x256xf32>
    %cst_43 = arith.constant 1.000000e+00 : f32
    %150 = vector.broadcast %cst_43 : f32 to vector<2x256xf32>
    %151 = arith.addf %150, %149 : vector<2x256xf32>
    %152 = arith.divf %150, %151 : vector<2x256xf32>
    %153 = arith.select %18, %147, %152 : vector<2x256xi1>, vector<2x256xf32>
    %154 = vector.extract_strided_slice %153 {offsets = [0, 0], sizes = [2, 64], strides = [1, 1]} : vector<2x256xf32> to vector<2x64xf32>
    %155 = vector.extract_strided_slice %153 {offsets = [0, 64], sizes = [2, 64], strides = [1, 1]} : vector<2x256xf32> to vector<2x64xf32>
    %156 = vector.extract_strided_slice %153 {offsets = [0, 128], sizes = [2, 64], strides = [1, 1]} : vector<2x256xf32> to vector<2x64xf32>
    %157 = vector.extract_strided_slice %153 {offsets = [0, 192], sizes = [2, 64], strides = [1, 1]} : vector<2x256xf32> to vector<2x64xf32>
    %158 = arith.mulf %155, %130 : vector<2x64xf32>
    %159 = arith.mulf %154, %156 : vector<2x64xf32>
    %160 = arith.addf %158, %159 : vector<2x64xf32>
    %161 = math.tanh %160 : vector<2x64xf32>
    %162 = arith.mulf %157, %161 : vector<2x64xf32>
    %163 = vector.extract_strided_slice %162 {offsets = [0, 0], sizes = [2, 32], strides = [1, 1]} : vector<2x64xf32> to vector<2x32xf32>
    %c4_44 = arith.constant 4 : index
    %c0_45 = arith.constant 0 : index
    %c0_46 = arith.constant 0 : index
    %164 = vector.load %arg7[%c4_44, %c0_45, %c0_46] : memref<8x2x32xf32, #tpu.memory_space<vmem>>, vector<1x2x32xf32>
    %165 = vector.shape_cast %164 : vector<1x2x32xf32> to vector<2x32xf32>
    %166 = vector.shape_cast %163 : vector<2x32xf32> to vector<1x2x32xf32>
    tpu.vector_store %arg7[%c4_44, %c0_45, %c0_46], %166 {strides = array<i32>} : memref<8x2x32xf32, #tpu.memory_space<vmem>>, vector<1x2x32xf32>,
    %167 = vector.extract_strided_slice %162 {offsets = [0, 32], sizes = [2, 32], strides = [1, 1]} : vector<2x64xf32> to vector<2x32xf32>
    %c3_47 = arith.constant 3 : index
    %c0_48 = arith.constant 0 : index
    %c0_49 = arith.constant 0 : index
    %168 = vector.load %arg8[%c3_47, %c0_48, %c0_49] : memref<8x2x32xf32, #tpu.memory_space<vmem>>, vector<1x2x32xf32>
    %169 = vector.shape_cast %168 : vector<1x2x32xf32> to vector<2x32xf32>
    %170 = vector.shape_cast %167 : vector<2x32xf32> to vector<1x2x32xf32>
    tpu.vector_store %arg8[%c3_47, %c0_48, %c0_49], %170 {strides = array<i32>} : memref<8x2x32xf32, #tpu.memory_space<vmem>>, vector<1x2x32xf32>,
    %171 = vector.extract_strided_slice %8 {offsets = [10, 0], sizes = [2, 256], strides = [1, 1]} : vector<16x256xf32> to vector<2x256xf32>
    %172 = vector.extract_strided_slice %11 {offsets = [4, 0], sizes = [2, 256], strides = [1, 1]} : vector<16x256xf32> to vector<2x256xf32>
    %173 = arith.addf %171, %172 : vector<2x256xf32>
    %174 = arith.truncf %162 : vector<2x64xf32> to vector<2x64xbf16>
    %cst_50 = arith.constant dense<0.000000e+00> : vector<2x256xf32>
    %175 = tpu.matmul %174, %12, %cst_50 {dimension_numbers = #tpu.dot_dimension_numbers<[1], [0], [0], [1], [0, 0, 1, 1], [], []>} : vector<2x64xbf16>, vector<64x256xbf16>, vector<2x256xf32> -> vector<2x256xf32>
    %176 = arith.addf %173, %175 : vector<2x256xf32>
    %177 = math.tanh %176 : vector<2x256xf32>
    %178 = arith.negf %176 : vector<2x256xf32>
    %179 = math.exp %178 : vector<2x256xf32>
    %cst_51 = arith.constant 1.000000e+00 : f32
    %180 = vector.broadcast %cst_51 : f32 to vector<2x256xf32>
    %181 = arith.addf %180, %179 : vector<2x256xf32>
    %182 = arith.divf %180, %181 : vector<2x256xf32>
    %183 = arith.select %18, %177, %182 : vector<2x256xi1>, vector<2x256xf32>
    %184 = vector.extract_strided_slice %183 {offsets = [0, 0], sizes = [2, 64], strides = [1, 1]} : vector<2x256xf32> to vector<2x64xf32>
    %185 = vector.extract_strided_slice %183 {offsets = [0, 64], sizes = [2, 64], strides = [1, 1]} : vector<2x256xf32> to vector<2x64xf32>
    %186 = vector.extract_strided_slice %183 {offsets = [0, 128], sizes = [2, 64], strides = [1, 1]} : vector<2x256xf32> to vector<2x64xf32>
    %187 = vector.extract_strided_slice %183 {offsets = [0, 192], sizes = [2, 64], strides = [1, 1]} : vector<2x256xf32> to vector<2x64xf32>
    %188 = arith.mulf %185, %160 : vector<2x64xf32>
    %189 = arith.mulf %184, %186 : vector<2x64xf32>
    %190 = arith.addf %188, %189 : vector<2x64xf32>
    %191 = math.tanh %190 : vector<2x64xf32>
    %192 = arith.mulf %187, %191 : vector<2x64xf32>
    %193 = vector.extract_strided_slice %192 {offsets = [0, 0], sizes = [2, 32], strides = [1, 1]} : vector<2x64xf32> to vector<2x32xf32>
    %c5_52 = arith.constant 5 : index
    %c0_53 = arith.constant 0 : index
    %c0_54 = arith.constant 0 : index
    %194 = vector.load %arg7[%c5_52, %c0_53, %c0_54] : memref<8x2x32xf32, #tpu.memory_space<vmem>>, vector<1x2x32xf32>
    %195 = vector.shape_cast %194 : vector<1x2x32xf32> to vector<2x32xf32>
    %196 = vector.shape_cast %193 : vector<2x32xf32> to vector<1x2x32xf32>
    tpu.vector_store %arg7[%c5_52, %c0_53, %c0_54], %196 {strides = array<i32>} : memref<8x2x32xf32, #tpu.memory_space<vmem>>, vector<1x2x32xf32>,
    %197 = vector.extract_strided_slice %192 {offsets = [0, 32], sizes = [2, 32], strides = [1, 1]} : vector<2x64xf32> to vector<2x32xf32>
    %c2_55 = arith.constant 2 : index
    %c0_56 = arith.constant 0 : index
    %c0_57 = arith.constant 0 : index
    %198 = vector.load %arg8[%c2_55, %c0_56, %c0_57] : memref<8x2x32xf32, #tpu.memory_space<vmem>>, vector<1x2x32xf32>
    %199 = vector.shape_cast %198 : vector<1x2x32xf32> to vector<2x32xf32>
    %200 = vector.shape_cast %197 : vector<2x32xf32> to vector<1x2x32xf32>
    tpu.vector_store %arg8[%c2_55, %c0_56, %c0_57], %200 {strides = array<i32>} : memref<8x2x32xf32, #tpu.memory_space<vmem>>, vector<1x2x32xf32>,
    %201 = vector.extract_strided_slice %8 {offsets = [12, 0], sizes = [2, 256], strides = [1, 1]} : vector<16x256xf32> to vector<2x256xf32>
    %202 = vector.extract_strided_slice %11 {offsets = [2, 0], sizes = [2, 256], strides = [1, 1]} : vector<16x256xf32> to vector<2x256xf32>
    %203 = arith.addf %201, %202 : vector<2x256xf32>
    %204 = arith.truncf %192 : vector<2x64xf32> to vector<2x64xbf16>
    %cst_58 = arith.constant dense<0.000000e+00> : vector<2x256xf32>
    %205 = tpu.matmul %204, %12, %cst_58 {dimension_numbers = #tpu.dot_dimension_numbers<[1], [0], [0], [1], [0, 0, 1, 1], [], []>} : vector<2x64xbf16>, vector<64x256xbf16>, vector<2x256xf32> -> vector<2x256xf32>
    %206 = arith.addf %203, %205 : vector<2x256xf32>
    %207 = math.tanh %206 : vector<2x256xf32>
    %208 = arith.negf %206 : vector<2x256xf32>
    %209 = math.exp %208 : vector<2x256xf32>
    %cst_59 = arith.constant 1.000000e+00 : f32
    %210 = vector.broadcast %cst_59 : f32 to vector<2x256xf32>
    %211 = arith.addf %210, %209 : vector<2x256xf32>
    %212 = arith.divf %210, %211 : vector<2x256xf32>
    %213 = arith.select %18, %207, %212 : vector<2x256xi1>, vector<2x256xf32>
    %214 = vector.extract_strided_slice %213 {offsets = [0, 0], sizes = [2, 64], strides = [1, 1]} : vector<2x256xf32> to vector<2x64xf32>
    %215 = vector.extract_strided_slice %213 {offsets = [0, 64], sizes = [2, 64], strides = [1, 1]} : vector<2x256xf32> to vector<2x64xf32>
    %216 = vector.extract_strided_slice %213 {offsets = [0, 128], sizes = [2, 64], strides = [1, 1]} : vector<2x256xf32> to vector<2x64xf32>
    %217 = vector.extract_strided_slice %213 {offsets = [0, 192], sizes = [2, 64], strides = [1, 1]} : vector<2x256xf32> to vector<2x64xf32>
    %218 = arith.mulf %215, %190 : vector<2x64xf32>
    %219 = arith.mulf %214, %216 : vector<2x64xf32>
    %220 = arith.addf %218, %219 : vector<2x64xf32>
    %221 = math.tanh %220 : vector<2x64xf32>
    %222 = arith.mulf %217, %221 : vector<2x64xf32>
    %223 = vector.extract_strided_slice %222 {offsets = [0, 0], sizes = [2, 32], strides = [1, 1]} : vector<2x64xf32> to vector<2x32xf32>
    %c6_60 = arith.constant 6 : index
    %c0_61 = arith.constant 0 : index
    %c0_62 = arith.constant 0 : index
    %224 = vector.load %arg7[%c6_60, %c0_61, %c0_62] : memref<8x2x32xf32, #tpu.memory_space<vmem>>, vector<1x2x32xf32>
    %225 = vector.shape_cast %224 : vector<1x2x32xf32> to vector<2x32xf32>
    %226 = vector.shape_cast %223 : vector<2x32xf32> to vector<1x2x32xf32>
    tpu.vector_store %arg7[%c6_60, %c0_61, %c0_62], %226 {strides = array<i32>} : memref<8x2x32xf32, #tpu.memory_space<vmem>>, vector<1x2x32xf32>,
    %227 = vector.extract_strided_slice %222 {offsets = [0, 32], sizes = [2, 32], strides = [1, 1]} : vector<2x64xf32> to vector<2x32xf32>
    %c1_63 = arith.constant 1 : index
    %c0_64 = arith.constant 0 : index
    %c0_65 = arith.constant 0 : index
    %228 = vector.load %arg8[%c1_63, %c0_64, %c0_65] : memref<8x2x32xf32, #tpu.memory_space<vmem>>, vector<1x2x32xf32>
    %229 = vector.shape_cast %228 : vector<1x2x32xf32> to vector<2x32xf32>
    %230 = vector.shape_cast %227 : vector<2x32xf32> to vector<1x2x32xf32>
    tpu.vector_store %arg8[%c1_63, %c0_64, %c0_65], %230 {strides = array<i32>} : memref<8x2x32xf32, #tpu.memory_space<vmem>>, vector<1x2x32xf32>,
    %231 = vector.extract_strided_slice %8 {offsets = [14, 0], sizes = [2, 256], strides = [1, 1]} : vector<16x256xf32> to vector<2x256xf32>
    %232 = vector.extract_strided_slice %11 {offsets = [0, 0], sizes = [2, 256], strides = [1, 1]} : vector<16x256xf32> to vector<2x256xf32>
    %233 = arith.addf %231, %232 : vector<2x256xf32>
    %234 = arith.truncf %222 : vector<2x64xf32> to vector<2x64xbf16>
    %cst_66 = arith.constant dense<0.000000e+00> : vector<2x256xf32>
    %235 = tpu.matmul %234, %12, %cst_66 {dimension_numbers = #tpu.dot_dimension_numbers<[1], [0], [0], [1], [0, 0, 1, 1], [], []>} : vector<2x64xbf16>, vector<64x256xbf16>, vector<2x256xf32> -> vector<2x256xf32>
    %236 = arith.addf %233, %235 : vector<2x256xf32>
    %237 = math.tanh %236 : vector<2x256xf32>
    %238 = arith.negf %236 : vector<2x256xf32>
    %239 = math.exp %238 : vector<2x256xf32>
    %cst_67 = arith.constant 1.000000e+00 : f32
    %240 = vector.broadcast %cst_67 : f32 to vector<2x256xf32>
    %241 = arith.addf %240, %239 : vector<2x256xf32>
    %242 = arith.divf %240, %241 : vector<2x256xf32>
    %243 = arith.select %18, %237, %242 : vector<2x256xi1>, vector<2x256xf32>
    %244 = vector.extract_strided_slice %243 {offsets = [0, 0], sizes = [2, 64], strides = [1, 1]} : vector<2x256xf32> to vector<2x64xf32>
    %245 = vector.extract_strided_slice %243 {offsets = [0, 64], sizes = [2, 64], strides = [1, 1]} : vector<2x256xf32> to vector<2x64xf32>
    %246 = vector.extract_strided_slice %243 {offsets = [0, 128], sizes = [2, 64], strides = [1, 1]} : vector<2x256xf32> to vector<2x64xf32>
    %247 = vector.extract_strided_slice %243 {offsets = [0, 192], sizes = [2, 64], strides = [1, 1]} : vector<2x256xf32> to vector<2x64xf32>
    %248 = arith.mulf %245, %220 : vector<2x64xf32>
    %249 = arith.mulf %244, %246 : vector<2x64xf32>
    %250 = arith.addf %248, %249 : vector<2x64xf32>
    %251 = math.tanh %250 : vector<2x64xf32>
    %252 = arith.mulf %247, %251 : vector<2x64xf32>
    %253 = vector.extract_strided_slice %252 {offsets = [0, 0], sizes = [2, 32], strides = [1, 1]} : vector<2x64xf32> to vector<2x32xf32>
    %c7_68 = arith.constant 7 : index
    %c0_69 = arith.constant 0 : index
    %c0_70 = arith.constant 0 : index
    %254 = vector.load %arg7[%c7_68, %c0_69, %c0_70] : memref<8x2x32xf32, #tpu.memory_space<vmem>>, vector<1x2x32xf32>
    %255 = vector.shape_cast %254 : vector<1x2x32xf32> to vector<2x32xf32>
    %256 = vector.shape_cast %253 : vector<2x32xf32> to vector<1x2x32xf32>
    tpu.vector_store %arg7[%c7_68, %c0_69, %c0_70], %256 {strides = array<i32>} : memref<8x2x32xf32, #tpu.memory_space<vmem>>, vector<1x2x32xf32>,
    %257 = vector.extract_strided_slice %252 {offsets = [0, 32], sizes = [2, 32], strides = [1, 1]} : vector<2x64xf32> to vector<2x32xf32>
    %c0_71 = arith.constant 0 : index
    %c0_72 = arith.constant 0 : index
    %c0_73 = arith.constant 0 : index
    %258 = vector.load %arg8[%c0_71, %c0_72, %c0_73] : memref<8x2x32xf32, #tpu.memory_space<vmem>>, vector<1x2x32xf32>
    %259 = vector.shape_cast %258 : vector<1x2x32xf32> to vector<2x32xf32>
    %260 = vector.shape_cast %257 : vector<2x32xf32> to vector<1x2x32xf32>
    tpu.vector_store %arg8[%c0_71, %c0_72, %c0_73], %260 {strides = array<i32>} : memref<8x2x32xf32, #tpu.memory_space<vmem>>, vector<1x2x32xf32>,
    %c0_74 = arith.constant 0 : index
    %c0_75 = arith.constant 0 : index
    %261 = vector.load %arg9[%c0_74, %c0_75] : memref<2x64xf32, #tpu.memory_space<vmem>>, vector<2x64xf32>
    tpu.vector_store %arg9[%c0_74, %c0_75], %252 {strides = array<i32>} : memref<2x64xf32, #tpu.memory_space<vmem>>, vector<2x64xf32>,
    %c0_76 = arith.constant 0 : index
    %c0_77 = arith.constant 0 : index
    %262 = vector.load %arg10[%c0_76, %c0_77] : memref<2x64xf32, #tpu.memory_space<vmem>>, vector<2x64xf32>
    tpu.vector_store %arg10[%c0_76, %c0_77], %250 {strides = array<i32>} : memref<2x64xf32, #tpu.memory_space<vmem>>, vector<2x64xf32>,
    return
  }
  func.func @transform_0(%arg0: i32) -> (i32, i32) {
    %c0_i32 = arith.constant 0 : i32
    %c0_i32_0 = arith.constant 0 : i32
    return %arg0, %c0_i32 : i32, i32
  }
  func.func @transform_1(%arg0: i32) -> (i32, i32) {
    %c0_i32 = arith.constant 0 : i32
    %0 = arith.subi %c0_i32, %arg0 : i32
    %c0_i32_0 = arith.constant 0 : i32
    %c0_i32_1 = arith.constant 0 : i32
    return %0, %c0_i32_0 : i32, i32
  }
  func.func @transform_2(%arg0: i32) -> (i32, i32) {
    %c0_i32 = arith.constant 0 : i32
    %c0_i32_0 = arith.constant 0 : i32
    %c0_i32_1 = arith.constant 0 : i32
    return %c0_i32, %c0_i32_0 : i32, i32
  }
  func.func @transform_3(%arg0: i32) -> (i32, i32) {
    %c0_i32 = arith.constant 0 : i32
    %c0_i32_0 = arith.constant 0 : i32
    %c0_i32_1 = arith.constant 0 : i32
    return %c0_i32, %c0_i32_0 : i32, i32
  }
  func.func @transform_4(%arg0: i32) -> (i32, i32) {
    %c0_i32 = arith.constant 0 : i32
    %c0_i32_0 = arith.constant 0 : i32
    %c0_i32_1 = arith.constant 0 : i32
    return %c0_i32, %c0_i32_0 : i32, i32
  }
  func.func @transform_5(%arg0: i32) -> (i32, i32) {
    %c0_i32 = arith.constant 0 : i32
    %c0_i32_0 = arith.constant 0 : i32
    %c0_i32_1 = arith.constant 0 : i32
    return %c0_i32, %c0_i32_0 : i32, i32
  }
  func.func @transform_6(%arg0: i32) -> (i32, i32, i32) {
    %c0_i32 = arith.constant 0 : i32
    %c0_i32_0 = arith.constant 0 : i32
    %c0_i32_1 = arith.constant 0 : i32
    return %arg0, %c0_i32, %c0_i32_0 : i32, i32, i32
  }
  func.func @transform_7(%arg0: i32) -> (i32, i32, i32) {
    %c0_i32 = arith.constant 0 : i32
    %0 = arith.subi %c0_i32, %arg0 : i32
    %c0_i32_0 = arith.constant 0 : i32
    %c0_i32_1 = arith.constant 0 : i32
    %c0_i32_2 = arith.constant 0 : i32
    return %0, %c0_i32_0, %c0_i32_1 : i32, i32, i32
  }
}

module attributes {stable_mosaic.version = 11 : i64} {
  func.func @_bilstm_kernel(%arg0: i32, %arg1: memref<16x64xbf16, #tpu.memory_space<vmem>>, %arg2: memref<16x64xbf16, #tpu.memory_space<vmem>>, %arg3: memref<64x256xbf16, #tpu.memory_space<vmem>>, %arg4: memref<64x256xbf16, #tpu.memory_space<vmem>>, %arg5: memref<64x256xbf16, #tpu.memory_space<vmem>>, %arg6: memref<1x256xf32, #tpu.memory_space<vmem>>, %arg7: memref<8x2x32xf32, #tpu.memory_space<vmem>>, %arg8: memref<8x2x32xf32, #tpu.memory_space<vmem>>, %arg9: memref<2x64xf32, #tpu.memory_space<vmem>>, %arg10: memref<2x64xf32, #tpu.memory_space<vmem>>) attributes {dimension_semantics = [#tpu.dimension_semantics<arbitrary>], iteration_bounds = array<i64: 1>, scalar_prefetch = 0 : i64, scratch_operands = 2 : i64, tpu.core_type = #tpu.core_type<tc>, window_params = [{transform_indices = @transform_0, window_bounds = array<i64: 16, 64>}, {transform_indices = @transform_1, window_bounds = array<i64: 16, 64>}, {pipeline_mode = #tpu.pipeline_mode<synchronous>, transform_indices = @transform_2, window_bounds = array<i64: 64, 256>}, {pipeline_mode = #tpu.pipeline_mode<synchronous>, transform_indices = @transform_3, window_bounds = array<i64: 64, 256>}, {pipeline_mode = #tpu.pipeline_mode<synchronous>, transform_indices = @transform_4, window_bounds = array<i64: 64, 256>}, {pipeline_mode = #tpu.pipeline_mode<synchronous>, transform_indices = @transform_5, window_bounds = array<i64: 1, 256>}, {transform_indices = @transform_6, window_bounds = array<i64: 8, 2, 32>}, {transform_indices = @transform_7, window_bounds = array<i64: 8, 2, 32>}]} {
    %c0_i32 = arith.constant 0 : i32
    %0 = arith.cmpi eq, %arg0, %c0_i32 : i32
    %1 = arith.extui %0 : i1 to i32
    %c0_i32_0 = arith.constant 0 : i32
    %2 = arith.cmpi ne, %1, %c0_i32_0 : i32
    scf.if %2 {
      %cst_78 = arith.constant 0.000000e+00 : f32
      %263 = vector.broadcast %cst_78 : f32 to vector<2x64xf32>
      %c0_79 = arith.constant 0 : index
      %c0_80 = arith.constant 0 : index
      %264 = vector.load %arg9[%c0_79, %c0_80] : memref<2x64xf32, #tpu.memory_space<vmem>>, vector<2x64xf32>
      tpu.vector_store %arg9[%c0_79, %c0_80], %263 {strides = array<i32>} : memref<2x64xf32, #tpu.memory_space<vmem>>, vector<2x64xf32>,
      %cst_81 = arith.constant 0.000000e+00 : f32
      %265 = vector.broadcast %cst_81 : f32 to vector<2x64xf32>
      %c0_82 = arith.constant 0 : index
      %c0_83 = arith.constant 0 : index
      %266 = vector.load %arg10[%c0_82, %c0_83] : memref<2x64xf32, #tpu.memory_space<vmem>>, vector<2x64xf32>
      tpu.vector_store %arg10[%c0_82, %c0_83], %265 {strides = array<i32>} : memref<2x64xf32, #tpu.memory_space<vmem>>, vector<2x64xf32>,
    } else {
    }
    %c0 = arith.constant 0 : index
    %c0_1 = arith.constant 0 : index
    %3 = vector.load %arg1[%c0, %c0_1] : memref<16x64xbf16, #tpu.memory_space<vmem>>, vector<16x64xbf16>
    %c0_2 = arith.constant 0 : index
    %c0_3 = arith.constant 0 : index
    %4 = vector.load %arg3[%c0_2, %c0_3] : memref<64x256xbf16, #tpu.memory_space<vmem>>, vector<64x256xbf16>
    %cst = arith.constant dense<0.000000e+00> : vector<16x256xf32>
    %5 = tpu.matmul %3, %4, %cst {dimension_numbers = #tpu.dot_dimension_numbers<[1], [0], [0], [1], [0, 0, 1, 1], [], []>} : vector<16x64xbf16>, vector<64x256xbf16>, vector<16x256xf32> -> vector<16x256xf32>
    %c0_4 = arith.constant 0 : index
    %c0_5 = arith.constant 0 : index
    %6 = vector.load %arg6[%c0_4, %c0_5] : memref<1x256xf32, #tpu.memory_space<vmem>>, vector<1x256xf32>
    %7 = vector.broadcast %6 : vector<1x256xf32> to vector<16x256xf32>
    %8 = arith.addf %5, %7 : vector<16x256xf32>
    %c0_6 = arith.constant 0 : index
    %c0_7 = arith.constant 0 : index
    %9 = vector.load %arg2[%c0_6, %c0_7] : memref<16x64xbf16, #tpu.memory_space<vmem>>, vector<16x64xbf16>
    %c0_8 = arith.constant 0 : index
    %c0_9 = arith.constant 0 : index
    %10 = vector.load %arg4[%c0_8, %c0_9] : memref<64x256xbf16, #tpu.memory_space<vmem>>, vector<64x256xbf16>
    %cst_10 = arith.constant dense<0.000000e+00> : vector<16x256xf32>
    %11 = tpu.matmul %9, %10, %cst_10 {dimension_numbers = #tpu.dot_dimension_numbers<[1], [0], [0], [1], [0, 0, 1, 1], [], []>} : vector<16x64xbf16>, vector<64x256xbf16>, vector<16x256xf32> -> vector<16x256xf32>
    %c0_11 = arith.constant 0 : index
    %c0_12 = arith.constant 0 : index
    %12 = vector.load %arg5[%c0_11, %c0_12] : memref<64x256xbf16, #tpu.memory_space<vmem>>, vector<64x256xbf16>
    %13 = tpu.iota {dimensions = array<i32: 1>} : vector<2x256xi32>
    %c128_i32 = arith.constant 128 : i32
    %14 = vector.broadcast %c128_i32 : i32 to vector<2x256xi32>
    %15 = arith.cmpi sge, %13, %14 : vector<2x256xi32>
    %c192_i32 = arith.constant 192 : i32
    %16 = vector.broadcast %c192_i32 : i32 to vector<2x256xi32>
    %17 = arith.cmpi slt, %13, %16 : vector<2x256xi32>
    %18 = arith.andi %15, %17 : vector<2x256xi1>
    %c0_13 = arith.constant 0 : index
    %c0_14 = arith.constant 0 : index
    %19 = vector.load %arg9[%c0_13, %c0_14] : memref<2x64xf32, #tpu.memory_space<vmem>>, vector<2x64xf32>
    %c0_15 = arith.constant 0 : index
    %c0_16 = arith.constant 0 : index
    %20 = vector.load %arg10[%c0_15, %c0_16] : memref<2x64xf32, #tpu.memory_space<vmem>>, vector<2x64xf32>
    %21 = vector.extract_strided_slice %8 {offsets = [0, 0], sizes = [2, 256], strides = [1, 1]} : vector<16x256xf32> to vector<2x256xf32>
    %22 = vector.extract_strided_slice %11 {offsets = [14, 0], sizes = [2, 256], strides = [1, 1]} : vector<16x256xf32> to vector<2x256xf32>
    %23 = arith.addf %21, %22 : vector<2x256xf32>
    %24 = arith.truncf %19 : vector<2x64xf32> to vector<2x64xbf16>
    %cst_17 = arith.constant dense<0.000000e+00> : vector<2x256xf32>
    %25 = tpu.matmul %24, %12, %cst_17 {dimension_numbers = #tpu.dot_dimension_numbers<[1], [0], [0], [1], [0, 0, 1, 1], [], []>} : vector<2x64xbf16>, vector<64x256xbf16>, vector<2x256xf32> -> vector<2x256xf32>
    %26 = arith.addf %23, %25 : vector<2x256xf32>
    %27 = math.tanh %26 : vector<2x256xf32>
    %28 = arith.negf %26 : vector<2x256xf32>
    %29 = math.exp %28 : vector<2x256xf32>
    %cst_18 = arith.constant 1.000000e+00 : f32
    %30 = vector.broadcast %cst_18 : f32 to vector<2x256xf32>
    %31 = arith.addf %30, %29 : vector<2x256xf32>
    %32 = arith.divf %30, %31 : vector<2x256xf32>
    %33 = arith.select %18, %27, %32 : vector<2x256xi1>, vector<2x256xf32>
    %34 = vector.extract_strided_slice %33 {offsets = [0, 0], sizes = [2, 64], strides = [1, 1]} : vector<2x256xf32> to vector<2x64xf32>
    %35 = vector.extract_strided_slice %33 {offsets = [0, 64], sizes = [2, 64], strides = [1, 1]} : vector<2x256xf32> to vector<2x64xf32>
    %36 = vector.extract_strided_slice %33 {offsets = [0, 128], sizes = [2, 64], strides = [1, 1]} : vector<2x256xf32> to vector<2x64xf32>
    %37 = vector.extract_strided_slice %33 {offsets = [0, 192], sizes = [2, 64], strides = [1, 1]} : vector<2x256xf32> to vector<2x64xf32>
    %38 = arith.mulf %35, %20 : vector<2x64xf32>
    %39 = arith.mulf %34, %36 : vector<2x64xf32>
    %40 = arith.addf %38, %39 : vector<2x64xf32>
    %41 = math.tanh %40 : vector<2x64xf32>
    %42 = arith.mulf %37, %41 : vector<2x64xf32>
    %43 = vector.extract_strided_slice %42 {offsets = [0, 0], sizes = [2, 32], strides = [1, 1]} : vector<2x64xf32> to vector<2x32xf32>
    %c0_19 = arith.constant 0 : index
    %c0_20 = arith.constant 0 : index
    %c0_21 = arith.constant 0 : index
    %44 = vector.load %arg7[%c0_19, %c0_20, %c0_21] : memref<8x2x32xf32, #tpu.memory_space<vmem>>, vector<1x2x32xf32>
    %45 = vector.shape_cast %44 : vector<1x2x32xf32> to vector<2x32xf32>
    %46 = vector.shape_cast %43 : vector<2x32xf32> to vector<1x2x32xf32>
    tpu.vector_store %arg7[%c0_19, %c0_20, %c0_21], %46 {strides = array<i32>} : memref<8x2x32xf32, #tpu.memory_space<vmem>>, vector<1x2x32xf32>,
    %47 = vector.extract_strided_slice %42 {offsets = [0, 32], sizes = [2, 32], strides = [1, 1]} : vector<2x64xf32> to vector<2x32xf32>
    %c7 = arith.constant 7 : index
    %c0_22 = arith.constant 0 : index
    %c0_23 = arith.constant 0 : index
    %48 = vector.load %arg8[%c7, %c0_22, %c0_23] : memref<8x2x32xf32, #tpu.memory_space<vmem>>, vector<1x2x32xf32>
    %49 = vector.shape_cast %48 : vector<1x2x32xf32> to vector<2x32xf32>
    %50 = vector.shape_cast %47 : vector<2x32xf32> to vector<1x2x32xf32>
    tpu.vector_store %arg8[%c7, %c0_22, %c0_23], %50 {strides = array<i32>} : memref<8x2x32xf32, #tpu.memory_space<vmem>>, vector<1x2x32xf32>,
    %51 = vector.extract_strided_slice %8 {offsets = [2, 0], sizes = [2, 256], strides = [1, 1]} : vector<16x256xf32> to vector<2x256xf32>
    %52 = vector.extract_strided_slice %11 {offsets = [12, 0], sizes = [2, 256], strides = [1, 1]} : vector<16x256xf32> to vector<2x256xf32>
    %53 = arith.addf %51, %52 : vector<2x256xf32>
    %54 = arith.truncf %42 : vector<2x64xf32> to vector<2x64xbf16>
    %cst_24 = arith.constant dense<0.000000e+00> : vector<2x256xf32>
    %55 = tpu.matmul %54, %12, %cst_24 {dimension_numbers = #tpu.dot_dimension_numbers<[1], [0], [0], [1], [0, 0, 1, 1], [], []>} : vector<2x64xbf16>, vector<64x256xbf16>, vector<2x256xf32> -> vector<2x256xf32>
    %56 = arith.addf %53, %55 : vector<2x256xf32>
    %57 = math.tanh %56 : vector<2x256xf32>
    %58 = arith.negf %56 : vector<2x256xf32>
    %59 = math.exp %58 : vector<2x256xf32>
    %cst_25 = arith.constant 1.000000e+00 : f32
    %60 = vector.broadcast %cst_25 : f32 to vector<2x256xf32>
    %61 = arith.addf %60, %59 : vector<2x256xf32>
    %62 = arith.divf %60, %61 : vector<2x256xf32>
    %63 = arith.select %18, %57, %62 : vector<2x256xi1>, vector<2x256xf32>
    %64 = vector.extract_strided_slice %63 {offsets = [0, 0], sizes = [2, 64], strides = [1, 1]} : vector<2x256xf32> to vector<2x64xf32>
    %65 = vector.extract_strided_slice %63 {offsets = [0, 64], sizes = [2, 64], strides = [1, 1]} : vector<2x256xf32> to vector<2x64xf32>
    %66 = vector.extract_strided_slice %63 {offsets = [0, 128], sizes = [2, 64], strides = [1, 1]} : vector<2x256xf32> to vector<2x64xf32>
    %67 = vector.extract_strided_slice %63 {offsets = [0, 192], sizes = [2, 64], strides = [1, 1]} : vector<2x256xf32> to vector<2x64xf32>
    %68 = arith.mulf %65, %40 : vector<2x64xf32>
    %69 = arith.mulf %64, %66 : vector<2x64xf32>
    %70 = arith.addf %68, %69 : vector<2x64xf32>
    %71 = math.tanh %70 : vector<2x64xf32>
    %72 = arith.mulf %67, %71 : vector<2x64xf32>
    %73 = vector.extract_strided_slice %72 {offsets = [0, 0], sizes = [2, 32], strides = [1, 1]} : vector<2x64xf32> to vector<2x32xf32>
    %c1 = arith.constant 1 : index
    %c0_26 = arith.constant 0 : index
    %c0_27 = arith.constant 0 : index
    %74 = vector.load %arg7[%c1, %c0_26, %c0_27] : memref<8x2x32xf32, #tpu.memory_space<vmem>>, vector<1x2x32xf32>
    %75 = vector.shape_cast %74 : vector<1x2x32xf32> to vector<2x32xf32>
    %76 = vector.shape_cast %73 : vector<2x32xf32> to vector<1x2x32xf32>
    tpu.vector_store %arg7[%c1, %c0_26, %c0_27], %76 {strides = array<i32>} : memref<8x2x32xf32, #tpu.memory_space<vmem>>, vector<1x2x32xf32>,
    %77 = vector.extract_strided_slice %72 {offsets = [0, 32], sizes = [2, 32], strides = [1, 1]} : vector<2x64xf32> to vector<2x32xf32>
    %c6 = arith.constant 6 : index
    %c0_28 = arith.constant 0 : index
    %c0_29 = arith.constant 0 : index
    %78 = vector.load %arg8[%c6, %c0_28, %c0_29] : memref<8x2x32xf32, #tpu.memory_space<vmem>>, vector<1x2x32xf32>
    %79 = vector.shape_cast %78 : vector<1x2x32xf32> to vector<2x32xf32>
    %80 = vector.shape_cast %77 : vector<2x32xf32> to vector<1x2x32xf32>
    tpu.vector_store %arg8[%c6, %c0_28, %c0_29], %80 {strides = array<i32>} : memref<8x2x32xf32, #tpu.memory_space<vmem>>, vector<1x2x32xf32>,
    %81 = vector.extract_strided_slice %8 {offsets = [4, 0], sizes = [2, 256], strides = [1, 1]} : vector<16x256xf32> to vector<2x256xf32>
    %82 = vector.extract_strided_slice %11 {offsets = [10, 0], sizes = [2, 256], strides = [1, 1]} : vector<16x256xf32> to vector<2x256xf32>
    %83 = arith.addf %81, %82 : vector<2x256xf32>
    %84 = arith.truncf %72 : vector<2x64xf32> to vector<2x64xbf16>
    %cst_30 = arith.constant dense<0.000000e+00> : vector<2x256xf32>
    %85 = tpu.matmul %84, %12, %cst_30 {dimension_numbers = #tpu.dot_dimension_numbers<[1], [0], [0], [1], [0, 0, 1, 1], [], []>} : vector<2x64xbf16>, vector<64x256xbf16>, vector<2x256xf32> -> vector<2x256xf32>
    %86 = arith.addf %83, %85 : vector<2x256xf32>
    %87 = math.tanh %86 : vector<2x256xf32>
    %88 = arith.negf %86 : vector<2x256xf32>
    %89 = math.exp %88 : vector<2x256xf32>
    %cst_31 = arith.constant 1.000000e+00 : f32
    %90 = vector.broadcast %cst_31 : f32 to vector<2x256xf32>
    %91 = arith.addf %90, %89 : vector<2x256xf32>
    %92 = arith.divf %90, %91 : vector<2x256xf32>
    %93 = arith.select %18, %87, %92 : vector<2x256xi1>, vector<2x256xf32>
    %94 = vector.extract_strided_slice %93 {offsets = [0, 0], sizes = [2, 64], strides = [1, 1]} : vector<2x256xf32> to vector<2x64xf32>
    %95 = vector.extract_strided_slice %93 {offsets = [0, 64], sizes = [2, 64], strides = [1, 1]} : vector<2x256xf32> to vector<2x64xf32>
    %96 = vector.extract_strided_slice %93 {offsets = [0, 128], sizes = [2, 64], strides = [1, 1]} : vector<2x256xf32> to vector<2x64xf32>
    %97 = vector.extract_strided_slice %93 {offsets = [0, 192], sizes = [2, 64], strides = [1, 1]} : vector<2x256xf32> to vector<2x64xf32>
    %98 = arith.mulf %95, %70 : vector<2x64xf32>
    %99 = arith.mulf %94, %96 : vector<2x64xf32>
    %100 = arith.addf %98, %99 : vector<2x64xf32>
    %101 = math.tanh %100 : vector<2x64xf32>
    %102 = arith.mulf %97, %101 : vector<2x64xf32>
    %103 = vector.extract_strided_slice %102 {offsets = [0, 0], sizes = [2, 32], strides = [1, 1]} : vector<2x64xf32> to vector<2x32xf32>
    %c2 = arith.constant 2 : index
    %c0_32 = arith.constant 0 : index
    %c0_33 = arith.constant 0 : index
    %104 = vector.load %arg7[%c2, %c0_32, %c0_33] : memref<8x2x32xf32, #tpu.memory_space<vmem>>, vector<1x2x32xf32>
    %105 = vector.shape_cast %104 : vector<1x2x32xf32> to vector<2x32xf32>
    %106 = vector.shape_cast %103 : vector<2x32xf32> to vector<1x2x32xf32>
    tpu.vector_store %arg7[%c2, %c0_32, %c0_33], %106 {strides = array<i32>} : memref<8x2x32xf32, #tpu.memory_space<vmem>>, vector<1x2x32xf32>,
    %107 = vector.extract_strided_slice %102 {offsets = [0, 32], sizes = [2, 32], strides = [1, 1]} : vector<2x64xf32> to vector<2x32xf32>
    %c5 = arith.constant 5 : index
    %c0_34 = arith.constant 0 : index
    %c0_35 = arith.constant 0 : index
    %108 = vector.load %arg8[%c5, %c0_34, %c0_35] : memref<8x2x32xf32, #tpu.memory_space<vmem>>, vector<1x2x32xf32>
    %109 = vector.shape_cast %108 : vector<1x2x32xf32> to vector<2x32xf32>
    %110 = vector.shape_cast %107 : vector<2x32xf32> to vector<1x2x32xf32>
    tpu.vector_store %arg8[%c5, %c0_34, %c0_35], %110 {strides = array<i32>} : memref<8x2x32xf32, #tpu.memory_space<vmem>>, vector<1x2x32xf32>,
    %111 = vector.extract_strided_slice %8 {offsets = [6, 0], sizes = [2, 256], strides = [1, 1]} : vector<16x256xf32> to vector<2x256xf32>
    %112 = vector.extract_strided_slice %11 {offsets = [8, 0], sizes = [2, 256], strides = [1, 1]} : vector<16x256xf32> to vector<2x256xf32>
    %113 = arith.addf %111, %112 : vector<2x256xf32>
    %114 = arith.truncf %102 : vector<2x64xf32> to vector<2x64xbf16>
    %cst_36 = arith.constant dense<0.000000e+00> : vector<2x256xf32>
    %115 = tpu.matmul %114, %12, %cst_36 {dimension_numbers = #tpu.dot_dimension_numbers<[1], [0], [0], [1], [0, 0, 1, 1], [], []>} : vector<2x64xbf16>, vector<64x256xbf16>, vector<2x256xf32> -> vector<2x256xf32>
    %116 = arith.addf %113, %115 : vector<2x256xf32>
    %117 = math.tanh %116 : vector<2x256xf32>
    %118 = arith.negf %116 : vector<2x256xf32>
    %119 = math.exp %118 : vector<2x256xf32>
    %cst_37 = arith.constant 1.000000e+00 : f32
    %120 = vector.broadcast %cst_37 : f32 to vector<2x256xf32>
    %121 = arith.addf %120, %119 : vector<2x256xf32>
    %122 = arith.divf %120, %121 : vector<2x256xf32>
    %123 = arith.select %18, %117, %122 : vector<2x256xi1>, vector<2x256xf32>
    %124 = vector.extract_strided_slice %123 {offsets = [0, 0], sizes = [2, 64], strides = [1, 1]} : vector<2x256xf32> to vector<2x64xf32>
    %125 = vector.extract_strided_slice %123 {offsets = [0, 64], sizes = [2, 64], strides = [1, 1]} : vector<2x256xf32> to vector<2x64xf32>
    %126 = vector.extract_strided_slice %123 {offsets = [0, 128], sizes = [2, 64], strides = [1, 1]} : vector<2x256xf32> to vector<2x64xf32>
    %127 = vector.extract_strided_slice %123 {offsets = [0, 192], sizes = [2, 64], strides = [1, 1]} : vector<2x256xf32> to vector<2x64xf32>
    %128 = arith.mulf %125, %100 : vector<2x64xf32>
    %129 = arith.mulf %124, %126 : vector<2x64xf32>
    %130 = arith.addf %128, %129 : vector<2x64xf32>
    %131 = math.tanh %130 : vector<2x64xf32>
    %132 = arith.mulf %127, %131 : vector<2x64xf32>
    %133 = vector.extract_strided_slice %132 {offsets = [0, 0], sizes = [2, 32], strides = [1, 1]} : vector<2x64xf32> to vector<2x32xf32>
    %c3 = arith.constant 3 : index
    %c0_38 = arith.constant 0 : index
    %c0_39 = arith.constant 0 : index
    %134 = vector.load %arg7[%c3, %c0_38, %c0_39] : memref<8x2x32xf32, #tpu.memory_space<vmem>>, vector<1x2x32xf32>
    %135 = vector.shape_cast %134 : vector<1x2x32xf32> to vector<2x32xf32>
    %136 = vector.shape_cast %133 : vector<2x32xf32> to vector<1x2x32xf32>
    tpu.vector_store %arg7[%c3, %c0_38, %c0_39], %136 {strides = array<i32>} : memref<8x2x32xf32, #tpu.memory_space<vmem>>, vector<1x2x32xf32>,
    %137 = vector.extract_strided_slice %132 {offsets = [0, 32], sizes = [2, 32], strides = [1, 1]} : vector<2x64xf32> to vector<2x32xf32>
    %c4 = arith.constant 4 : index
    %c0_40 = arith.constant 0 : index
    %c0_41 = arith.constant 0 : index
    %138 = vector.load %arg8[%c4, %c0_40, %c0_41] : memref<8x2x32xf32, #tpu.memory_space<vmem>>, vector<1x2x32xf32>
    %139 = vector.shape_cast %138 : vector<1x2x32xf32> to vector<2x32xf32>
    %140 = vector.shape_cast %137 : vector<2x32xf32> to vector<1x2x32xf32>
    tpu.vector_store %arg8[%c4, %c0_40, %c0_41], %140 {strides = array<i32>} : memref<8x2x32xf32, #tpu.memory_space<vmem>>, vector<1x2x32xf32>,
    %141 = vector.extract_strided_slice %8 {offsets = [8, 0], sizes = [2, 256], strides = [1, 1]} : vector<16x256xf32> to vector<2x256xf32>
    %142 = vector.extract_strided_slice %11 {offsets = [6, 0], sizes = [2, 256], strides = [1, 1]} : vector<16x256xf32> to vector<2x256xf32>
    %143 = arith.addf %141, %142 : vector<2x256xf32>
    %144 = arith.truncf %132 : vector<2x64xf32> to vector<2x64xbf16>
    %cst_42 = arith.constant dense<0.000000e+00> : vector<2x256xf32>
    %145 = tpu.matmul %144, %12, %cst_42 {dimension_numbers = #tpu.dot_dimension_numbers<[1], [0], [0], [1], [0, 0, 1, 1], [], []>} : vector<2x64xbf16>, vector<64x256xbf16>, vector<2x256xf32> -> vector<2x256xf32>
    %146 = arith.addf %143, %145 : vector<2x256xf32>
    %147 = math.tanh %146 : vector<2x256xf32>
    %148 = arith.negf %146 : vector<2x256xf32>
    %149 = math.exp %148 : vector<2x256xf32>
    %cst_43 = arith.constant 1.000000e+00 : f32
    %150 = vector.broadcast %cst_43 : f32 to vector<2x256xf32>
    %151 = arith.addf %150, %149 : vector<2x256xf32>
    %152 = arith.divf %150, %151 : vector<2x256xf32>
    %153 = arith.select %18, %147, %152 : vector<2x256xi1>, vector<2x256xf32>
    %154 = vector.extract_strided_slice %153 {offsets = [0, 0], sizes = [2, 64], strides = [1, 1]} : vector<2x256xf32> to vector<2x64xf32>
    %155 = vector.extract_strided_slice %153 {offsets = [0, 64], sizes = [2, 64], strides = [1, 1]} : vector<2x256xf32> to vector<2x64xf32>
    %156 = vector.extract_strided_slice %153 {offsets = [0, 128], sizes = [2, 64], strides = [1, 1]} : vector<2x256xf32> to vector<2x64xf32>
    %157 = vector.extract_strided_slice %153 {offsets = [0, 192], sizes = [2, 64], strides = [1, 1]} : vector<2x256xf32> to vector<2x64xf32>
    %158 = arith.mulf %155, %130 : vector<2x64xf32>
    %159 = arith.mulf %154, %156 : vector<2x64xf32>
    %160 = arith.addf %158, %159 : vector<2x64xf32>
    %161 = math.tanh %160 : vector<2x64xf32>
    %162 = arith.mulf %157, %161 : vector<2x64xf32>
    %163 = vector.extract_strided_slice %162 {offsets = [0, 0], sizes = [2, 32], strides = [1, 1]} : vector<2x64xf32> to vector<2x32xf32>
    %c4_44 = arith.constant 4 : index
    %c0_45 = arith.constant 0 : index
    %c0_46 = arith.constant 0 : index
    %164 = vector.load %arg7[%c4_44, %c0_45, %c0_46] : memref<8x2x32xf32, #tpu.memory_space<vmem>>, vector<1x2x32xf32>
    %165 = vector.shape_cast %164 : vector<1x2x32xf32> to vector<2x32xf32>
    %166 = vector.shape_cast %163 : vector<2x32xf32> to vector<1x2x32xf32>
    tpu.vector_store %arg7[%c4_44, %c0_45, %c0_46], %166 {strides = array<i32>} : memref<8x2x32xf32, #tpu.memory_space<vmem>>, vector<1x2x32xf32>,
    %167 = vector.extract_strided_slice %162 {offsets = [0, 32], sizes = [2, 32], strides = [1, 1]} : vector<2x64xf32> to vector<2x32xf32>
    %c3_47 = arith.constant 3 : index
    %c0_48 = arith.constant 0 : index
    %c0_49 = arith.constant 0 : index
    %168 = vector.load %arg8[%c3_47, %c0_48, %c0_49] : memref<8x2x32xf32, #tpu.memory_space<vmem>>, vector<1x2x32xf32>
    %169 = vector.shape_cast %168 : vector<1x2x32xf32> to vector<2x32xf32>
    %170 = vector.shape_cast %167 : vector<2x32xf32> to vector<1x2x32xf32>
    tpu.vector_store %arg8[%c3_47, %c0_48, %c0_49], %170 {strides = array<i32>} : memref<8x2x32xf32, #tpu.memory_space<vmem>>, vector<1x2x32xf32>,
    %171 = vector.extract_strided_slice %8 {offsets = [10, 0], sizes = [2, 256], strides = [1, 1]} : vector<16x256xf32> to vector<2x256xf32>
    %172 = vector.extract_strided_slice %11 {offsets = [4, 0], sizes = [2, 256], strides = [1, 1]} : vector<16x256xf32> to vector<2x256xf32>
    %173 = arith.addf %171, %172 : vector<2x256xf32>
    %174 = arith.truncf %162 : vector<2x64xf32> to vector<2x64xbf16>
    %cst_50 = arith.constant dense<0.000000e+00> : vector<2x256xf32>
    %175 = tpu.matmul %174, %12, %cst_50 {dimension_numbers = #tpu.dot_dimension_numbers<[1], [0], [0], [1], [0, 0, 1, 1], [], []>} : vector<2x64xbf16>, vector<64x256xbf16>, vector<2x256xf32> -> vector<2x256xf32>
    %176 = arith.addf %173, %175 : vector<2x256xf32>
    %177 = math.tanh %176 : vector<2x256xf32>
    %178 = arith.negf %176 : vector<2x256xf32>
    %179 = math.exp %178 : vector<2x256xf32>
    %cst_51 = arith.constant 1.000000e+00 : f32
    %180 = vector.broadcast %cst_51 : f32 to vector<2x256xf32>
    %181 = arith.addf %180, %179 : vector<2x256xf32>
    %182 = arith.divf %180, %181 : vector<2x256xf32>
    %183 = arith.select %18, %177, %182 : vector<2x256xi1>, vector<2x256xf32>
    %184 = vector.extract_strided_slice %183 {offsets = [0, 0], sizes = [2, 64], strides = [1, 1]} : vector<2x256xf32> to vector<2x64xf32>
    %185 = vector.extract_strided_slice %183 {offsets = [0, 64], sizes = [2, 64], strides = [1, 1]} : vector<2x256xf32> to vector<2x64xf32>
    %186 = vector.extract_strided_slice %183 {offsets = [0, 128], sizes = [2, 64], strides = [1, 1]} : vector<2x256xf32> to vector<2x64xf32>
    %187 = vector.extract_strided_slice %183 {offsets = [0, 192], sizes = [2, 64], strides = [1, 1]} : vector<2x256xf32> to vector<2x64xf32>
    %188 = arith.mulf %185, %160 : vector<2x64xf32>
    %189 = arith.mulf %184, %186 : vector<2x64xf32>
    %190 = arith.addf %188, %189 : vector<2x64xf32>
    %191 = math.tanh %190 : vector<2x64xf32>
    %192 = arith.mulf %187, %191 : vector<2x64xf32>
    %193 = vector.extract_strided_slice %192 {offsets = [0, 0], sizes = [2, 32], strides = [1, 1]} : vector<2x64xf32> to vector<2x32xf32>
    %c5_52 = arith.constant 5 : index
    %c0_53 = arith.constant 0 : index
    %c0_54 = arith.constant 0 : index
    %194 = vector.load %arg7[%c5_52, %c0_53, %c0_54] : memref<8x2x32xf32, #tpu.memory_space<vmem>>, vector<1x2x32xf32>
    %195 = vector.shape_cast %194 : vector<1x2x32xf32> to vector<2x32xf32>
    %196 = vector.shape_cast %193 : vector<2x32xf32> to vector<1x2x32xf32>
    tpu.vector_store %arg7[%c5_52, %c0_53, %c0_54], %196 {strides = array<i32>} : memref<8x2x32xf32, #tpu.memory_space<vmem>>, vector<1x2x32xf32>,
    %197 = vector.extract_strided_slice %192 {offsets = [0, 32], sizes = [2, 32], strides = [1, 1]} : vector<2x64xf32> to vector<2x32xf32>
    %c2_55 = arith.constant 2 : index
    %c0_56 = arith.constant 0 : index
    %c0_57 = arith.constant 0 : index
    %198 = vector.load %arg8[%c2_55, %c0_56, %c0_57] : memref<8x2x32xf32, #tpu.memory_space<vmem>>, vector<1x2x32xf32>
    %199 = vector.shape_cast %198 : vector<1x2x32xf32> to vector<2x32xf32>
    %200 = vector.shape_cast %197 : vector<2x32xf32> to vector<1x2x32xf32>
    tpu.vector_store %arg8[%c2_55, %c0_56, %c0_57], %200 {strides = array<i32>} : memref<8x2x32xf32, #tpu.memory_space<vmem>>, vector<1x2x32xf32>,
    %201 = vector.extract_strided_slice %8 {offsets = [12, 0], sizes = [2, 256], strides = [1, 1]} : vector<16x256xf32> to vector<2x256xf32>
    %202 = vector.extract_strided_slice %11 {offsets = [2, 0], sizes = [2, 256], strides = [1, 1]} : vector<16x256xf32> to vector<2x256xf32>
    %203 = arith.addf %201, %202 : vector<2x256xf32>
    %204 = arith.truncf %192 : vector<2x64xf32> to vector<2x64xbf16>
    %cst_58 = arith.constant dense<0.000000e+00> : vector<2x256xf32>
    %205 = tpu.matmul %204, %12, %cst_58 {dimension_numbers = #tpu.dot_dimension_numbers<[1], [0], [0], [1], [0, 0, 1, 1], [], []>} : vector<2x64xbf16>, vector<64x256xbf16>, vector<2x256xf32> -> vector<2x256xf32>
    %206 = arith.addf %203, %205 : vector<2x256xf32>
    %207 = math.tanh %206 : vector<2x256xf32>
    %208 = arith.negf %206 : vector<2x256xf32>
    %209 = math.exp %208 : vector<2x256xf32>
    %cst_59 = arith.constant 1.000000e+00 : f32
    %210 = vector.broadcast %cst_59 : f32 to vector<2x256xf32>
    %211 = arith.addf %210, %209 : vector<2x256xf32>
    %212 = arith.divf %210, %211 : vector<2x256xf32>
    %213 = arith.select %18, %207, %212 : vector<2x256xi1>, vector<2x256xf32>
    %214 = vector.extract_strided_slice %213 {offsets = [0, 0], sizes = [2, 64], strides = [1, 1]} : vector<2x256xf32> to vector<2x64xf32>
    %215 = vector.extract_strided_slice %213 {offsets = [0, 64], sizes = [2, 64], strides = [1, 1]} : vector<2x256xf32> to vector<2x64xf32>
    %216 = vector.extract_strided_slice %213 {offsets = [0, 128], sizes = [2, 64], strides = [1, 1]} : vector<2x256xf32> to vector<2x64xf32>
    %217 = vector.extract_strided_slice %213 {offsets = [0, 192], sizes = [2, 64], strides = [1, 1]} : vector<2x256xf32> to vector<2x64xf32>
    %218 = arith.mulf %215, %190 : vector<2x64xf32>
    %219 = arith.mulf %214, %216 : vector<2x64xf32>
    %220 = arith.addf %218, %219 : vector<2x64xf32>
    %221 = math.tanh %220 : vector<2x64xf32>
    %222 = arith.mulf %217, %221 : vector<2x64xf32>
    %223 = vector.extract_strided_slice %222 {offsets = [0, 0], sizes = [2, 32], strides = [1, 1]} : vector<2x64xf32> to vector<2x32xf32>
    %c6_60 = arith.constant 6 : index
    %c0_61 = arith.constant 0 : index
    %c0_62 = arith.constant 0 : index
    %224 = vector.load %arg7[%c6_60, %c0_61, %c0_62] : memref<8x2x32xf32, #tpu.memory_space<vmem>>, vector<1x2x32xf32>
    %225 = vector.shape_cast %224 : vector<1x2x32xf32> to vector<2x32xf32>
    %226 = vector.shape_cast %223 : vector<2x32xf32> to vector<1x2x32xf32>
    tpu.vector_store %arg7[%c6_60, %c0_61, %c0_62], %226 {strides = array<i32>} : memref<8x2x32xf32, #tpu.memory_space<vmem>>, vector<1x2x32xf32>,
    %227 = vector.extract_strided_slice %222 {offsets = [0, 32], sizes = [2, 32], strides = [1, 1]} : vector<2x64xf32> to vector<2x32xf32>
    %c1_63 = arith.constant 1 : index
    %c0_64 = arith.constant 0 : index
    %c0_65 = arith.constant 0 : index
    %228 = vector.load %arg8[%c1_63, %c0_64, %c0_65] : memref<8x2x32xf32, #tpu.memory_space<vmem>>, vector<1x2x32xf32>
    %229 = vector.shape_cast %228 : vector<1x2x32xf32> to vector<2x32xf32>
    %230 = vector.shape_cast %227 : vector<2x32xf32> to vector<1x2x32xf32>
    tpu.vector_store %arg8[%c1_63, %c0_64, %c0_65], %230 {strides = array<i32>} : memref<8x2x32xf32, #tpu.memory_space<vmem>>, vector<1x2x32xf32>,
    %231 = vector.extract_strided_slice %8 {offsets = [14, 0], sizes = [2, 256], strides = [1, 1]} : vector<16x256xf32> to vector<2x256xf32>
    %232 = vector.extract_strided_slice %11 {offsets = [0, 0], sizes = [2, 256], strides = [1, 1]} : vector<16x256xf32> to vector<2x256xf32>
    %233 = arith.addf %231, %232 : vector<2x256xf32>
    %234 = arith.truncf %222 : vector<2x64xf32> to vector<2x64xbf16>
    %cst_66 = arith.constant dense<0.000000e+00> : vector<2x256xf32>
    %235 = tpu.matmul %234, %12, %cst_66 {dimension_numbers = #tpu.dot_dimension_numbers<[1], [0], [0], [1], [0, 0, 1, 1], [], []>} : vector<2x64xbf16>, vector<64x256xbf16>, vector<2x256xf32> -> vector<2x256xf32>
    %236 = arith.addf %233, %235 : vector<2x256xf32>
    %237 = math.tanh %236 : vector<2x256xf32>
    %238 = arith.negf %236 : vector<2x256xf32>
    %239 = math.exp %238 : vector<2x256xf32>
    %cst_67 = arith.constant 1.000000e+00 : f32
    %240 = vector.broadcast %cst_67 : f32 to vector<2x256xf32>
    %241 = arith.addf %240, %239 : vector<2x256xf32>
    %242 = arith.divf %240, %241 : vector<2x256xf32>
    %243 = arith.select %18, %237, %242 : vector<2x256xi1>, vector<2x256xf32>
    %244 = vector.extract_strided_slice %243 {offsets = [0, 0], sizes = [2, 64], strides = [1, 1]} : vector<2x256xf32> to vector<2x64xf32>
    %245 = vector.extract_strided_slice %243 {offsets = [0, 64], sizes = [2, 64], strides = [1, 1]} : vector<2x256xf32> to vector<2x64xf32>
    %246 = vector.extract_strided_slice %243 {offsets = [0, 128], sizes = [2, 64], strides = [1, 1]} : vector<2x256xf32> to vector<2x64xf32>
    %247 = vector.extract_strided_slice %243 {offsets = [0, 192], sizes = [2, 64], strides = [1, 1]} : vector<2x256xf32> to vector<2x64xf32>
    %248 = arith.mulf %245, %220 : vector<2x64xf32>
    %249 = arith.mulf %244, %246 : vector<2x64xf32>
    %250 = arith.addf %248, %249 : vector<2x64xf32>
    %251 = math.tanh %250 : vector<2x64xf32>
    %252 = arith.mulf %247, %251 : vector<2x64xf32>
    %253 = vector.extract_strided_slice %252 {offsets = [0, 0], sizes = [2, 32], strides = [1, 1]} : vector<2x64xf32> to vector<2x32xf32>
    %c7_68 = arith.constant 7 : index
    %c0_69 = arith.constant 0 : index
    %c0_70 = arith.constant 0 : index
    %254 = vector.load %arg7[%c7_68, %c0_69, %c0_70] : memref<8x2x32xf32, #tpu.memory_space<vmem>>, vector<1x2x32xf32>
    %255 = vector.shape_cast %254 : vector<1x2x32xf32> to vector<2x32xf32>
    %256 = vector.shape_cast %253 : vector<2x32xf32> to vector<1x2x32xf32>
    tpu.vector_store %arg7[%c7_68, %c0_69, %c0_70], %256 {strides = array<i32>} : memref<8x2x32xf32, #tpu.memory_space<vmem>>, vector<1x2x32xf32>,
    %257 = vector.extract_strided_slice %252 {offsets = [0, 32], sizes = [2, 32], strides = [1, 1]} : vector<2x64xf32> to vector<2x32xf32>
    %c0_71 = arith.constant 0 : index
    %c0_72 = arith.constant 0 : index
    %c0_73 = arith.constant 0 : index
    %258 = vector.load %arg8[%c0_71, %c0_72, %c0_73] : memref<8x2x32xf32, #tpu.memory_space<vmem>>, vector<1x2x32xf32>
    %259 = vector.shape_cast %258 : vector<1x2x32xf32> to vector<2x32xf32>
    %260 = vector.shape_cast %257 : vector<2x32xf32> to vector<1x2x32xf32>
    tpu.vector_store %arg8[%c0_71, %c0_72, %c0_73], %260 {strides = array<i32>} : memref<8x2x32xf32, #tpu.memory_space<vmem>>, vector<1x2x32xf32>,
    %c0_74 = arith.constant 0 : index
    %c0_75 = arith.constant 0 : index
    %261 = vector.load %arg9[%c0_74, %c0_75] : memref<2x64xf32, #tpu.memory_space<vmem>>, vector<2x64xf32>
    tpu.vector_store %arg9[%c0_74, %c0_75], %252 {strides = array<i32>} : memref<2x64xf32, #tpu.memory_space<vmem>>, vector<2x64xf32>,
    %c0_76 = arith.constant 0 : index
    %c0_77 = arith.constant 0 : index
    %262 = vector.load %arg10[%c0_76, %c0_77] : memref<2x64xf32, #tpu.memory_space<vmem>>, vector<2x64xf32>
    tpu.vector_store %arg10[%c0_76, %c0_77], %250 {strides = array<i32>} : memref<2x64xf32, #tpu.memory_space<vmem>>, vector<2x64xf32>,
    return
  }
  func.func @transform_0(%arg0: i32) -> (i32, i32) {
    %c0_i32 = arith.constant 0 : i32
    %c0_i32_0 = arith.constant 0 : i32
    return %arg0, %c0_i32 : i32, i32
  }
  func.func @transform_1(%arg0: i32) -> (i32, i32) {
    %c0_i32 = arith.constant 0 : i32
    %0 = arith.subi %c0_i32, %arg0 : i32
    %c0_i32_0 = arith.constant 0 : i32
    %c0_i32_1 = arith.constant 0 : i32
    return %0, %c0_i32_0 : i32, i32
  }
  func.func @transform_2(%arg0: i32) -> (i32, i32) {
    %c0_i32 = arith.constant 0 : i32
    %c0_i32_0 = arith.constant 0 : i32
    %c0_i32_1 = arith.constant 0 : i32
    return %c0_i32, %c0_i32_0 : i32, i32
  }
  func.func @transform_3(%arg0: i32) -> (i32, i32) {
    %c0_i32 = arith.constant 0 : i32
    %c0_i32_0 = arith.constant 0 : i32
    %c0_i32_1 = arith.constant 0 : i32
    return %c0_i32, %c0_i32_0 : i32, i32
  }
  func.func @transform_4(%arg0: i32) -> (i32, i32) {
    %c0_i32 = arith.constant 0 : i32
    %c0_i32_0 = arith.constant 0 : i32
    %c0_i32_1 = arith.constant 0 : i32
    return %c0_i32, %c0_i32_0 : i32, i32
  }
  func.func @transform_5(%arg0: i32) -> (i32, i32) {
    %c0_i32 = arith.constant 0 : i32
    %c0_i32_0 = arith.constant 0 : i32
    %c0_i32_1 = arith.constant 0 : i32
    return %c0_i32, %c0_i32_0 : i32, i32
  }
  func.func @transform_6(%arg0: i32) -> (i32, i32, i32) {
    %c0_i32 = arith.constant 0 : i32
    %c0_i32_0 = arith.constant 0 : i32
    %c0_i32_1 = arith.constant 0 : i32
    return %arg0, %c0_i32, %c0_i32_0 : i32, i32, i32
  }
  func.func @transform_7(%arg0: i32) -> (i32, i32, i32) {
    %c0_i32 = arith.constant 0 : i32
    %0 = arith.subi %c0_i32, %arg0 : i32
    %c0_i32_0 = arith.constant 0 : i32
    %c0_i32_1 = arith.constant 0 : i32
    %c0_i32_2 = arith.constant 0 : i32
    return %0, %c0_i32_0, %c0_i32_1 : i32, i32, i32
  }
}

</mosaic_0001>

<bundles_post_ra>
// kernel: lstm_encoder_forward.2
= control target key start
LH: loop header
LB: loop body
LE: loop exit
PB: predicated region body
PF: predicated region fallthrough
CT: control target
= control target key end

     0   :  { %vm94_vm0 = vcmask 130048   ;;  %vm66_vm1 = vcmask 517120   ;;  %v1367_v25 = vmov 0.0   ;;  %vm244_vm2 = vcmask 523264   ;;  %s1809_s2 = inlined_call_operand.vmem [shape: bf16[16,256], index: 2, kind: input, shape index: {}]   ;;  %s1810_s3 = inlined_call_operand.vmem [shape: bf16[16,256], index: 3, kind: input, shape index: {}]   ;;  %s1811_s0 = inlined_call_operand.vmem [shape: bf16[16,16], index: 0, kind: input, shape index: {}, may-alias: {0,1}]   ;;  %s1812_s1 = inlined_call_operand.vmem [shape: bf16[16,16], index: 1, kind: input, shape index: {}, may-alias: {0,1}]   ;;  %s1813_s4 = inlined_call_operand.vmem [shape: bf16[64,256], index: 4, kind: input, shape index: {}]   ;;  %s1814_s5 = inlined_call_operand.vmem [shape: f32[1,256], index: 5, kind: input, shape index: {}]   ;;  %s1815_s6 = inlined_call_operand.vmem [shape: f32[8,2,32], index: 6, kind: output, shape index: {0}]   ;;  %s1816_s7 = inlined_call_operand.vmem [shape: f32[8,2,32], index: 7, kind: output, shape index: {1}]  }
   0x1   :  { %v1154_v0 = vld [vmem:[%s1809_s2] sm:$0xf]  ;;  %v1256_v1 = vld [vmem:[%s1809_s2 + $0x4] sm:$0xf0]  ;;  %v1255_v2 = vld [vmem:[%s1809_s2 + $0x4] sm:$0xf] }
   0x2   :  { %v1155_v3 = vor.u32 %v1256_v1, %v1154_v0  ;;  %v1156_v4 = vld [vmem:[%s1809_s2 + $0x8] sm:$0xf0]  ;;  %v1168_v5 = vld [vmem:[%s1810_s3] sm:$0xf]  ;;  %v1259_v6 = vld [vmem:[%s1810_s3 + $0x4] sm:$0xf0] }
   0x3   :  { %v1159_v7 = vor.u32 %v1255_v2, %v1156_v4  ;;  %v1169_v8 = vor.u32 %v1259_v6, %v1168_v5  ;;  %v1258_v9 = vld [vmem:[%s1810_s3 + $0x4] sm:$0xf]  ;;  %v1170_v10 = vld [vmem:[%s1810_s3 + $0x8] sm:$0xf0]  ;;  %v1202_v14 = vld [vmem:[%s1813_s4 + $0x30] sm:$0xf] }
   0x4   :  { %v1254_v11 = vld [vmem:[%s1811_s0] sm:$0xff]  ;;  %105 = vmatpush.bf16.msra.mxu0 %v1155_v3  ;;  %v1173_v12 = vor.u32 %v1258_v9, %v1170_v10  ;;  %v1267_v15 = vld [vmem:[%s1813_s4 + $0x34] sm:$0xf0]  ;;  %v1266_v17 = vld [vmem:[%s1813_s4 + $0x34] sm:$0xf]  ;;  %s1368_s3 = smov 64  }
   0x5   :  { %v1257_v13 = vld [vmem:[%s1812_s1] sm:$0xff]  ;;  %119 = vmatpush.bf16.msra.mxu1 %v1159_v7  ;;  %155 = vmatpush.bf16.msra.mxu2 %v1169_v8  ;;  %v1446_v16 = vor.u32 %v1267_v15, %v1202_v14  ;;  %v1204_v18 = vld [vmem:[%s1813_s4 + $0x38] sm:$0xf0]  ;;  %v1265_v21 = vld [vmem:[%s1813_s4 + $0x24] sm:$0xf0] }
   0x6   :  { %169 = vmatpush.bf16.msra.mxu3 %v1173_v12  ;;  %v1454_v19 = vor.u32 %v1266_v17, %v1204_v18  ;;  %v1194_v20 = vld [vmem:[%s1813_s4 + $0x20] sm:$0xf]  ;;  %v1264_v22 = vld [vmem:[%s1813_s4 + $0x24] sm:$0xf]  ;;  %v1196_v23 = vld [vmem:[%s1813_s4 + $0x28] sm:$0xf0]  ;;  %v184_v18 = vlaneseq }
   0x7   :  { %1160 = vmatmul.msk.bf16.vlgmr.msra.gmra.mxu0 %vm94_vm0, %v1254_v11  ;;  %v1474_v24 = vor.u32 %v1265_v21, %v1194_v20  ;;  %67 = vst.msk [vmem:[#allocation2] sm:$0x3] %vm66_vm1, %v1367_v25  ;;  %v1478_v26 = vor.u32 %v1264_v22, %v1196_v23  ;;  %v1186_v27 = vld [vmem:[%s1813_s4 + $0x10] sm:$0xf]  ;;  %v1263_v28 = vld [vmem:[%s1813_s4 + $0x14] sm:$0xf0] }
   0x8   :  { %1161 = vmatmul.msk.bf16.vlgmr.msra.gmra.mxu1 %vm94_vm0, %v1254_v11  ;;  %1174 = vmatmul.msk.bf16.vlgmr.msra.gmra.mxu2 %vm94_vm0, %v1257_v13  ;;  %68 = vst.msk [vmem:[#allocation3] sm:$0x3] %vm66_vm1, %v1367_v25  ;;  %v1262_v29 = vld [vmem:[%s1813_s4 + $0x14] sm:$0xf]  ;;  %v1188_v30 = vld [vmem:[%s1813_s4 + $0x18] sm:$0xf0]  ;;  %v1496_v31 = vor.u32 %v1263_v28, %v1186_v27 }
   0x9   :  { %359 = vmatpush.bf16.msrb.mxu2 %v1446_v16  ;;  %1175 = vmatmul.msk.bf16.vlgmr.msra.gmra.mxu3 %vm94_vm0, %v1257_v13  ;;  %v1499_v32 = vor.u32 %v1262_v29, %v1188_v30  ;;  %v1178_v33 = vld [vmem:[%s1813_s4] sm:$0xf]  ;;  %v1261_v34 = vld [vmem:[%s1813_s4 + $0x4] sm:$0xf0]  ;;  %v1260_v35 = vld [vmem:[%s1813_s4 + $0x4] sm:$0xf] }
   0xa   :  { %252 = vmatpush.bf16.msrb.mxu0 %v1446_v16  ;;  %265 = vmatpush.bf16.msrb.mxu1 %v1454_v19  ;;  %v1180_v36 = vld [vmem:[%s1813_s4 + $0x8] sm:$0xf0]  ;;  %v1516_v37 = vor.u32 %v1261_v34, %v1178_v33  ;;  %v73_v44 = vld [vmem:[%s1814_s5] sm:$0x3]  ;;  %v185_v21 = vand.u32 127, %v184_v18  ;;  %s1369_s5 = smov 32  }
   0xb   :  { %372 = vmatpush.bf16.msrb.mxu3 %v1454_v19  ;;  %v1519_v40 = vor.u32 %v1260_v35, %v1180_v36  ;;  %v75_v45 = vperm.slane %v73_v44, 0  ;;  %v76_v47 = vperm.slane %v73_v44, 1 }
   0xc   :  { %v1582_v28 = vadd.s32 128, %v185_v21 }
   0xd   :  { %360 = vmatpush.bf16.msrb.mxu2 %v1474_v24 }
   0xe   :  { %253 = vmatpush.bf16.msrb.mxu0 %v1474_v24  ;;  %266 = vmatpush.bf16.msrb.mxu1 %v1478_v26  ;;  %v193_v38 = vld [vmem:[#allocation2] sm:$0x3]  ;;  %vm190_vm8 = vcmp.lt.s32.totalorder %v1582_v28, 192 }
   0xf   :  { %373 = vmatpush.bf16.msrb.mxu3 %v1478_v26  ;;  %v194_v39 = vld [vmem:[#allocation3] sm:$0x3]  ;;  %v203_v41 = vpack.c.bf16 %v193_v38, %v193_v38 }
  0x10   :  { %319 = vrot.lane.b32.xlu0 %v194_v39, %s1368_s3 }
  0x11   :  { %361 = vmatpush.bf16.msrb.mxu2 %v1496_v31 }
  0x12   :  { %254 = vmatpush.bf16.msrb.mxu0 %v1496_v31  ;;  %267 = vmatpush.bf16.msrb.mxu1 %v1499_v32 }
  0x13   :  { %374 = vmatpush.bf16.msrb.mxu3 %v1499_v32 }
  0x15   :  { %362 = vmatpush.bf16.msrb.mxu2 %v1516_v37 }
  0x16   :  { %255 = vmatpush.bf16.msrb.mxu0 %v1516_v37  ;;  %268 = vmatpush.bf16.msrb.mxu1 %v1519_v40 }
  0x17   :  { %375 = vmatpush.bf16.msrb.mxu3 %v1519_v40 }
  0x19   :  { %575 = vmatpush.bf16.msra.mxu2 %v1446_v16  ;;  %1208 = vmatmul.msk.bf16.vlgmr.msrb.gmra.mxu0 %vm244_vm2, %v203_v41 }
  0x1a   :  { %467 = vmatpush.bf16.msra.mxu0 %v1446_v16  ;;  %480 = vmatpush.bf16.msra.mxu1 %v1454_v19 }
  0x1b   :  { %588 = vmatpush.bf16.msra.mxu3 %v1454_v19  ;;  %1209 = vmatmul.msk.bf16.vlgmr.msrb.gmra.mxu1 %vm244_vm2, %v203_v41 }
  0x1d   :  { %576 = vmatpush.bf16.msra.mxu2 %v1474_v24 }
  0x1e   :  { %468 = vmatpush.bf16.msra.mxu0 %v1474_v24  ;;  %481 = vmatpush.bf16.msra.mxu1 %v1478_v26 }
  0x1f   :  { %589 = vmatpush.bf16.msra.mxu3 %v1478_v26 }
  0x21   :  { %577 = vmatpush.bf16.msra.mxu2 %v1496_v31 }
  0x22   :  { %469 = vmatpush.bf16.msra.mxu0 %v1496_v31  ;;  %482 = vmatpush.bf16.msra.mxu1 %v1499_v32 }
  0x23   :  { %590 = vmatpush.bf16.msra.mxu3 %v1499_v32 }
  0x25   :  { %578 = vmatpush.bf16.msra.mxu2 %v1516_v37 }
  0x26   :  { %470 = vmatpush.bf16.msra.mxu0 %v1516_v37  ;;  %483 = vmatpush.bf16.msra.mxu1 %v1519_v40 }
  0x27   :  { %591 = vmatpush.bf16.msra.mxu3 %v1519_v40 }
  0x2a   :  { %691 = vmatpush.bf16.msrb.mxu0 %v1446_v16  ;;  %704 = vmatpush.bf16.msrb.mxu1 %v1454_v19 }
  0x2e   :  { %692 = vmatpush.bf16.msrb.mxu0 %v1474_v24  ;;  %705 = vmatpush.bf16.msrb.mxu1 %v1478_v26 }
  0x32   :  { %693 = vmatpush.bf16.msrb.mxu0 %v1496_v31  ;;  %706 = vmatpush.bf16.msrb.mxu1 %v1499_v32 }
  0x36   :  { %694 = vmatpush.bf16.msrb.mxu0 %v1516_v37  ;;  %707 = vmatpush.bf16.msrb.mxu1 %v1519_v40 }
  0x84   :  { %v107_v42 = vpop.f32.mrf.mxu0 }
  0x85   :  { %v121_v43 = vpop.f32.mrf.mxu1  ;;  %v1566_v62 = vadd.f32 %v107_v42, %v75_v45 }
  0x86   :  { %v1571_v1 = vadd.f32 %v121_v43, %v76_v47 }
  0x8b   :  { %v157_v46 = vpop.f32.mrf.mxu2 }
  0x8c   :  { %v673_v48 = vrot.slane %v157_v46, 6  ;;  %v780_v49 = vrot.slane %v157_v46, 2  ;;  %v171_v50 = vpop.f32.mrf.mxu3  ;;  %v109_v51 = vpop.f32.mrf.mxu0 }
  0x8d   :  { %v110_v52 = vadd.f32 %v109_v51, %v75_v45  ;;  %v123_v53 = vpop.f32.mrf.mxu1  ;;  %v674_v54 = vrot.slane %v171_v50, 6  ;;  %v781_v55 = vrot.slane %v171_v50, 2  ;;  %v320_v51 = vpop.permute.xlu0 %319 }
  0x8e   :  { %v124_v56 = vadd.f32 %v123_v53, %v76_v47 }
  0x8f   :  { %v1556_v57 = vadd.f32 %v780_v49, %v110_v52  ;;  %v1558_v58 = vadd.f32 %v673_v48, %v110_v52 }
  0x90   :  { %v1560_v59 = vadd.f32 %v781_v55, %v124_v56  ;;  %v1562_v60 = vadd.f32 %v674_v54, %v124_v56 }
  0x93   :  { %v1564_v61 = vpop.f32.mrf.mxu2 }
  0x94   :  { %v197_v63 = vrot.slane %v1564_v61, 6  ;;  %v1569_v0 = vpop.f32.mrf.mxu3 }
  0x95   :  { %v198_v2 = vrot.slane %v1569_v0, 6 }
  0x96   :  { %v257_v3 = vpop.f32.mrf.mxu0  ;;  %v1575_v4 = vadd.f32 %v197_v63, %v1566_v62 }
  0x97   :  { %v1578_v6 = vadd.f32 %v198_v2, %v1571_v1 }
  0x98   :  { %v270_v5 = vpop.f32.mrf.mxu1  ;;  %v274_v7 = vadd.f32 %v257_v3, %v1575_v4  ;;  %v342_v3 = vrot.slane %v1564_v61, 2 }
  0x99   :  { %v275_v8 = vadd.f32 %v270_v5, %v1578_v6  ;;  %v343_v5 = vrot.slane %v1569_v0, 2 }
  0x9a   :  { %v1210_v9 = vmul.f32 -1.442695, %v274_v7 }
  0x9b   :  { %v1211_v10 = vmul.f32 -1.442695, %v275_v8 }
  0x9c   :  { %1271 = vpow2.f32 %v1210_v9  ;;  %v1609_v9 = vadd.f32 %v342_v3, %v1566_v62 }
  0x9d   :  { %1273 = vpow2.f32 %v1211_v10  ;;  %v1612_v10 = vadd.f32 %v343_v5, %v1571_v1 }
  0x9e   :  { %v259_v11 = vpop.f32.mrf.mxu0 }
  0xa0   :  { %v272_v12 = vpop.f32.mrf.mxu1 }
  0xa2   :  { %v1272_v13 = vpop.eup %1271 }
  0xa3   :  { %v1274_v14 = vpop.eup %1273  ;;  %v284_v15 = vadd.f32 1.0, %v1272_v13 }
  0xa4   :  { %v285_v17 = vadd.f32 1.0, %v1274_v14 }
  0xa5   :  { %1275 = vrcp.f32 %v284_v15  ;;  %v297_v29 = vand.u32 2147483648, %v284_v15  ;;  %v295_v34 = vand.u32 2147483647, %v284_v15  ;;  %vm291_vm5 = vweird.f32 %v284_v15 }
  0xa6   :  { %1277 = vrcp.f32 %v285_v17  ;;  %v312_v35 = vand.u32 2147483648, %v285_v17  ;;  %v310_v38 = vand.u32 2147483647, %v285_v17  ;;  %vm306_vm7 = vweird.f32 %v285_v17 }
  0xa7   :  { %1279 = vtanh.f32 %v275_v8  ;;  %v298_v41 = vor.u32 1.1754944e-38, %v297_v29  ;;  %vm296_vm9 = vcmp.eq.f32.partialorder %v295_v34, 8.507059e+37 }
  0xa8   :  { %v313_v44 = vor.u32 1.1754944e-38, %v312_v35  ;;  %vm311_vm11 = vcmp.eq.f32.partialorder %v310_v38, 8.507059e+37 }
  0xab   :  { %v1276_v20 = vpop.eup %1275 }
  0xac   :  { %v1278_v22 = vpop.eup %1277  ;;  %v287_v23 = vmul.f32 %v1276_v20, %v284_v15  ;;  %vm292_vm3 = vweird.f32 %v1276_v20 }
  0xad   :  { %v302_v25 = vmul.f32 %v1278_v22, %v285_v17  ;;  %vm307_vm4 = vweird.f32 %v1278_v22  ;;  %vm293_vm6 = vmor %vm291_vm5, %vm292_vm3  ;;  %v1280_v45 = vpop.eup %1279 }
  0xae   :  { %v288_v27 = vsub.f32 1.0, %v287_v23  ;;  %vm308_vm10 = vmor %vm306_vm7, %vm307_vm4 }
  0xaf   :  { %v303_v30 = vsub.f32 1.0, %v302_v25 }
  0xb0   :  { %v289_v33 = vmul.f32 %v1276_v20, %v288_v27 }
  0xb1   :  { %v304_v36 = vmul.f32 %v1278_v22, %v303_v30 }
  0xb2   :  { %v290_v39 = vadd.f32 %v1276_v20, %v289_v33 }
  0xb3   :  { %v305_v42 = vadd.f32 %v1278_v22, %v304_v36 }
  0xb4   :  { %v294_v43 = vsel %vm293_vm6, %v1276_v20, %v290_v39 }
  0xb5   :  { %v299_v46 = vsel %vm296_vm9, %v298_v41, %v294_v43  ;;  %v309_v47 = vsel %vm308_vm10, %v1278_v22, %v305_v42 }
  0xb6   :  { %v314_v48 = vsel %vm311_vm11, %v313_v44, %v309_v47  ;;  %v322_v52 = vmul.f32 %v320_v51, %v299_v46 }
  0xb7   :  { %v317_v49 = vsel %vm190_vm8, %v1280_v45, %v314_v48 }
  0xb8   :  { %v323_v50 = vmul.f32 %v317_v49, %v299_v46 }
  0xba   :  { %325 = vrot.lane.b32.xlu0 %v323_v50, %s1368_s3 }
 0x12c   :  { %v326_v53 = vpop.permute.xlu0 %325 }
 0x12d   :  { %v1588_v54 = vadd.f32 %v326_v53, %v322_v52 }
 0x12f   :  { %1281 = vtanh.f32 %v1588_v54  ;;  %v432_v43 = vrot.slane %v1588_v54, 6 }
 0x135   :  { %v1282_v55 = vpop.eup %1281 }
 0x136   :  { %v1591_v56 = vmul.f32 %v1282_v55, %v317_v49 }
 0x138   :  { %v348_v63 = vpack.c.bf16 %v1591_v56, %v1591_v56 }
 0x13a   :  { %350 = vrot.lane.b32.xlu1 %v348_v63, %s1368_s3 }
 0x1ac   :  { %v351_v2 = vpop.permute.xlu1 %350 }
 0x1ad   :  { %1213 = vmatmul.msk.bf16.vlgmr.msrb.gmra.mxu2 %vm244_vm2, %v351_v2  ;;  %1214 = vmatmul.msk.bf16.vlgmr.msrb.gmra.mxu3 %vm244_vm2, %v351_v2 }
 0x1ae   :  { %810 = vmatpush.bf16.msrb.mxu3 %v1454_v19  ;;  %797 = vmatpush.bf16.msrb.mxu2 %v1446_v16 }
 0x1b2   :  { %811 = vmatpush.bf16.msrb.mxu3 %v1478_v26  ;;  %798 = vmatpush.bf16.msrb.mxu2 %v1474_v24 }
 0x1b6   :  { %812 = vmatpush.bf16.msrb.mxu3 %v1499_v32  ;;  %799 = vmatpush.bf16.msrb.mxu2 %v1496_v31 }
 0x1ba   :  { %813 = vmatpush.bf16.msrb.mxu3 %v1519_v40  ;;  %800 = vmatpush.bf16.msrb.mxu2 %v1516_v37 }
 0x230   :  { %v364_v7 = vpop.f32.mrf.mxu2  ;;  %v377_v8 = vpop.f32.mrf.mxu3 }
 0x231   :  { %v383_v11 = vrot.slane %v364_v7, 6  ;;  %v384_v12 = vrot.slane %v377_v8, 6 }
 0x233   :  { %v387_v13 = vadd.f32 %v383_v11, %v1609_v9  ;;  %v388_v14 = vadd.f32 %v384_v12, %v1612_v10 }
 0x235   :  { %v1215_v15 = vmul.f32 -1.442695, %v387_v13  ;;  %v1216_v17 = vmul.f32 -1.442695, %v388_v14 }
 0x237   :  { %1283 = vpow2.f32 %v1215_v15 }
 0x238   :  { %1285 = vpow2.f32 %v1216_v17  ;;  %v366_v61 = vpop.f32.mrf.mxu2  ;;  %v379_v0 = vpop.f32.mrf.mxu3 }
 0x23d   :  { %v1284_v18 = vpop.eup %1283 }
 0x23e   :  { %v1286_v20 = vpop.eup %1285  ;;  %v397_v21 = vadd.f32 1.0, %v1284_v18 }
 0x23f   :  { %v398_v62 = vadd.f32 1.0, %v1286_v20 }
 0x240   :  { %1287 = vrcp.f32 %v397_v21  ;;  %v410_v29 = vand.u32 2147483648, %v397_v21  ;;  %v408_v34 = vand.u32 2147483647, %v397_v21  ;;  %vm404_vm14 = vweird.f32 %v397_v21 }
 0x241   :  { %1289 = vrcp.f32 %v398_v62  ;;  %v425_v35 = vand.u32 2147483648, %v398_v62  ;;  %v423_v38 = vand.u32 2147483647, %v398_v62  ;;  %vm419_vm0 = vweird.f32 %v398_v62 }
 0x242   :  { %1291 = vtanh.f32 %v388_v14  ;;  %v411_v41 = vor.u32 1.1754944e-38, %v410_v29  ;;  %vm409_vm1 = vcmp.eq.f32.partialorder %v408_v34, 8.507059e+37 }
 0x243   :  { %v426_v45 = vor.u32 1.1754944e-38, %v425_v35  ;;  %vm424_vm4 = vcmp.eq.f32.partialorder %v423_v38, 8.507059e+37 }
 0x246   :  { %v1288_v1 = vpop.eup %1287 }
 0x247   :  { %v1290_v22 = vpop.eup %1289  ;;  %v400_v23 = vmul.f32 %v1288_v1, %v397_v21  ;;  %vm405_vm12 = vweird.f32 %v1288_v1 }
 0x248   :  { %v415_v25 = vmul.f32 %v1290_v22, %v398_v62  ;;  %vm420_vm13 = vweird.f32 %v1290_v22  ;;  %vm406_vm15 = vmor %vm404_vm14, %vm405_vm12  ;;  %v1292_v46 = vpop.eup %1291 }
 0x249   :  { %v401_v27 = vsub.f32 1.0, %v400_v23  ;;  %vm421_vm3 = vmor %vm419_vm0, %vm420_vm13 }
 0x24a   :  { %v416_v30 = vsub.f32 1.0, %v415_v25 }
 0x24b   :  { %v402_v33 = vmul.f32 %v1288_v1, %v401_v27 }
 0x24c   :  { %v417_v36 = vmul.f32 %v1290_v22, %v416_v30 }
 0x24d   :  { %v403_v39 = vadd.f32 %v1288_v1, %v402_v33 }
 0x24e   :  { %v418_v42 = vadd.f32 %v1290_v22, %v417_v36 }
 0x24f   :  { %v407_v44 = vsel %vm406_vm15, %v1288_v1, %v403_v39 }
 0x250   :  { %v412_v47 = vsel %vm409_vm1, %v411_v41, %v407_v44  ;;  %v422_v48 = vsel %vm421_vm3, %v1290_v22, %v418_v42 }
 0x251   :  { %v427_v49 = vsel %vm424_vm4, %v426_v45, %v422_v48  ;;  %v434_v50 = vmul.f32 %v432_v43, %v412_v47 }
 0x252   :  { %v430_v51 = vsel %vm190_vm8, %v1292_v46, %v427_v49 }
 0x253   :  { %v435_v52 = vmul.f32 %v430_v51, %v412_v47 }
 0x255   :  { %437 = vrot.lane.b32.xlu1 %v435_v52, %s1368_s3 }
 0x2c7   :  { %v438_v53 = vpop.permute.xlu1 %437 }
 0x2c8   :  { %v1620_v55 = vadd.f32 %v438_v53, %v434_v50 }
 0x2ca   :  { %1293 = vtanh.f32 %v1620_v55  ;;  %v540_v41 = vrot.slane %v1620_v55, 6 }
 0x2d0   :  { %v1294_v54 = vpop.eup %1293 }
 0x2d1   :  { %v1623_v63 = vmul.f32 %v1294_v54, %v430_v51 }
 0x2d3   :  { %v455_v2 = vpack.c.bf16 %v1623_v63, %v1623_v63 }
 0x2d5   :  { %v457_v3 = vrot.slane %v455_v2, 1 }
 0x2d7   :  { %458 = vrot.lane.b32.xlu2 %v457_v3, %s1368_s3 }
 0x331   :  { %v459_v5 = vpop.permute.xlu2 %458 }
 0x332   :  { %1219 = vmatmul.msk.bf16.vlgmr.msra.gmra.mxu0 %vm244_vm2, %v459_v5  ;;  %1220 = vmatmul.msk.bf16.vlgmr.msra.gmra.mxu1 %vm244_vm2, %v459_v5 }
 0x333   :  { %917 = vmatpush.bf16.msra.mxu1 %v1454_v19  ;;  %904 = vmatpush.bf16.msra.mxu0 %v1446_v16 }
 0x337   :  { %918 = vmatpush.bf16.msra.mxu1 %v1478_v26  ;;  %905 = vmatpush.bf16.msra.mxu0 %v1474_v24 }
 0x33b   :  { %919 = vmatpush.bf16.msra.mxu1 %v1499_v32  ;;  %906 = vmatpush.bf16.msra.mxu0 %v1496_v31 }
 0x33f   :  { %920 = vmatpush.bf16.msra.mxu1 %v1519_v40  ;;  %907 = vmatpush.bf16.msra.mxu0 %v1516_v37 }
 0x3af   :  { %v472_v7 = vpop.f32.mrf.mxu0  ;;  %v485_v8 = vpop.f32.mrf.mxu1 }
 0x3b0   :  { %v491_v11 = vrot.slane %v472_v7, 4  ;;  %v492_v12 = vrot.slane %v485_v8, 4 }
 0x3b2   :  { %v495_v13 = vadd.f32 %v491_v11, %v1575_v4  ;;  %v496_v14 = vadd.f32 %v492_v12, %v1578_v6 }
 0x3b4   :  { %v1221_v15 = vmul.f32 -1.442695, %v495_v13  ;;  %v1222_v17 = vmul.f32 -1.442695, %v496_v14 }
 0x3b6   :  { %1295 = vpow2.f32 %v1221_v15 }
 0x3b7   :  { %1297 = vpow2.f32 %v1222_v17  ;;  %v474_v61 = vpop.f32.mrf.mxu0  ;;  %v487_v0 = vpop.f32.mrf.mxu1 }
 0x3bc   :  { %v1296_v18 = vpop.eup %1295 }
 0x3bd   :  { %v1298_v20 = vpop.eup %1297  ;;  %v505_v21 = vadd.f32 1.0, %v1296_v18 }
 0x3be   :  { %v506_v62 = vadd.f32 1.0, %v1298_v20 }
 0x3bf   :  { %1299 = vrcp.f32 %v505_v21  ;;  %v518_v4 = vand.u32 2147483648, %v505_v21  ;;  %v516_v30 = vand.u32 2147483647, %v505_v21  ;;  %vm512_vm7 = vweird.f32 %v505_v21 }
 0x3c0   :  { %1301 = vrcp.f32 %v506_v62  ;;  %v533_v33 = vand.u32 2147483648, %v506_v62  ;;  %v531_v35 = vand.u32 2147483647, %v506_v62  ;;  %vm527_vm10 = vweird.f32 %v506_v62 }
 0x3c1   :  { %1303 = vtanh.f32 %v496_v14  ;;  %v519_v38 = vor.u32 1.1754944e-38, %v518_v4  ;;  %vm517_vm11 = vcmp.eq.f32.partialorder %v516_v30, 8.507059e+37 }
 0x3c2   :  { %v534_v43 = vor.u32 1.1754944e-38, %v533_v33  ;;  %vm532_vm13 = vcmp.eq.f32.partialorder %v531_v35, 8.507059e+37 }
 0x3c5   :  { %v1300_v1 = vpop.eup %1299 }
 0x3c6   :  { %v1302_v22 = vpop.eup %1301  ;;  %v508_v23 = vmul.f32 %v1300_v1, %v505_v21  ;;  %vm513_vm5 = vweird.f32 %v1300_v1 }
 0x3c7   :  { %v523_v25 = vmul.f32 %v1302_v22, %v506_v62  ;;  %vm528_vm6 = vweird.f32 %v1302_v22  ;;  %vm514_vm9 = vmor %vm512_vm7, %vm513_vm5  ;;  %v1304_v44 = vpop.eup %1303 }
 0x3c8   :  { %v509_v27 = vsub.f32 1.0, %v508_v23  ;;  %vm529_vm12 = vmor %vm527_vm10, %vm528_vm6 }
 0x3c9   :  { %v524_v6 = vsub.f32 1.0, %v523_v25 }
 0x3ca   :  { %v510_v29 = vmul.f32 %v1300_v1, %v509_v27 }
 0x3cb   :  { %v525_v34 = vmul.f32 %v1302_v22, %v524_v6 }
 0x3cc   :  { %v511_v36 = vadd.f32 %v1300_v1, %v510_v29 }
 0x3cd   :  { %v526_v39 = vadd.f32 %v1302_v22, %v525_v34 }
 0x3ce   :  { %v515_v42 = vsel %vm514_vm9, %v1300_v1, %v511_v36 }
 0x3cf   :  { %v520_v45 = vsel %vm517_vm11, %v519_v38, %v515_v42  ;;  %v530_v46 = vsel %vm529_vm12, %v1302_v22, %v526_v39 }
 0x3d0   :  { %v535_v47 = vsel %vm532_vm13, %v534_v43, %v530_v46  ;;  %v542_v48 = vmul.f32 %v540_v41, %v520_v45 }
 0x3d1   :  { %v538_v49 = vsel %vm190_vm8, %v1304_v44, %v535_v47 }
 0x3d2   :  { %v543_v50 = vmul.f32 %v538_v49, %v520_v45 }
 0x3d4   :  { %545 = vrot.lane.b32.xlu2 %v543_v50, %s1368_s3 }
 0x42e   :  { %v546_v51 = vpop.permute.xlu2 %545 }
 0x42f   :  { %v1644_v52 = vadd.f32 %v546_v51, %v542_v48 }
 0x431   :  { %1305 = vtanh.f32 %v1644_v52  ;;  %v648_v27 = vrot.slane %v1644_v52, 6 }
 0x437   :  { %v1306_v53 = vpop.eup %1305 }
 0x438   :  { %v1647_v55 = vmul.f32 %v1306_v53, %v538_v49 }
 0x43a   :  { %v563_v54 = vpack.c.bf16 %v1647_v55, %v1647_v55 }
 0x43c   :  { %v565_v2 = vrot.slane %v563_v54, 2 }
 0x43e   :  { %566 = vrot.lane.b32.xlu0 %v565_v2, %s1368_s3 }
 0x4b0   :  { %v567_v3 = vpop.permute.xlu0 %566 }
 0x4b1   :  { %1225 = vmatmul.msk.bf16.vlgmr.msra.gmra.mxu2 %vm244_vm2, %v567_v3  ;;  %1226 = vmatmul.msk.bf16.vlgmr.msra.gmra.mxu3 %vm244_vm2, %v567_v3 }
 0x4b2   :  { %1024 = vmatpush.bf16.msra.mxu3 %v1454_v19  ;;  %1011 = vmatpush.bf16.msra.mxu2 %v1446_v16 }
 0x4b6   :  { %1025 = vmatpush.bf16.msra.mxu3 %v1478_v26  ;;  %1012 = vmatpush.bf16.msra.mxu2 %v1474_v24 }
 0x4ba   :  { %1026 = vmatpush.bf16.msra.mxu3 %v1499_v32  ;;  %1013 = vmatpush.bf16.msra.mxu2 %v1496_v31 }
 0x4be   :  { %1027 = vmatpush.bf16.msra.mxu3 %v1519_v40  ;;  %1014 = vmatpush.bf16.msra.mxu2 %v1516_v37 }
 0x534   :  { %v580_v5 = vpop.f32.mrf.mxu2  ;;  %v593_v7 = vpop.f32.mrf.mxu3 }
 0x535   :  { %v599_v8 = vrot.slane %v580_v5, 2  ;;  %v600_v11 = vrot.slane %v593_v7, 2 }
 0x537   :  { %v603_v19 = vadd.f32 %v599_v8, %v1609_v9  ;;  %v604_v16 = vadd.f32 %v600_v11, %v1612_v10 }
 0x539   :  { %v1227_v12 = vmul.f32 -1.442695, %v603_v19  ;;  %v1228_v26 = vmul.f32 -1.442695, %v604_v16 }
 0x53b   :  { %1307 = vpow2.f32 %v1227_v12 }
 0x53c   :  { %1309 = vpow2.f32 %v1228_v26  ;;  %v582_v24 = vpop.f32.mrf.mxu2  ;;  %v595_v32 = vpop.f32.mrf.mxu3 }
 0x541   :  { %v1308_v13 = vpop.eup %1307 }
 0x542   :  { %v1310_v31 = vpop.eup %1309  ;;  %v613_v14 = vadd.f32 1.0, %v1308_v13 }
 0x543   :  { %v614_v40 = vadd.f32 1.0, %v1310_v31 }
 0x544   :  { %1311 = vrcp.f32 %v613_v14  ;;  %v626_v9 = vand.u32 2147483648, %v613_v14  ;;  %v624_v20 = vand.u32 2147483647, %v613_v14  ;;  %vm620_vm0 = vweird.f32 %v613_v14 }
 0x545   :  { %1313 = vrcp.f32 %v614_v40  ;;  %v641_v21 = vand.u32 2147483648, %v614_v40  ;;  %v639_v1 = vand.u32 2147483647, %v614_v40  ;;  %vm635_vm3 = vweird.f32 %v614_v40 }
 0x546   :  { %1315 = vtanh.f32 %v604_v16  ;;  %v627_v23 = vor.u32 1.1754944e-38, %v626_v9  ;;  %vm625_vm4 = vcmp.eq.f32.partialorder %v624_v20, 8.507059e+37 }
 0x547   :  { %v642_v6 = vor.u32 1.1754944e-38, %v641_v21  ;;  %vm640_vm6 = vcmp.eq.f32.partialorder %v639_v1, 8.507059e+37 }
 0x54a   :  { %v1312_v37 = vpop.eup %1311 }
 0x54b   :  { %v1314_v15 = vpop.eup %1313  ;;  %v616_v17 = vmul.f32 %v1312_v37, %v613_v14  ;;  %vm621_vm14 = vweird.f32 %v1312_v37 }
 0x54c   :  { %v631_v61 = vmul.f32 %v1314_v15, %v614_v40  ;;  %vm636_vm15 = vweird.f32 %v1314_v15  ;;  %vm622_vm1 = vmor %vm620_vm0, %vm621_vm14  ;;  %v1316_v29 = vpop.eup %1315 }
 0x54d   :  { %v617_v0 = vsub.f32 1.0, %v616_v17  ;;  %vm637_vm5 = vmor %vm635_vm3, %vm636_vm15 }
 0x54e   :  { %v632_v10 = vsub.f32 1.0, %v631_v61 }
 0x54f   :  { %v618_v18 = vmul.f32 %v1312_v37, %v617_v0 }
 0x550   :  { %v633_v62 = vmul.f32 %v1314_v15, %v632_v10 }
 0x551   :  { %v619_v22 = vadd.f32 %v1312_v37, %v618_v18 }
 0x552   :  { %v634_v25 = vadd.f32 %v1314_v15, %v633_v62 }
 0x553   :  { %v623_v4 = vsel %vm622_vm1, %v1312_v37, %v619_v22 }
 0x554   :  { %v628_v30 = vsel %vm625_vm4, %v627_v23, %v623_v4  ;;  %v638_v33 = vsel %vm637_vm5, %v1314_v15, %v634_v25 }
 0x555   :  { %v643_v34 = vsel %vm640_vm6, %v642_v6, %v638_v33  ;;  %v650_v35 = vmul.f32 %v648_v27, %v628_v30 }
 0x556   :  { %v646_v36 = vsel %vm190_vm8, %v1316_v29, %v643_v34 }
 0x557   :  { %v651_v38 = vmul.f32 %v646_v36, %v628_v30 }
 0x559   :  { %653 = vrot.lane.b32.xlu1 %v651_v38, %s1368_s3 }
 0x5cb   :  { %v654_v39 = vpop.permute.xlu1 %653 }
 0x5cc   :  { %v656_v41 = vadd.f32 %v654_v39, %v650_v35 }
 0x5ce   :  { %1317 = vtanh.f32 %v656_v41  ;;  %v758_v61 = vrot.slane %v656_v41, 6 }
 0x5d4   :  { %v1318_v42 = vpop.eup %1317 }
 0x5d5   :  { %v1668_v43 = vmul.f32 %v1318_v42, %v646_v36 }
 0x5d7   :  { %v679_v44 = vpack.c.bf16 %v1668_v43, %v1668_v43 }
 0x5d9   :  { %v681_v45 = vrot.slane %v679_v44, 3 }
 0x5db   :  { %682 = vrot.lane.b32.xlu2 %v681_v45, %s1368_s3 }
 0x635   :  { %v683_v46 = vpop.permute.xlu2 %682 }
 0x636   :  { %1231 = vmatmul.msk.bf16.vlgmr.msrb.gmra.mxu0 %vm244_vm2, %v683_v46  ;;  %1232 = vmatmul.msk.bf16.vlgmr.msrb.gmra.mxu1 %vm244_vm2, %v683_v46 }
 0x6b3   :  { %v696_v47 = vpop.f32.mrf.mxu0  ;;  %v709_v48 = vpop.f32.mrf.mxu1 }
 0x6b4   :  { %v713_v49 = vadd.f32 %v696_v47, %v1558_v58  ;;  %v714_v50 = vadd.f32 %v709_v48, %v1562_v60 }
 0x6b6   :  { %v1233_v51 = vmul.f32 -1.442695, %v713_v49  ;;  %v1234_v52 = vmul.f32 -1.442695, %v714_v50 }
 0x6b8   :  { %1319 = vpow2.f32 %v1233_v51 }
 0x6b9   :  { %1321 = vpow2.f32 %v1234_v52 }
 0x6bb   :  { %v698_v53 = vpop.f32.mrf.mxu0  ;;  %v711_v54 = vpop.f32.mrf.mxu1 }
 0x6be   :  { %v1320_v2 = vpop.eup %1319 }
 0x6bf   :  { %v1322_v3 = vpop.eup %1321  ;;  %v723_v5 = vadd.f32 1.0, %v1320_v2 }
 0x6c0   :  { %v724_v7 = vadd.f32 1.0, %v1322_v3 }
 0x6c1   :  { %1323 = vrcp.f32 %v723_v5  ;;  %v736_v24 = vand.u32 2147483648, %v723_v5  ;;  %v734_v13 = vand.u32 2147483647, %v723_v5  ;;  %vm730_vm10 = vweird.f32 %v723_v5 }
 0x6c2   :  { %1325 = vrcp.f32 %v724_v7  ;;  %v751_v31 = vand.u32 2147483648, %v724_v7  ;;  %v749_v40 = vand.u32 2147483647, %v724_v7  ;;  %vm745_vm12 = vweird.f32 %v724_v7 }
 0x6c3   :  { %1327 = vtanh.f32 %v714_v50  ;;  %v737_v15 = vor.u32 1.1754944e-38, %v736_v24  ;;  %vm735_vm13 = vcmp.eq.f32.partialorder %v734_v13, 8.507059e+37 }
 0x6c4   :  { %v752_v9 = vor.u32 1.1754944e-38, %v751_v31  ;;  %vm750_vm15 = vcmp.eq.f32.partialorder %v749_v40, 8.507059e+37 }
 0x6c7   :  { %v1324_v8 = vpop.eup %1323 }
 0x6c8   :  { %v1326_v11 = vpop.eup %1325  ;;  %v726_v19 = vmul.f32 %v1324_v8, %v723_v5  ;;  %vm731_vm7 = vweird.f32 %v1324_v8 }
 0x6c9   :  { %v741_v16 = vmul.f32 %v1326_v11, %v724_v7  ;;  %vm746_vm9 = vweird.f32 %v1326_v11  ;;  %vm732_vm11 = vmor %vm730_vm10, %vm731_vm7  ;;  %v1328_v10 = vpop.eup %1327 }
 0x6ca   :  { %v727_v12 = vsub.f32 1.0, %v726_v19  ;;  %vm747_vm14 = vmor %vm745_vm12, %vm746_vm9 }
 0x6cb   :  { %v742_v26 = vsub.f32 1.0, %v741_v16 }
 0x6cc   :  { %v728_v32 = vmul.f32 %v1324_v8, %v727_v12 }
 0x6cd   :  { %v743_v14 = vmul.f32 %v1326_v11, %v742_v26 }
 0x6ce   :  { %v729_v37 = vadd.f32 %v1324_v8, %v728_v32 }
 0x6cf   :  { %v744_v17 = vadd.f32 %v1326_v11, %v743_v14 }
 0x6d0   :  { %v733_v0 = vsel %vm732_vm11, %v1324_v8, %v729_v37 }
 0x6d1   :  { %v738_v18 = vsel %vm735_vm13, %v737_v15, %v733_v0  ;;  %v748_v20 = vsel %vm747_vm14, %v1326_v11, %v744_v17 }
 0x6d2   :  { %v753_v21 = vsel %vm750_vm15, %v752_v9, %v748_v20  ;;  %v760_v62 = vmul.f32 %v758_v61, %v738_v18 }
 0x6d3   :  { %v756_v1 = vsel %vm190_vm8, %v1328_v10, %v753_v21 }
 0x6d4   :  { %v761_v22 = vmul.f32 %v756_v1, %v738_v18 }
 0x6d6   :  { %763 = vrot.lane.b32.xlu0 %v761_v22, %s1368_s3 }
 0x748   :  { %v764_v23 = vpop.permute.xlu0 %763 }
 0x749   :  { %v766_v25 = vadd.f32 %v764_v23, %v760_v62 }
 0x74b   :  { %1329 = vtanh.f32 %v766_v25  ;;  %v870_v26 = vrot.slane %v766_v25, 6 }
 0x751   :  { %v1330_v27 = vpop.eup %1329 }
 0x752   :  { %v1680_v4 = vmul.f32 %v1330_v27, %v756_v1 }
 0x754   :  { %v786_v6 = vpack.c.bf16 %v1680_v4, %v1680_v4 }
 0x756   :  { %788 = vrot.lane.b32.xlu1 %v786_v6, %s1368_s3 }
 0x7c8   :  { %v789_v29 = vpop.permute.xlu1 %788 }
 0x7c9   :  { %1237 = vmatmul.msk.bf16.vlgmr.msrb.gmra.mxu2 %vm244_vm2, %v789_v29  ;;  %1238 = vmatmul.msk.bf16.vlgmr.msrb.gmra.mxu3 %vm244_vm2, %v789_v29 }
 0x84c   :  { %v802_v30 = vpop.f32.mrf.mxu2  ;;  %v815_v33 = vpop.f32.mrf.mxu3 }
 0x84d   :  { %v821_v34 = vrot.slane %v802_v30, 6  ;;  %v822_v35 = vrot.slane %v815_v33, 6 }
 0x84f   :  { %v825_v36 = vadd.f32 %v821_v34, %v1556_v57  ;;  %v826_v38 = vadd.f32 %v822_v35, %v1560_v59 }
 0x851   :  { %v1239_v39 = vmul.f32 -1.442695, %v825_v36  ;;  %v1240_v41 = vmul.f32 -1.442695, %v826_v38 }
 0x853   :  { %1331 = vpow2.f32 %v1239_v39 }
 0x854   :  { %1333 = vpow2.f32 %v1240_v41  ;;  %v804_v42 = vpop.f32.mrf.mxu2  ;;  %v817_v44 = vpop.f32.mrf.mxu3 }
 0x859   :  { %v1332_v45 = vpop.eup %1331 }
 0x85a   :  { %v1334_v46 = vpop.eup %1333  ;;  %v835_v47 = vadd.f32 1.0, %v1332_v45 }
 0x85b   :  { %v836_v48 = vadd.f32 1.0, %v1334_v46 }
 0x85c   :  { %1335 = vrcp.f32 %v835_v47  ;;  %v848_v54 = vand.u32 2147483648, %v835_v47  ;;  %v846_v5 = vand.u32 2147483647, %v835_v47  ;;  %vm842_vm3 = vweird.f32 %v835_v47 }
 0x85d   :  { %1337 = vrcp.f32 %v836_v48  ;;  %v863_v7 = vand.u32 2147483648, %v836_v48  ;;  %v861_v11 = vand.u32 2147483647, %v836_v48  ;;  %vm857_vm5 = vweird.f32 %v836_v48 }
 0x85e   :  { %1339 = vtanh.f32 %v826_v38  ;;  %v849_v16 = vor.u32 1.1754944e-38, %v848_v54  ;;  %vm847_vm6 = vcmp.eq.f32.partialorder %v846_v5, 8.507059e+37 }
 0x85f   :  { %v864_v32 = vor.u32 1.1754944e-38, %v863_v7  ;;  %vm862_vm9 = vcmp.eq.f32.partialorder %v861_v11, 8.507059e+37 }
 0x862   :  { %v1336_v49 = vpop.eup %1335 }
 0x863   :  { %v1338_v50 = vpop.eup %1337  ;;  %v838_v51 = vmul.f32 %v1336_v49, %v835_v47  ;;  %vm843_vm0 = vweird.f32 %v1336_v49 }
 0x864   :  { %v853_v52 = vmul.f32 %v1338_v50, %v836_v48  ;;  %vm858_vm1 = vweird.f32 %v1338_v50  ;;  %vm844_vm4 = vmor %vm842_vm3, %vm843_vm0  ;;  %v1340_v13 = vpop.eup %1339  ;;  %vm335_vm3 = vcmask 254976  }
 0x865   :  { %v839_v53 = vsub.f32 1.0, %v838_v51  ;;  %vm859_vm7 = vmor %vm857_vm5, %vm858_vm1  ;;  %vm664_vm5 = vcmask 261126  }
 0x866   :  { %v854_v2 = vsub.f32 1.0, %v853_v52 }
 0x867   :  { %v840_v3 = vmul.f32 %v1336_v49, %v839_v53 }
 0x868   :  { %v855_v8 = vmul.f32 %v1338_v50, %v854_v2 }
 0x869   :  { %v841_v19 = vadd.f32 %v1336_v49, %v840_v3 }
 0x86a   :  { %v856_v12 = vadd.f32 %v1338_v50, %v855_v8 }
 0x86b   :  { %v845_v24 = vsel %vm844_vm4, %v1336_v49, %v841_v19  ;;  %vm448_vm4 = vcmask 257026  }
 0x86c   :  { %v850_v31 = vsel %vm847_vm6, %v849_v16, %v845_v24  ;;  %v860_v14 = vsel %vm859_vm7, %v1338_v50, %v856_v12  ;;  %vm556_vm6 = vcmask 259076  }
 0x86d   :  { %v865_v40 = vsel %vm862_vm9, %v864_v32, %v860_v14  ;;  %v872_v37 = vmul.f32 %v870_v26, %v850_v31 }
 0x86e   :  { %v868_v15 = vsel %vm190_vm8, %v1340_v13, %v865_v40 }
 0x86f   :  { %v873_v17 = vmul.f32 %v868_v15, %v850_v31 }
 0x871   :  { %875 = vrot.lane.b32.xlu2 %v873_v17, %s1368_s3 }
 0x8cb   :  { %v876_v61 = vpop.permute.xlu2 %875 }
 0x8cc   :  { %v878_v0 = vadd.f32 %v876_v61, %v872_v37 }
 0x8ce   :  { %1341 = vtanh.f32 %v878_v0  ;;  %v977_v54 = vrot.slane %v878_v0, 6 }
 0x8d4   :  { %v1342_v9 = vpop.eup %1341 }
 0x8d5   :  { %v1692_v10 = vmul.f32 %v1342_v9, %v868_v15 }
 0x8d7   :  { %v892_v18 = vpack.c.bf16 %v1692_v10, %v1692_v10 }
 0x8d9   :  { %v894_v20 = vrot.slane %v892_v18, 1 }
 0x8db   :  { %895 = vrot.lane.b32.xlu0 %v894_v20, %s1368_s3 }
 0x94d   :  { %v896_v21 = vpop.permute.xlu0 %895 }
 0x94e   :  { %1243 = vmatmul.msk.bf16.vlgmr.msra.gmra.mxu0 %vm244_vm2, %v896_v21  ;;  %1244 = vmatmul.msk.bf16.vlgmr.msra.gmra.mxu1 %vm244_vm2, %v896_v21 }
 0x9cb   :  { %v909_v62 = vpop.f32.mrf.mxu0  ;;  %v922_v1 = vpop.f32.mrf.mxu1 }
 0x9cc   :  { %v928_v22 = vrot.slane %v909_v62, 4  ;;  %v929_v23 = vrot.slane %v922_v1, 4 }
 0x9ce   :  { %v932_v25 = vadd.f32 %v928_v22, %v1558_v58  ;;  %v933_v27 = vadd.f32 %v929_v23, %v1562_v60 }
 0x9d0   :  { %v1245_v6 = vmul.f32 -1.442695, %v932_v25  ;;  %v1246_v29 = vmul.f32 -1.442695, %v933_v27 }
 0x9d2   :  { %1343 = vpow2.f32 %v1245_v6 }
 0x9d3   :  { %1345 = vpow2.f32 %v1246_v29  ;;  %v911_v30 = vpop.f32.mrf.mxu0  ;;  %v924_v33 = vpop.f32.mrf.mxu1 }
 0x9d8   :  { %v1344_v34 = vpop.eup %1343 }
 0x9d9   :  { %v1346_v35 = vpop.eup %1345  ;;  %v942_v36 = vadd.f32 1.0, %v1344_v34 }
 0x9da   :  { %v943_v38 = vadd.f32 1.0, %v1346_v35 }
 0x9db   :  { %1347 = vrcp.f32 %v942_v36  ;;  %v955_v58 = vand.u32 2147483648, %v942_v36  ;;  %v953_v47 = vand.u32 2147483647, %v942_v36  ;;  %vm949_vm12 = vweird.f32 %v942_v36 }
 0x9dc   :  { %1349 = vrcp.f32 %v943_v38  ;;  %v970_v48 = vand.u32 2147483648, %v943_v38  ;;  %v968_v50 = vand.u32 2147483647, %v943_v38  ;;  %vm964_vm14 = vweird.f32 %v943_v38 }
 0x9dd   :  { %1351 = vtanh.f32 %v933_v27  ;;  %v956_v52 = vor.u32 1.1754944e-38, %v955_v58  ;;  %vm954_vm15 = vcmp.eq.f32.partialorder %v953_v47, 8.507059e+37 }
 0x9de   :  { %v971_v3 = vor.u32 1.1754944e-38, %v970_v48  ;;  %vm969_vm1 = vcmp.eq.f32.partialorder %v968_v50, 8.507059e+37 }
 0x9e1   :  { %v1348_v39 = vpop.eup %1347 }
 0x9e2   :  { %v1350_v41 = vpop.eup %1349  ;;  %v945_v42 = vmul.f32 %v1348_v39, %v942_v36  ;;  %vm950_vm10 = vweird.f32 %v1348_v39 }
 0x9e3   :  { %v960_v44 = vmul.f32 %v1350_v41, %v943_v38  ;;  %vm965_vm11 = vweird.f32 %v1350_v41  ;;  %vm951_vm13 = vmor %vm949_vm12, %vm950_vm10  ;;  %v1352_v5 = vpop.eup %1351 }
 0x9e4   :  { %v946_v45 = vsub.f32 1.0, %v945_v42  ;;  %vm966_vm0 = vmor %vm964_vm14, %vm965_vm11 }
 0x9e5   :  { %v961_v60 = vsub.f32 1.0, %v960_v44 }
 0x9e6   :  { %v947_v46 = vmul.f32 %v1348_v39, %v946_v45 }
 0x9e7   :  { %v962_v49 = vmul.f32 %v1350_v41, %v961_v60 }
 0x9e8   :  { %v948_v51 = vadd.f32 %v1348_v39, %v947_v46 }
 0x9e9   :  { %v963_v53 = vadd.f32 %v1350_v41, %v962_v49 }
 0x9ea   :  { %v952_v2 = vsel %vm951_vm13, %v1348_v39, %v948_v51 }
 0x9eb   :  { %v957_v7 = vsel %vm954_vm15, %v956_v52, %v952_v2  ;;  %v967_v8 = vsel %vm966_vm0, %v1350_v41, %v963_v53 }
 0x9ec   :  { %v972_v11 = vsel %vm969_vm1, %v971_v3, %v967_v8  ;;  %v979_v19 = vmul.f32 %v977_v54, %v957_v7 }
 0x9ed   :  { %v975_v16 = vsel %vm190_vm8, %v1352_v5, %v972_v11 }
 0x9ee   :  { %v980_v12 = vmul.f32 %v975_v16, %v957_v7 }
 0x9f0   :  { %982 = vrot.lane.b32.xlu1 %v980_v12, %s1368_s3 }
 0x9f8   :  { %332 = vrot.lane.b32.xlu1 %v1591_v56, %s1368_s3 }
 0xa00   :  { %450 = vrot.lane.b32.xlu1 %v1623_v63, %s1369_s5 }
 0xa08   :  { %660 = vrot.lane.b32.xlu1 %v1668_v43, %s1368_s3 }
 0xa10   :  { %775 = vrot.lane.b32.xlu1 %v1680_v4, %s1369_s5 }
 0xa62   :  { %v983_v26 = vpop.permute.xlu1 %982 }
 0xa63   :  { %v1712_v24 = vadd.f32 %v983_v26, %v979_v19 }
 0xa65   :  { %1353 = vtanh.f32 %v1712_v24  ;;  %v1084_v51 = vrot.slane %v1712_v24, 6 }
 0xa6a   :  { %v333_v32 = vpop.permute.xlu1 %332 }
 0xa6b   :  { %v1354_v13 = vpop.eup %1353  ;;  %336 = vst.msk [vmem:[%s1815_s6] sm:$0x3] %vm335_vm3, %v333_v32 }
 0xa6c   :  { %v987_v31 = vmul.f32 %v1354_v13, %v975_v16 }
 0xa6e   :  { %989 = vrot.lane.b32.xlu1 %v987_v31, %s1368_s3  ;;  %v999_v14 = vpack.c.bf16 %v987_v31, %v987_v31 }
 0xa70   :  { %v1001_v40 = vrot.slane %v999_v14, 2 }
 0xa72   :  { %v451_v37 = vpop.permute.xlu1 %450  ;;  %1002 = vrot.lane.b32.xlu2 %v1001_v40, %s1368_s3 }
 0xa73   :  { %1218 = vst.msk [vmem:[%s1816_s7 + $0xa] sm:$0xc] %vm448_vm4, %v451_v37 }
 0xa7a   :  { %v661_v15 = vpop.permute.xlu1 %660  ;;  %337 = vrot.lane.b32.xlu2 %v1591_v56, %s1369_s5 }
 0xa7b   :  { %1229 = vst.msk [vmem:[%s1815_s6] sm:$0xc0] %vm664_vm5, %v661_v15 }
 0xa82   :  { %v776_v17 = vpop.permute.xlu1 %775  ;;  %552 = vrot.lane.b32.xlu2 %v1647_v55, %s1368_s3 }
 0xa83   :  { %1236 = vst.msk [vmem:[%s1816_s7 + $0x6] sm:$0x3] %vm335_vm3, %v776_v17 }
 0xa8a   :  { %666 = vrot.lane.b32.xlu2 %v1668_v43, %s1369_s5 }
 0xa92   :  { %882 = vrot.lane.b32.xlu2 %v1692_v10, %s1368_s3 }
 0xa9a   :  { %994 = vrot.lane.b32.xlu2 %v987_v31, %s1369_s5 }
 0xacc   :  { %v1003_v56 = vpop.permute.xlu2 %1002 }
 0xacd   :  { %1249 = vmatmul.msk.bf16.vlgmr.msra.gmra.mxu2 %vm244_vm2, %v1003_v56  ;;  %1250 = vmatmul.msk.bf16.vlgmr.msra.gmra.mxu3 %vm244_vm2, %v1003_v56 }
 0xad4   :  { %v338_v61 = vpop.permute.xlu2 %337 }
 0xad5   :  { %1212 = vst.msk [vmem:[%s1816_s7 + $0xe] sm:$0x3] %vm335_vm3, %v338_v61 }
 0xadc   :  { %v553_v0 = vpop.permute.xlu2 %552 }
 0xadd   :  { %1223 = vst.msk [vmem:[%s1815_s6] sm:$0x30] %vm556_vm6, %v553_v0 }
 0xae0   :  { %v990_v43 = vpop.permute.xlu1 %989 }
 0xae1   :  { %1247 = vst.msk [vmem:[%s1815_s6 + $0x8] sm:$0x30] %vm556_vm6, %v990_v43 }
 0xae4   :  { %v667_v9 = vpop.permute.xlu2 %666 }
 0xae5   :  { %1230 = vst.msk [vmem:[%s1816_s7 + $0x2] sm:$0xc0] %vm664_vm5, %v667_v9 }
 0xaec   :  { %v883_v18 = vpop.permute.xlu2 %882 }
 0xaed   :  { %1241 = vst.msk [vmem:[%s1815_s6 + $0x8] sm:$0xc] %vm448_vm4, %v883_v18 }
 0xaf4   :  { %v995_v20 = vpop.permute.xlu2 %994 }
 0xaf5   :  { %1248 = vst.msk [vmem:[%s1816_s7 - $0x2] sm:$0x30] %vm556_vm6, %v995_v20 }
 0xb50   :  { %v1016_v21 = vpop.f32.mrf.mxu2  ;;  %v1029_v62 = vpop.f32.mrf.mxu3 }
 0xb51   :  { %v1035_v1 = vrot.slane %v1016_v21, 2  ;;  %v1036_v22 = vrot.slane %v1029_v62, 2 }
 0xb53   :  { %v1039_v23 = vadd.f32 %v1035_v1, %v1556_v57  ;;  %v1040_v25 = vadd.f32 %v1036_v22, %v1560_v59 }
 0xb55   :  { %v1251_v27 = vmul.f32 -1.442695, %v1039_v23  ;;  %v1252_v6 = vmul.f32 -1.442695, %v1040_v25 }
 0xb57   :  { %1355 = vpow2.f32 %v1251_v27 }
 0xb58   :  { %1357 = vpow2.f32 %v1252_v6  ;;  %v1018_v29 = vpop.f32.mrf.mxu2  ;;  %v1031_v30 = vpop.f32.mrf.mxu3 }
 0xb5d   :  { %v1356_v33 = vpop.eup %1355 }
 0xb5e   :  { %v1358_v34 = vpop.eup %1357  ;;  %v1049_v35 = vadd.f32 1.0, %v1356_v33 }
 0xb5f   :  { %v1050_v36 = vadd.f32 1.0, %v1358_v34 }
 0xb60   :  { %1359 = vrcp.f32 %v1049_v35  ;;  %v1062_v57 = vand.u32 2147483648, %v1049_v35  ;;  %v1060_v58 = vand.u32 2147483647, %v1049_v35  ;;  %vm1056_vm9 = vweird.f32 %v1049_v35 }
 0xb61   :  { %1361 = vrcp.f32 %v1050_v36  ;;  %v1077_v60 = vand.u32 2147483648, %v1050_v36  ;;  %v1075_v47 = vand.u32 2147483647, %v1050_v36  ;;  %vm1071_vm11 = vweird.f32 %v1050_v36 }
 0xb62   :  { %1363 = vtanh.f32 %v1040_v25  ;;  %v1063_v49 = vor.u32 1.1754944e-38, %v1062_v57  ;;  %vm1061_vm12 = vcmp.eq.f32.partialorder %v1060_v58, 8.507059e+37 }
 0xb63   :  { %v1078_v53 = vor.u32 1.1754944e-38, %v1077_v60  ;;  %vm1076_vm14 = vcmp.eq.f32.partialorder %v1075_v47, 8.507059e+37 }
 0xb66   :  { %v1360_v38 = vpop.eup %1359 }
 0xb67   :  { %v1362_v39 = vpop.eup %1361  ;;  %v1052_v41 = vmul.f32 %v1360_v38, %v1049_v35  ;;  %vm1057_vm2 = vweird.f32 %v1360_v38 }
 0xb68   :  { %v1067_v42 = vmul.f32 %v1362_v39, %v1050_v36  ;;  %vm1072_vm7 = vweird.f32 %v1362_v39  ;;  %vm1058_vm10 = vmor %vm1056_vm9, %vm1057_vm2  ;;  %v1364_v54 = vpop.eup %1363 }
 0xb69   :  { %v1053_v44 = vsub.f32 1.0, %v1052_v41  ;;  %vm1073_vm13 = vmor %vm1071_vm11, %vm1072_vm7 }
 0xb6a   :  { %v1068_v59 = vsub.f32 1.0, %v1067_v42 }
 0xb6b   :  { %v1054_v45 = vmul.f32 %v1360_v38, %v1053_v44 }
 0xb6c   :  { %v1069_v46 = vmul.f32 %v1362_v39, %v1068_v59 }
 0xb6d   :  { %v1055_v48 = vadd.f32 %v1360_v38, %v1054_v45 }
 0xb6e   :  { %v1070_v50 = vadd.f32 %v1362_v39, %v1069_v46 }
 0xb6f   :  { %v1059_v52 = vsel %vm1058_vm10, %v1360_v38, %v1055_v48 }
 0xb70   :  { %v1064_v2 = vsel %vm1061_vm12, %v1063_v49, %v1059_v52  ;;  %v1074_v3 = vsel %vm1073_vm13, %v1362_v39, %v1070_v50 }
 0xb71   :  { %v1079_v5 = vsel %vm1076_vm14, %v1078_v53, %v1074_v3  ;;  %v1086_v7 = vmul.f32 %v1084_v51, %v1064_v2 }
 0xb72   :  { %v1082_v8 = vsel %vm190_vm8, %v1364_v54, %v1079_v5  ;;  %vm1105_vm8 = vcmask 523270  }
 0xb73   :  { %v1087_v11 = vmul.f32 %v1082_v8, %v1064_v2 }
 0xb75   :  { %1089 = vrot.lane.b32.xlu0 %v1087_v11, %s1368_s3 }
 0xb7d   :  { %444 = vrot.lane.b32.xlu0 %v1623_v63, %s1368_s3 }
 0xb85   :  { %558 = vrot.lane.b32.xlu0 %v1647_v55, %s1369_s5 }
 0xb8d   :  { %770 = vrot.lane.b32.xlu0 %v1680_v4, %s1368_s3 }
 0xb95   :  { %887 = vrot.lane.b32.xlu0 %v1692_v10, %s1369_s5 }
 0xbe7   :  { %v1090_v19 = vpop.permute.xlu0 %1089 }
 0xbe8   :  { %v1092_v16 = vadd.f32 %v1090_v19, %v1086_v7 }
 0xbea   :  { %1365 = vtanh.f32 %v1092_v16  ;;  %1108 = vrot.lane.b32.xlu2 %v1092_v16, %s1368_s3 }
 0xbef   :  { %v445_v28 = vpop.permute.xlu0 %444 }
 0xbf0   :  { %v1366_v12 = vpop.eup %1365  ;;  %1217 = vst.msk [vmem:[%s1815_s6] sm:$0xc] %vm448_vm4, %v445_v28 }
 0xbf1   :  { %v1094_v63 = vmul.f32 %v1366_v12, %v1082_v8 }
 0xbf3   :  { %1101 = vrot.lane.b32.xlu1 %v1094_v63, %s1369_s5  ;;  %1096 = vrot.lane.b32.xlu0 %v1094_v63, %s1368_s3 }
 0xbf7   :  { %v559_v55 = vpop.permute.xlu0 %558 }
 0xbf8   :  { %1224 = vst.msk [vmem:[%s1816_s7 + $0x6] sm:$0x30] %vm556_vm6, %v559_v55 }
 0xbff   :  { %v771_v4 = vpop.permute.xlu0 %770 }
 0xc00   :  { %1235 = vst.msk [vmem:[%s1815_s6 + $0x8] sm:$0x3] %vm335_vm3, %v771_v4 }
 0xc07   :  { %v888_v10 = vpop.permute.xlu0 %887 }
 0xc08   :  { %1242 = vst.msk [vmem:[%s1816_s7 + $0x2] sm:$0xc] %vm448_vm4, %v888_v10 }
 0xc44   :  { %v1109_v26 = vpop.permute.xlu2 %1108 }
 0xc45   :  { %1111 = vst.msk [vmem:[#allocation3 - $0x6] sm:$0xc0] %vm1105_vm8, %v1109_v26 }
 0xc65   :  { %v1102_v24 = vpop.permute.xlu1 %1101  ;;  %v1097_v32 = vpop.permute.xlu0 %1096 }
 0xc66   :  { %1104 = vst.msk [vmem:[%s1816_s7 - $0x6] sm:$0xc0] %vm664_vm5, %v1102_v24 }
 0xc67   :  { %1253 = vst.msk [vmem:[%s1815_s6 + $0x8] sm:$0xc0] %vm664_vm5, %v1097_v32 }
 0xc68   :  { %1106 = vst.msk [vmem:[#allocation2 - $0x6] sm:$0xc0] %vm1105_vm8, %v1097_v32 }

// kernel: lstm_encoder_forward.3
= control target key start
LH: loop header
LB: loop body
LE: loop exit
PB: predicated region body
PF: predicated region fallthrough
CT: control target
= control target key end

     0   :  { %vm66_vm0 = vcmask 517120   ;;  %vm130_vm1 = vcmask 523264   ;;  %v1498_v60 = vmov 0.0   ;;  %s1499_s26 = smov 64   ;;  %s2012_s2 = inlined_call_operand.vmem [shape: bf16[64,256], index: 2, kind: input, shape index: {}]   ;;  %s2013_s3 = inlined_call_operand.vmem [shape: bf16[64,256], index: 3, kind: input, shape index: {}]   ;;  %s2014_s4 = inlined_call_operand.vmem [shape: bf16[64,256], index: 4, kind: input, shape index: {}]   ;;  %s2015_s0 = inlined_call_operand.vmem [shape: bf16[16,64], index: 0, kind: input, shape index: {}, may-alias: {0,1}]   ;;  %s2016_s1 = inlined_call_operand.vmem [shape: bf16[16,64], index: 1, kind: input, shape index: {}, may-alias: {0,1}]   ;;  %s2017_s5 = inlined_call_operand.vmem [shape: f32[1,256], index: 5, kind: input, shape index: {}]   ;;  %s2018_s6 = inlined_call_operand.vmem [shape: f32[8,2,32], index: 6, kind: output, shape index: {0}]   ;;  %s2019_s7 = inlined_call_operand.vmem [shape: f32[8,2,32], index: 7, kind: output, shape index: {1}]  }
   0x1   :  { %v1249_v0 = vld [vmem:[%s2012_s2 + $0x30] sm:$0xf]  ;;  %v1381_v1 = vld [vmem:[%s2012_s2 + $0x34] sm:$0xf0]  ;;  %v1380_v2 = vld [vmem:[%s2012_s2 + $0x34] sm:$0xf] }
   0x2   :  { %v1250_v3 = vor.u32 %v1381_v1, %v1249_v0  ;;  %v1251_v4 = vld [vmem:[%s2012_s2 + $0x38] sm:$0xf0]  ;;  %v1287_v5 = vld [vmem:[%s2013_s3 + $0x30] sm:$0xf]  ;;  %v1390_v6 = vld [vmem:[%s2013_s3 + $0x34] sm:$0xf0] }
   0x3   :  { %v1254_v7 = vor.u32 %v1380_v2, %v1251_v4  ;;  %v1288_v8 = vor.u32 %v1390_v6, %v1287_v5  ;;  %v1389_v9 = vld [vmem:[%s2013_s3 + $0x34] sm:$0xf]  ;;  %v1289_v10 = vld [vmem:[%s2013_s3 + $0x38] sm:$0xf0]  ;;  %v1241_v11 = vld [vmem:[%s2012_s2 + $0x20] sm:$0xf] }
   0x4   :  { %138 = vmatpush.bf16.msra.mxu0 %v1250_v3  ;;  %v1292_v12 = vor.u32 %v1389_v9, %v1289_v10  ;;  %v1379_v13 = vld [vmem:[%s2012_s2 + $0x24] sm:$0xf0]  ;;  %v1378_v14 = vld [vmem:[%s2012_s2 + $0x24] sm:$0xf]  ;;  %v1243_v15 = vld [vmem:[%s2012_s2 + $0x28] sm:$0xf0] }
   0x5   :  { %152 = vmatpush.bf16.msra.mxu1 %v1254_v7  ;;  %224 = vmatpush.bf16.msra.mxu2 %v1288_v8  ;;  %v1242_v16 = vor.u32 %v1379_v13, %v1241_v11  ;;  %v1246_v17 = vor.u32 %v1378_v14, %v1243_v15  ;;  %v1279_v18 = vld [vmem:[%s2013_s3 + $0x20] sm:$0xf]  ;;  %v1388_v19 = vld [vmem:[%s2013_s3 + $0x24] sm:$0xf0]  ;;  %v1387_v20 = vld [vmem:[%s2013_s3 + $0x24] sm:$0xf] }
   0x6   :  { %238 = vmatpush.bf16.msra.mxu3 %v1292_v12  ;;  %v1280_v21 = vor.u32 %v1388_v19, %v1279_v18  ;;  %v1281_v22 = vld [vmem:[%s2013_s3 + $0x28] sm:$0xf0]  ;;  %v1233_v23 = vld [vmem:[%s2012_s2 + $0x10] sm:$0xf]  ;;  %v1377_v24 = vld [vmem:[%s2012_s2 + $0x14] sm:$0xf0] }
   0x7   :  { %v1284_v25 = vor.u32 %v1387_v20, %v1281_v22  ;;  %v1376_v26 = vld [vmem:[%s2012_s2 + $0x14] sm:$0xf]  ;;  %v1235_v27 = vld [vmem:[%s2012_s2 + $0x18] sm:$0xf0]  ;;  %v1271_v28 = vld [vmem:[%s2013_s3 + $0x10] sm:$0xf]  ;;  %v1234_v29 = vor.u32 %v1377_v24, %v1233_v23 }
   0x8   :  { %139 = vmatpush.bf16.msra.mxu0 %v1242_v16  ;;  %v1386_v30 = vld [vmem:[%s2013_s3 + $0x14] sm:$0xf0]  ;;  %v1385_v31 = vld [vmem:[%s2013_s3 + $0x14] sm:$0xf]  ;;  %v1273_v32 = vld [vmem:[%s2013_s3 + $0x18] sm:$0xf0]  ;;  %v1238_v33 = vor.u32 %v1376_v26, %v1235_v27 }
   0x9   :  { %153 = vmatpush.bf16.msra.mxu1 %v1246_v17  ;;  %225 = vmatpush.bf16.msra.mxu2 %v1280_v21  ;;  %v1272_v34 = vor.u32 %v1386_v30, %v1271_v28  ;;  %v1225_v35 = vld [vmem:[%s2012_s2] sm:$0xf]  ;;  %v1375_v36 = vld [vmem:[%s2012_s2 + $0x4] sm:$0xf0]  ;;  %v1374_v37 = vld [vmem:[%s2012_s2 + $0x4] sm:$0xf]  ;;  %v1276_v38 = vor.u32 %v1385_v31, %v1273_v32 }
   0xa   :  { %239 = vmatpush.bf16.msra.mxu3 %v1284_v25  ;;  %v1227_v39 = vld [vmem:[%s2012_s2 + $0x8] sm:$0xf0]  ;;  %v1263_v40 = vld [vmem:[%s2013_s3] sm:$0xf]  ;;  %v1384_v41 = vld [vmem:[%s2013_s3 + $0x4] sm:$0xf0]  ;;  %v1226_v44 = vor.u32 %v1375_v36, %v1225_v35 }
   0xb   :  { %v1383_v42 = vld [vmem:[%s2013_s3 + $0x4] sm:$0xf]  ;;  %v1265_v43 = vld [vmem:[%s2013_s3 + $0x8] sm:$0xf0]  ;;  %v1321_v45 = vld [vmem:[%s2014_s4 + $0x30] sm:$0xf]  ;;  %v1230_v47 = vor.u32 %v1374_v37, %v1227_v39  ;;  %v1264_v48 = vor.u32 %v1384_v41, %v1263_v40 }
   0xc   :  { %140 = vmatpush.bf16.msra.mxu0 %v1234_v29  ;;  %v1398_v46 = vld [vmem:[%s2014_s4 + $0x34] sm:$0xf0]  ;;  %v1397_v49 = vld [vmem:[%s2014_s4 + $0x34] sm:$0xf]  ;;  %v1323_v50 = vld [vmem:[%s2014_s4 + $0x38] sm:$0xf0]  ;;  %v1268_v51 = vor.u32 %v1383_v42, %v1265_v43 }
   0xd   :  { %154 = vmatpush.bf16.msra.mxu1 %v1238_v33  ;;  %226 = vmatpush.bf16.msra.mxu2 %v1272_v34  ;;  %v1649_v52 = vor.u32 %v1398_v46, %v1321_v45  ;;  %v1373_v53 = vld [vmem:[%s2015_s0] sm:$0xff]  ;;  %v1654_v54 = vor.u32 %v1397_v49, %v1323_v50  ;;  %v1396_v56 = vld [vmem:[%s2014_s4 + $0x24] sm:$0xf0]  ;;  %v1315_v59 = vld [vmem:[%s2014_s4 + $0x28] sm:$0xf0] }
   0xe   :  { %240 = vmatpush.bf16.msra.mxu3 %v1276_v38  ;;  %v1313_v55 = vld [vmem:[%s2014_s4 + $0x20] sm:$0xf]  ;;  %v1395_v58 = vld [vmem:[%s2014_s4 + $0x24] sm:$0xf]  ;;  %67 = vst.msk [vmem:[#allocation2] sm:$0x3] %vm66_vm0, %v1498_v60 }
   0xf   :  { %v1382_v57 = vld [vmem:[%s2016_s1] sm:$0xff]  ;;  %v1673_v61 = vor.u32 %v1396_v56, %v1313_v55  ;;  %68 = vst.msk [vmem:[#allocation3] sm:$0x3] %vm66_vm0, %v1498_v60  ;;  %v1678_v62 = vor.u32 %v1395_v58, %v1315_v59  ;;  %v1305_v63 = vld [vmem:[%s2014_s4 + $0x10] sm:$0xf]  ;;  %v256_v55 = vlaneseq }
  0x10   :  { %141 = vmatpush.bf16.msra.mxu0 %v1226_v44  ;;  %v1394_v0 = vld [vmem:[%s2014_s4 + $0x14] sm:$0xf0]  ;;  %v1393_v1 = vld [vmem:[%s2014_s4 + $0x14] sm:$0xf]  ;;  %v1307_v2 = vld [vmem:[%s2014_s4 + $0x18] sm:$0xf0] }
  0x11   :  { %155 = vmatpush.bf16.msra.mxu1 %v1230_v47  ;;  %227 = vmatpush.bf16.msra.mxu2 %v1264_v48  ;;  %v1697_v3 = vor.u32 %v1394_v0, %v1305_v63  ;;  %v1701_v4 = vor.u32 %v1393_v1, %v1307_v2  ;;  %v1297_v5 = vld [vmem:[%s2014_s4] sm:$0xf]  ;;  %v1392_v6 = vld [vmem:[%s2014_s4 + $0x4] sm:$0xf0]  ;;  %v1391_v7 = vld [vmem:[%s2014_s4 + $0x4] sm:$0xf] }
  0x12   :  { %241 = vmatpush.bf16.msra.mxu3 %v1268_v51  ;;  %v1299_v8 = vld [vmem:[%s2014_s4 + $0x8] sm:$0xf0]  ;;  %v1717_v10 = vor.u32 %v1392_v6, %v1297_v5  ;;  %v79_v16 = vld [vmem:[%s2017_s5] sm:$0x3]  ;;  %s1500_s5 = smov 32  }
  0x13   :  { %1255 = vmatmul.msk.bf16.vlgmr.msra.gmra.mxu0 %vm130_vm1, %v1373_v53  ;;  %v1721_v11 = vor.u32 %v1391_v7, %v1299_v8  ;;  %v81_v17 = vperm.slane %v79_v16, 0  ;;  %v82_v19 = vperm.slane %v79_v16, 1 }
  0x14   :  { %323 = vmatpush.bf16.msrb.mxu0 %v1649_v52  ;;  %1256 = vmatmul.msk.bf16.vlgmr.msra.gmra.mxu1 %vm130_vm1, %v1373_v53 }
  0x15   :  { %336 = vmatpush.bf16.msrb.mxu1 %v1654_v54  ;;  %1293 = vmatmul.msk.bf16.vlgmr.msra.gmra.mxu2 %vm130_vm1, %v1382_v57  ;;  %v265_v12 = vld [vmem:[#allocation2] sm:$0x3] }
  0x16   :  { %1294 = vmatmul.msk.bf16.vlgmr.msra.gmra.mxu3 %vm130_vm1, %v1382_v57  ;;  %430 = vmatpush.bf16.msrb.mxu2 %v1649_v52  ;;  %v266_v9 = vld [vmem:[#allocation3] sm:$0x3]  ;;  %v275_v13 = vpack.c.bf16 %v265_v12, %v265_v12  ;;  %v257_v57 = vand.u32 127, %v256_v55 }
  0x17   :  { %443 = vmatpush.bf16.msrb.mxu3 %v1654_v54  ;;  %390 = vrot.lane.b32.xlu0 %v266_v9, %s1499_s26 }
  0x18   :  { %324 = vmatpush.bf16.msrb.mxu0 %v1673_v61  ;;  %v1785_v0 = vadd.s32 128, %v257_v57 }
  0x19   :  { %337 = vmatpush.bf16.msrb.mxu1 %v1678_v62 }
  0x1a   :  { %431 = vmatpush.bf16.msrb.mxu2 %v1673_v61  ;;  %vm262_vm7 = vcmp.lt.s32.totalorder %v1785_v0, 192 }
  0x1b   :  { %444 = vmatpush.bf16.msrb.mxu3 %v1678_v62 }
  0x1c   :  { %325 = vmatpush.bf16.msrb.mxu0 %v1697_v3 }
  0x1d   :  { %338 = vmatpush.bf16.msrb.mxu1 %v1701_v4 }
  0x1e   :  { %432 = vmatpush.bf16.msrb.mxu2 %v1697_v3 }
  0x1f   :  { %445 = vmatpush.bf16.msrb.mxu3 %v1701_v4 }
  0x20   :  { %326 = vmatpush.bf16.msrb.mxu0 %v1717_v10 }
  0x21   :  { %339 = vmatpush.bf16.msrb.mxu1 %v1721_v11 }
  0x22   :  { %433 = vmatpush.bf16.msrb.mxu2 %v1717_v10 }
  0x23   :  { %1327 = vmatmul.msk.bf16.vlgmr.msrb.gmra.mxu0 %vm130_vm1, %v275_v13  ;;  %446 = vmatpush.bf16.msrb.mxu3 %v1721_v11 }
  0x24   :  { %538 = vmatpush.bf16.msra.mxu0 %v1649_v52  ;;  %1328 = vmatmul.msk.bf16.vlgmr.msrb.gmra.mxu1 %vm130_vm1, %v275_v13 }
  0x25   :  { %551 = vmatpush.bf16.msra.mxu1 %v1654_v54 }
  0x26   :  { %646 = vmatpush.bf16.msra.mxu2 %v1649_v52 }
  0x27   :  { %659 = vmatpush.bf16.msra.mxu3 %v1654_v54 }
  0x28   :  { %539 = vmatpush.bf16.msra.mxu0 %v1673_v61 }
  0x29   :  { %552 = vmatpush.bf16.msra.mxu1 %v1678_v62 }
  0x2a   :  { %647 = vmatpush.bf16.msra.mxu2 %v1673_v61 }
  0x2b   :  { %660 = vmatpush.bf16.msra.mxu3 %v1678_v62 }
  0x2c   :  { %540 = vmatpush.bf16.msra.mxu0 %v1697_v3 }
  0x2d   :  { %553 = vmatpush.bf16.msra.mxu1 %v1701_v4 }
  0x2e   :  { %648 = vmatpush.bf16.msra.mxu2 %v1697_v3 }
  0x2f   :  { %661 = vmatpush.bf16.msra.mxu3 %v1701_v4 }
  0x30   :  { %541 = vmatpush.bf16.msra.mxu0 %v1717_v10 }
  0x31   :  { %554 = vmatpush.bf16.msra.mxu1 %v1721_v11 }
  0x32   :  { %649 = vmatpush.bf16.msra.mxu2 %v1717_v10 }
  0x33   :  { %662 = vmatpush.bf16.msra.mxu3 %v1721_v11 }
  0x34   :  { %762 = vmatpush.bf16.msrb.mxu0 %v1649_v52 }
  0x35   :  { %775 = vmatpush.bf16.msrb.mxu1 %v1654_v54 }
  0x38   :  { %763 = vmatpush.bf16.msrb.mxu0 %v1673_v61 }
  0x39   :  { %776 = vmatpush.bf16.msrb.mxu1 %v1678_v62 }
  0x3c   :  { %764 = vmatpush.bf16.msrb.mxu0 %v1697_v3 }
  0x3d   :  { %777 = vmatpush.bf16.msrb.mxu1 %v1701_v4 }
  0x40   :  { %765 = vmatpush.bf16.msrb.mxu0 %v1717_v10 }
  0x41   :  { %778 = vmatpush.bf16.msrb.mxu1 %v1721_v11 }
  0x90   :  { %v143_v14 = vpop.f32.mrf.mxu0 }
  0x91   :  { %v157_v15 = vpop.f32.mrf.mxu1  ;;  %v1769_v34 = vadd.f32 %v143_v14, %v81_v17 }
  0x92   :  { %v1774_v38 = vadd.f32 %v157_v15, %v82_v19 }
  0x98   :  { %v229_v18 = vpop.f32.mrf.mxu2  ;;  %v145_v23 = vpop.f32.mrf.mxu0 }
  0x99   :  { %v744_v20 = vrot.slane %v229_v18, 6  ;;  %v851_v21 = vrot.slane %v229_v18, 2  ;;  %v243_v22 = vpop.f32.mrf.mxu3  ;;  %v146_v24 = vadd.f32 %v145_v23, %v81_v17  ;;  %v159_v25 = vpop.f32.mrf.mxu1 }
  0x9a   :  { %v745_v26 = vrot.slane %v243_v22, 6  ;;  %v852_v27 = vrot.slane %v243_v22, 2  ;;  %v160_v28 = vadd.f32 %v159_v25, %v82_v19  ;;  %v391_v23 = vpop.permute.xlu0 %390 }
  0x9b   :  { %v1759_v29 = vadd.f32 %v851_v21, %v146_v24  ;;  %v1761_v30 = vadd.f32 %v744_v20, %v146_v24 }
  0x9c   :  { %v1763_v31 = vadd.f32 %v852_v27, %v160_v28  ;;  %v1765_v32 = vadd.f32 %v745_v26, %v160_v28 }
  0xa0   :  { %v1767_v33 = vpop.f32.mrf.mxu2  ;;  %v328_v37 = vpop.f32.mrf.mxu0 }
  0xa1   :  { %v269_v35 = vrot.slane %v1767_v33, 6  ;;  %v1772_v36 = vpop.f32.mrf.mxu3  ;;  %v341_v40 = vpop.f32.mrf.mxu1 }
  0xa2   :  { %v270_v39 = vrot.slane %v1772_v36, 6 }
  0xa3   :  { %v1778_v41 = vadd.f32 %v269_v35, %v1769_v34 }
  0xa4   :  { %v1781_v42 = vadd.f32 %v270_v39, %v1774_v38  ;;  %v413_v39 = vrot.slane %v1767_v33, 2 }
  0xa5   :  { %v345_v43 = vadd.f32 %v328_v37, %v1778_v41 }
  0xa6   :  { %v346_v44 = vadd.f32 %v341_v40, %v1781_v42  ;;  %v414_v40 = vrot.slane %v1772_v36, 2 }
  0xa7   :  { %v1329_v45 = vmul.f32 -1.442695, %v345_v43 }
  0xa8   :  { %v1330_v46 = vmul.f32 -1.442695, %v346_v44  ;;  %v330_v47 = vpop.f32.mrf.mxu0 }
  0xa9   :  { %1402 = vpow2.f32 %v1329_v45  ;;  %v343_v48 = vpop.f32.mrf.mxu1  ;;  %v1812_v45 = vadd.f32 %v413_v39, %v1769_v34 }
  0xaa   :  { %1404 = vpow2.f32 %v1330_v46  ;;  %v1815_v46 = vadd.f32 %v414_v40, %v1774_v38 }
  0xaf   :  { %v1403_v49 = vpop.eup %1402 }
  0xb0   :  { %v1405_v50 = vpop.eup %1404  ;;  %v355_v51 = vadd.f32 1.0, %v1403_v49 }
  0xb1   :  { %v356_v53 = vadd.f32 1.0, %v1405_v50 }
  0xb2   :  { %1406 = vrcp.f32 %v355_v51  ;;  %v368_v1 = vand.u32 2147483648, %v355_v51  ;;  %v366_v6 = vand.u32 2147483647, %v355_v51  ;;  %vm362_vm4 = vweird.f32 %v355_v51 }
  0xb3   :  { %1408 = vrcp.f32 %v356_v53  ;;  %v383_v7 = vand.u32 2147483648, %v356_v53  ;;  %v381_v9 = vand.u32 2147483647, %v356_v53  ;;  %vm377_vm6 = vweird.f32 %v356_v53 }
  0xb4   :  { %1410 = vtanh.f32 %v346_v44  ;;  %v369_v13 = vor.u32 1.1754944e-38, %v368_v1  ;;  %vm367_vm8 = vcmp.eq.f32.partialorder %v366_v6, 8.507059e+37 }
  0xb5   :  { %v384_v16 = vor.u32 1.1754944e-38, %v383_v7  ;;  %vm382_vm10 = vcmp.eq.f32.partialorder %v381_v9, 8.507059e+37 }
  0xb8   :  { %v1407_v56 = vpop.eup %1406 }
  0xb9   :  { %v1409_v58 = vpop.eup %1408  ;;  %v358_v59 = vmul.f32 %v1407_v56, %v355_v51  ;;  %vm363_vm2 = vweird.f32 %v1407_v56 }
  0xba   :  { %v373_v60 = vmul.f32 %v1409_v58, %v356_v53  ;;  %vm378_vm3 = vweird.f32 %v1409_v58  ;;  %vm364_vm5 = vmor %vm362_vm4, %vm363_vm2  ;;  %v1411_v17 = vpop.eup %1410 }
  0xbb   :  { %v359_v63 = vsub.f32 1.0, %v358_v59  ;;  %vm379_vm9 = vmor %vm377_vm6, %vm378_vm3 }
  0xbc   :  { %v374_v2 = vsub.f32 1.0, %v373_v60 }
  0xbd   :  { %v360_v5 = vmul.f32 %v1407_v56, %v359_v63 }
  0xbe   :  { %v375_v8 = vmul.f32 %v1409_v58, %v374_v2 }
  0xbf   :  { %v361_v12 = vadd.f32 %v1407_v56, %v360_v5 }
  0xc0   :  { %v376_v14 = vadd.f32 %v1409_v58, %v375_v8 }
  0xc1   :  { %v365_v15 = vsel %vm364_vm5, %v1407_v56, %v361_v12 }
  0xc2   :  { %v370_v18 = vsel %vm367_vm8, %v369_v13, %v365_v15  ;;  %v380_v19 = vsel %vm379_vm9, %v1409_v58, %v376_v14 }
  0xc3   :  { %v385_v20 = vsel %vm382_vm10, %v384_v16, %v380_v19  ;;  %v393_v24 = vmul.f32 %v391_v23, %v370_v18 }
  0xc4   :  { %v388_v21 = vsel %vm262_vm7, %v1411_v17, %v385_v20 }
  0xc5   :  { %v394_v22 = vmul.f32 %v388_v21, %v370_v18 }
  0xc7   :  { %396 = vrot.lane.b32.xlu0 %v394_v22, %s1499_s26 }
 0x139   :  { %v397_v25 = vpop.permute.xlu0 %396 }
 0x13a   :  { %v1791_v26 = vadd.f32 %v397_v25, %v393_v24 }
 0x13c   :  { %1412 = vtanh.f32 %v1791_v26  ;;  %v503_v15 = vrot.slane %v1791_v26, 6 }
 0x142   :  { %v1413_v27 = vpop.eup %1412 }
 0x143   :  { %v1794_v28 = vmul.f32 %v1413_v27, %v388_v21 }
 0x145   :  { %v419_v35 = vpack.c.bf16 %v1794_v28, %v1794_v28 }
 0x147   :  { %421 = vrot.lane.b32.xlu1 %v419_v35, %s1499_s26 }
 0x1b9   :  { %v422_v37 = vpop.permute.xlu1 %421 }
 0x1ba   :  { %1332 = vmatmul.msk.bf16.vlgmr.msrb.gmra.mxu2 %vm130_vm1, %v422_v37  ;;  %1333 = vmatmul.msk.bf16.vlgmr.msrb.gmra.mxu3 %vm130_vm1, %v422_v37 }
 0x1bb   :  { %881 = vmatpush.bf16.msrb.mxu3 %v1654_v54  ;;  %868 = vmatpush.bf16.msrb.mxu2 %v1649_v52 }
 0x1bf   :  { %882 = vmatpush.bf16.msrb.mxu3 %v1678_v62  ;;  %869 = vmatpush.bf16.msrb.mxu2 %v1673_v61 }
 0x1c3   :  { %883 = vmatpush.bf16.msrb.mxu3 %v1701_v4  ;;  %870 = vmatpush.bf16.msrb.mxu2 %v1697_v3 }
 0x1c7   :  { %884 = vmatpush.bf16.msrb.mxu3 %v1721_v11  ;;  %871 = vmatpush.bf16.msrb.mxu2 %v1717_v10 }
 0x23d   :  { %v435_v43 = vpop.f32.mrf.mxu2  ;;  %v448_v44 = vpop.f32.mrf.mxu3 }
 0x23e   :  { %v454_v47 = vrot.slane %v435_v43, 6  ;;  %v455_v48 = vrot.slane %v448_v44, 6 }
 0x240   :  { %v458_v49 = vadd.f32 %v454_v47, %v1812_v45  ;;  %v459_v50 = vadd.f32 %v455_v48, %v1815_v46 }
 0x242   :  { %v1334_v51 = vmul.f32 -1.442695, %v458_v49  ;;  %v1335_v53 = vmul.f32 -1.442695, %v459_v50 }
 0x244   :  { %1414 = vpow2.f32 %v1334_v51 }
 0x245   :  { %1416 = vpow2.f32 %v1335_v53  ;;  %v437_v33 = vpop.f32.mrf.mxu2  ;;  %v450_v36 = vpop.f32.mrf.mxu3 }
 0x24a   :  { %v1415_v55 = vpop.eup %1414 }
 0x24b   :  { %v1417_v56 = vpop.eup %1416  ;;  %v468_v57 = vadd.f32 1.0, %v1415_v55 }
 0x24c   :  { %v469_v34 = vadd.f32 1.0, %v1417_v56 }
 0x24d   :  { %1418 = vrcp.f32 %v468_v57  ;;  %v481_v1 = vand.u32 2147483648, %v468_v57  ;;  %v479_v6 = vand.u32 2147483647, %v468_v57  ;;  %vm475_vm13 = vweird.f32 %v468_v57 }
 0x24e   :  { %1420 = vrcp.f32 %v469_v34  ;;  %v496_v7 = vand.u32 2147483648, %v469_v34  ;;  %v494_v9 = vand.u32 2147483647, %v469_v34  ;;  %vm490_vm15 = vweird.f32 %v469_v34 }
 0x24f   :  { %1422 = vtanh.f32 %v459_v50  ;;  %v482_v13 = vor.u32 1.1754944e-38, %v481_v1  ;;  %vm480_vm0 = vcmp.eq.f32.partialorder %v479_v6, 8.507059e+37 }
 0x250   :  { %v497_v17 = vor.u32 1.1754944e-38, %v496_v7  ;;  %vm495_vm3 = vcmp.eq.f32.partialorder %v494_v9, 8.507059e+37 }
 0x253   :  { %v1419_v38 = vpop.eup %1418 }
 0x254   :  { %v1421_v58 = vpop.eup %1420  ;;  %v471_v59 = vmul.f32 %v1419_v38, %v468_v57  ;;  %vm476_vm11 = vweird.f32 %v1419_v38 }
 0x255   :  { %v486_v60 = vmul.f32 %v1421_v58, %v469_v34  ;;  %vm491_vm12 = vweird.f32 %v1421_v58  ;;  %vm477_vm14 = vmor %vm475_vm13, %vm476_vm11  ;;  %v1423_v18 = vpop.eup %1422 }
 0x256   :  { %v472_v63 = vsub.f32 1.0, %v471_v59  ;;  %vm492_vm2 = vmor %vm490_vm15, %vm491_vm12 }
 0x257   :  { %v487_v2 = vsub.f32 1.0, %v486_v60 }
 0x258   :  { %v473_v5 = vmul.f32 %v1419_v38, %v472_v63 }
 0x259   :  { %v488_v8 = vmul.f32 %v1421_v58, %v487_v2 }
 0x25a   :  { %v474_v12 = vadd.f32 %v1419_v38, %v473_v5 }
 0x25b   :  { %v489_v14 = vadd.f32 %v1421_v58, %v488_v8 }
 0x25c   :  { %v478_v16 = vsel %vm477_vm14, %v1419_v38, %v474_v12 }
 0x25d   :  { %v483_v19 = vsel %vm480_vm0, %v482_v13, %v478_v16  ;;  %v493_v20 = vsel %vm492_vm2, %v1421_v58, %v489_v14 }
 0x25e   :  { %v498_v21 = vsel %vm495_vm3, %v497_v17, %v493_v20  ;;  %v505_v22 = vmul.f32 %v503_v15, %v483_v19 }
 0x25f   :  { %v501_v23 = vsel %vm262_vm7, %v1423_v18, %v498_v21 }
 0x260   :  { %v506_v24 = vmul.f32 %v501_v23, %v483_v19 }
 0x262   :  { %508 = vrot.lane.b32.xlu1 %v506_v24, %s1499_s26 }
 0x2d4   :  { %v509_v25 = vpop.permute.xlu1 %508 }
 0x2d5   :  { %v1823_v27 = vadd.f32 %v509_v25, %v505_v22 }
 0x2d7   :  { %1424 = vtanh.f32 %v1823_v27  ;;  %v611_v13 = vrot.slane %v1823_v27, 6 }
 0x2dd   :  { %v1425_v26 = vpop.eup %1424 }
 0x2de   :  { %v1826_v35 = vmul.f32 %v1425_v26, %v501_v23 }
 0x2e0   :  { %v526_v37 = vpack.c.bf16 %v1826_v35, %v1826_v35 }
 0x2e2   :  { %v528_v39 = vrot.slane %v526_v37, 1 }
 0x2e4   :  { %529 = vrot.lane.b32.xlu2 %v528_v39, %s1499_s26 }
 0x33e   :  { %v530_v40 = vpop.permute.xlu2 %529 }
 0x33f   :  { %1338 = vmatmul.msk.bf16.vlgmr.msra.gmra.mxu0 %vm130_vm1, %v530_v40  ;;  %1339 = vmatmul.msk.bf16.vlgmr.msra.gmra.mxu1 %vm130_vm1, %v530_v40 }
 0x340   :  { %988 = vmatpush.bf16.msra.mxu1 %v1654_v54  ;;  %975 = vmatpush.bf16.msra.mxu0 %v1649_v52 }
 0x344   :  { %989 = vmatpush.bf16.msra.mxu1 %v1678_v62  ;;  %976 = vmatpush.bf16.msra.mxu0 %v1673_v61 }
 0x348   :  { %990 = vmatpush.bf16.msra.mxu1 %v1701_v4  ;;  %977 = vmatpush.bf16.msra.mxu0 %v1697_v3 }
 0x34c   :  { %991 = vmatpush.bf16.msra.mxu1 %v1721_v11  ;;  %978 = vmatpush.bf16.msra.mxu0 %v1717_v10 }
 0x3bc   :  { %v543_v43 = vpop.f32.mrf.mxu0  ;;  %v556_v44 = vpop.f32.mrf.mxu1 }
 0x3bd   :  { %v562_v47 = vrot.slane %v543_v43, 4  ;;  %v563_v48 = vrot.slane %v556_v44, 4 }
 0x3bf   :  { %v566_v49 = vadd.f32 %v562_v47, %v1778_v41  ;;  %v567_v50 = vadd.f32 %v563_v48, %v1781_v42 }
 0x3c1   :  { %v1340_v51 = vmul.f32 -1.442695, %v566_v49  ;;  %v1341_v53 = vmul.f32 -1.442695, %v567_v50 }
 0x3c3   :  { %1426 = vpow2.f32 %v1340_v51 }
 0x3c4   :  { %1428 = vpow2.f32 %v1341_v53  ;;  %v545_v33 = vpop.f32.mrf.mxu0  ;;  %v558_v36 = vpop.f32.mrf.mxu1 }
 0x3c9   :  { %v1427_v55 = vpop.eup %1426 }
 0x3ca   :  { %v1429_v56 = vpop.eup %1428  ;;  %v576_v57 = vadd.f32 1.0, %v1427_v55 }
 0x3cb   :  { %v577_v34 = vadd.f32 1.0, %v1429_v56 }
 0x3cc   :  { %1430 = vrcp.f32 %v576_v57  ;;  %v589_v41 = vand.u32 2147483648, %v576_v57  ;;  %v587_v2 = vand.u32 2147483647, %v576_v57  ;;  %vm583_vm6 = vweird.f32 %v576_v57 }
 0x3cd   :  { %1432 = vrcp.f32 %v577_v34  ;;  %v604_v5 = vand.u32 2147483648, %v577_v34  ;;  %v602_v7 = vand.u32 2147483647, %v577_v34  ;;  %vm598_vm9 = vweird.f32 %v577_v34 }
 0x3ce   :  { %1434 = vtanh.f32 %v567_v50  ;;  %v590_v9 = vor.u32 1.1754944e-38, %v589_v41  ;;  %vm588_vm10 = vcmp.eq.f32.partialorder %v587_v2, 8.507059e+37 }
 0x3cf   :  { %v605_v15 = vor.u32 1.1754944e-38, %v604_v5  ;;  %vm603_vm12 = vcmp.eq.f32.partialorder %v602_v7, 8.507059e+37 }
 0x3d2   :  { %v1431_v38 = vpop.eup %1430 }
 0x3d3   :  { %v1433_v58 = vpop.eup %1432  ;;  %v579_v59 = vmul.f32 %v1431_v38, %v576_v57  ;;  %vm584_vm4 = vweird.f32 %v1431_v38 }
 0x3d4   :  { %v594_v60 = vmul.f32 %v1433_v58, %v577_v34  ;;  %vm599_vm5 = vweird.f32 %v1433_v58  ;;  %vm585_vm8 = vmor %vm583_vm6, %vm584_vm4  ;;  %v1435_v16 = vpop.eup %1434 }
 0x3d5   :  { %v580_v63 = vsub.f32 1.0, %v579_v59  ;;  %vm600_vm11 = vmor %vm598_vm9, %vm599_vm5 }
 0x3d6   :  { %v595_v42 = vsub.f32 1.0, %v594_v60 }
 0x3d7   :  { %v581_v1 = vmul.f32 %v1431_v38, %v580_v63 }
 0x3d8   :  { %v596_v6 = vmul.f32 %v1433_v58, %v595_v42 }
 0x3d9   :  { %v582_v8 = vadd.f32 %v1431_v38, %v581_v1 }
 0x3da   :  { %v597_v12 = vadd.f32 %v1433_v58, %v596_v6 }
 0x3db   :  { %v586_v14 = vsel %vm585_vm8, %v1431_v38, %v582_v8 }
 0x3dc   :  { %v591_v17 = vsel %vm588_vm10, %v590_v9, %v586_v14  ;;  %v601_v18 = vsel %vm600_vm11, %v1433_v58, %v597_v12 }
 0x3dd   :  { %v606_v19 = vsel %vm603_vm12, %v605_v15, %v601_v18  ;;  %v613_v20 = vmul.f32 %v611_v13, %v591_v17 }
 0x3de   :  { %v609_v21 = vsel %vm262_vm7, %v1435_v16, %v606_v19 }
 0x3df   :  { %v614_v22 = vmul.f32 %v609_v21, %v591_v17 }
 0x3e1   :  { %616 = vrot.lane.b32.xlu2 %v614_v22, %s1499_s26 }
 0x43b   :  { %v617_v23 = vpop.permute.xlu2 %616 }
 0x43c   :  { %v1847_v24 = vadd.f32 %v617_v23, %v613_v20 }
 0x43e   :  { %1436 = vtanh.f32 %v1847_v24  ;;  %v719_v63 = vrot.slane %v1847_v24, 6 }
 0x444   :  { %v1437_v25 = vpop.eup %1436 }
 0x445   :  { %v1850_v27 = vmul.f32 %v1437_v25, %v609_v21 }
 0x447   :  { %v634_v26 = vpack.c.bf16 %v1850_v27, %v1850_v27 }
 0x449   :  { %v636_v37 = vrot.slane %v634_v26, 2 }
 0x44b   :  { %637 = vrot.lane.b32.xlu0 %v636_v37, %s1499_s26 }
 0x4bd   :  { %v638_v39 = vpop.permute.xlu0 %637 }
 0x4be   :  { %1344 = vmatmul.msk.bf16.vlgmr.msra.gmra.mxu2 %vm130_vm1, %v638_v39  ;;  %1345 = vmatmul.msk.bf16.vlgmr.msra.gmra.mxu3 %vm130_vm1, %v638_v39 }
 0x4bf   :  { %1095 = vmatpush.bf16.msra.mxu3 %v1654_v54  ;;  %1082 = vmatpush.bf16.msra.mxu2 %v1649_v52 }
 0x4c3   :  { %1096 = vmatpush.bf16.msra.mxu3 %v1678_v62  ;;  %1083 = vmatpush.bf16.msra.mxu2 %v1673_v61 }
 0x4c7   :  { %1097 = vmatpush.bf16.msra.mxu3 %v1701_v4  ;;  %1084 = vmatpush.bf16.msra.mxu2 %v1697_v3 }
 0x4cb   :  { %1098 = vmatpush.bf16.msra.mxu3 %v1721_v11  ;;  %1085 = vmatpush.bf16.msra.mxu2 %v1717_v10 }
 0x541   :  { %v651_v40 = vpop.f32.mrf.mxu2  ;;  %v664_v43 = vpop.f32.mrf.mxu3 }
 0x542   :  { %v670_v44 = vrot.slane %v651_v40, 2  ;;  %v671_v47 = vrot.slane %v664_v43, 2 }
 0x544   :  { %v674_v54 = vadd.f32 %v670_v44, %v1812_v45  ;;  %v675_v52 = vadd.f32 %v671_v47, %v1815_v46 }
 0x546   :  { %v1346_v48 = vmul.f32 -1.442695, %v674_v54  ;;  %v1347_v62 = vmul.f32 -1.442695, %v675_v52 }
 0x548   :  { %1438 = vpow2.f32 %v1346_v48 }
 0x549   :  { %1440 = vpow2.f32 %v1347_v62  ;;  %v653_v61 = vpop.f32.mrf.mxu2  ;;  %v666_v4 = vpop.f32.mrf.mxu3 }
 0x54e   :  { %v1439_v49 = vpop.eup %1438 }
 0x54f   :  { %v1441_v3 = vpop.eup %1440  ;;  %v684_v50 = vadd.f32 1.0, %v1439_v49 }
 0x550   :  { %v685_v11 = vadd.f32 1.0, %v1441_v3 }
 0x551   :  { %1442 = vrcp.f32 %v684_v50  ;;  %v697_v45 = vand.u32 2147483648, %v684_v50  ;;  %v695_v56 = vand.u32 2147483647, %v684_v50  ;;  %vm691_vm15 = vweird.f32 %v684_v50 }
 0x552   :  { %1444 = vrcp.f32 %v685_v11  ;;  %v712_v57 = vand.u32 2147483648, %v685_v11  ;;  %v710_v38 = vand.u32 2147483647, %v685_v11  ;;  %vm706_vm2 = vweird.f32 %v685_v11 }
 0x553   :  { %1446 = vtanh.f32 %v675_v52  ;;  %v698_v59 = vor.u32 1.1754944e-38, %v697_v45  ;;  %vm696_vm3 = vcmp.eq.f32.partialorder %v695_v56, 8.507059e+37 }
 0x554   :  { %v713_v42 = vor.u32 1.1754944e-38, %v712_v57  ;;  %vm711_vm5 = vcmp.eq.f32.partialorder %v710_v38, 8.507059e+37 }
 0x557   :  { %v1443_v10 = vpop.eup %1442 }
 0x558   :  { %v1445_v51 = vpop.eup %1444  ;;  %v687_v53 = vmul.f32 %v1443_v10, %v684_v50  ;;  %vm692_vm13 = vweird.f32 %v1443_v10 }
 0x559   :  { %v702_v33 = vmul.f32 %v1445_v51, %v685_v11  ;;  %vm707_vm14 = vweird.f32 %v1445_v51  ;;  %vm693_vm0 = vmor %vm691_vm15, %vm692_vm13  ;;  %v1447_v1 = vpop.eup %1446 }
 0x55a   :  { %v688_v36 = vsub.f32 1.0, %v687_v53  ;;  %vm708_vm4 = vmor %vm706_vm2, %vm707_vm14 }
 0x55b   :  { %v703_v46 = vsub.f32 1.0, %v702_v33 }
 0x55c   :  { %v689_v55 = vmul.f32 %v1443_v10, %v688_v36 }
 0x55d   :  { %v704_v34 = vmul.f32 %v1445_v51, %v703_v46 }
 0x55e   :  { %v690_v58 = vadd.f32 %v1443_v10, %v689_v55 }
 0x55f   :  { %v705_v60 = vadd.f32 %v1445_v51, %v704_v34 }
 0x560   :  { %v694_v41 = vsel %vm693_vm0, %v1443_v10, %v690_v58 }
 0x561   :  { %v699_v2 = vsel %vm696_vm3, %v698_v59, %v694_v41  ;;  %v709_v5 = vsel %vm708_vm4, %v1445_v51, %v705_v60 }
 0x562   :  { %v714_v6 = vsel %vm711_vm5, %v713_v42, %v709_v5  ;;  %v721_v7 = vmul.f32 %v719_v63, %v699_v2 }
 0x563   :  { %v717_v8 = vsel %vm262_vm7, %v1447_v1, %v714_v6 }
 0x564   :  { %v722_v9 = vmul.f32 %v717_v8, %v699_v2 }
 0x566   :  { %724 = vrot.lane.b32.xlu1 %v722_v9, %s1499_s26 }
 0x5d8   :  { %v725_v12 = vpop.permute.xlu1 %724 }
 0x5d9   :  { %v727_v13 = vadd.f32 %v725_v12, %v721_v7 }
 0x5db   :  { %1448 = vtanh.f32 %v727_v13  ;;  %v829_v33 = vrot.slane %v727_v13, 6 }
 0x5e1   :  { %v1449_v14 = vpop.eup %1448 }
 0x5e2   :  { %v1871_v15 = vmul.f32 %v1449_v14, %v717_v8 }
 0x5e4   :  { %v750_v16 = vpack.c.bf16 %v1871_v15, %v1871_v15 }
 0x5e6   :  { %v752_v17 = vrot.slane %v750_v16, 3 }
 0x5e8   :  { %753 = vrot.lane.b32.xlu2 %v752_v17, %s1499_s26 }
 0x642   :  { %v754_v18 = vpop.permute.xlu2 %753 }
 0x643   :  { %1350 = vmatmul.msk.bf16.vlgmr.msrb.gmra.mxu0 %vm130_vm1, %v754_v18  ;;  %1351 = vmatmul.msk.bf16.vlgmr.msrb.gmra.mxu1 %vm130_vm1, %v754_v18 }
 0x6c0   :  { %v767_v19 = vpop.f32.mrf.mxu0  ;;  %v780_v20 = vpop.f32.mrf.mxu1 }
 0x6c1   :  { %v784_v21 = vadd.f32 %v767_v19, %v1761_v30  ;;  %v785_v22 = vadd.f32 %v780_v20, %v1765_v32 }
 0x6c3   :  { %v1352_v23 = vmul.f32 -1.442695, %v784_v21  ;;  %v1353_v24 = vmul.f32 -1.442695, %v785_v22 }
 0x6c5   :  { %1450 = vpow2.f32 %v1352_v23 }
 0x6c6   :  { %1452 = vpow2.f32 %v1353_v24 }
 0x6c8   :  { %v769_v25 = vpop.f32.mrf.mxu0  ;;  %v782_v26 = vpop.f32.mrf.mxu1 }
 0x6cb   :  { %v1451_v37 = vpop.eup %1450 }
 0x6cc   :  { %v1453_v39 = vpop.eup %1452  ;;  %v794_v40 = vadd.f32 1.0, %v1451_v37 }
 0x6cd   :  { %v795_v43 = vadd.f32 1.0, %v1453_v39 }
 0x6ce   :  { %1454 = vrcp.f32 %v794_v40  ;;  %v807_v61 = vand.u32 2147483648, %v794_v40  ;;  %v805_v49 = vand.u32 2147483647, %v794_v40  ;;  %vm801_vm9 = vweird.f32 %v794_v40 }
 0x6cf   :  { %1456 = vrcp.f32 %v795_v43  ;;  %v822_v3 = vand.u32 2147483648, %v795_v43  ;;  %v820_v11 = vand.u32 2147483647, %v795_v43  ;;  %vm816_vm11 = vweird.f32 %v795_v43 }
 0x6d0   :  { %1458 = vtanh.f32 %v785_v22  ;;  %v808_v51 = vor.u32 1.1754944e-38, %v807_v61  ;;  %vm806_vm12 = vcmp.eq.f32.partialorder %v805_v49, 8.507059e+37 }
 0x6d1   :  { %v823_v45 = vor.u32 1.1754944e-38, %v822_v3  ;;  %vm821_vm14 = vcmp.eq.f32.partialorder %v820_v11, 8.507059e+37 }
 0x6d4   :  { %v1455_v44 = vpop.eup %1454 }
 0x6d5   :  { %v1457_v47 = vpop.eup %1456  ;;  %v797_v54 = vmul.f32 %v1455_v44, %v794_v40  ;;  %vm802_vm6 = vweird.f32 %v1455_v44 }
 0x6d6   :  { %v812_v52 = vmul.f32 %v1457_v47, %v795_v43  ;;  %vm817_vm8 = vweird.f32 %v1457_v47  ;;  %vm803_vm10 = vmor %vm801_vm9, %vm802_vm6  ;;  %v1459_v46 = vpop.eup %1458 }
 0x6d7   :  { %v798_v48 = vsub.f32 1.0, %v797_v54  ;;  %vm818_vm13 = vmor %vm816_vm11, %vm817_vm8 }
 0x6d8   :  { %v813_v62 = vsub.f32 1.0, %v812_v52 }
 0x6d9   :  { %v799_v4 = vmul.f32 %v1455_v44, %v798_v48 }
 0x6da   :  { %v814_v50 = vmul.f32 %v1457_v47, %v813_v62 }
 0x6db   :  { %v800_v10 = vadd.f32 %v1455_v44, %v799_v4 }
 0x6dc   :  { %v815_v53 = vadd.f32 %v1457_v47, %v814_v50 }
 0x6dd   :  { %v804_v36 = vsel %vm803_vm10, %v1455_v44, %v800_v10 }
 0x6de   :  { %v809_v55 = vsel %vm806_vm12, %v808_v51, %v804_v36  ;;  %v819_v56 = vsel %vm818_vm13, %v1457_v47, %v815_v53 }
 0x6df   :  { %v824_v57 = vsel %vm821_vm14, %v823_v45, %v819_v56  ;;  %v831_v34 = vmul.f32 %v829_v33, %v809_v55 }
 0x6e0   :  { %v827_v38 = vsel %vm262_vm7, %v1459_v46, %v824_v57 }
 0x6e1   :  { %v832_v58 = vmul.f32 %v827_v38, %v809_v55 }
 0x6e3   :  { %834 = vrot.lane.b32.xlu0 %v832_v58, %s1499_s26 }
 0x755   :  { %v835_v59 = vpop.permute.xlu0 %834 }
 0x756   :  { %v837_v60 = vadd.f32 %v835_v59, %v831_v34 }
 0x758   :  { %1460 = vtanh.f32 %v837_v60  ;;  %v941_v62 = vrot.slane %v837_v60, 6 }
 0x75e   :  { %v1461_v63 = vpop.eup %1460 }
 0x75f   :  { %v1883_v41 = vmul.f32 %v1461_v63, %v827_v38 }
 0x761   :  { %v857_v42 = vpack.c.bf16 %v1883_v41, %v1883_v41 }
 0x763   :  { %859 = vrot.lane.b32.xlu1 %v857_v42, %s1499_s26 }
 0x7d5   :  { %v860_v1 = vpop.permute.xlu1 %859 }
 0x7d6   :  { %1356 = vmatmul.msk.bf16.vlgmr.msrb.gmra.mxu2 %vm130_vm1, %v860_v1  ;;  %1357 = vmatmul.msk.bf16.vlgmr.msrb.gmra.mxu3 %vm130_vm1, %v860_v1 }
 0x859   :  { %v873_v2 = vpop.f32.mrf.mxu2  ;;  %v886_v5 = vpop.f32.mrf.mxu3 }
 0x85a   :  { %v892_v6 = vrot.slane %v873_v2, 6  ;;  %v893_v7 = vrot.slane %v886_v5, 6 }
 0x85c   :  { %v896_v8 = vadd.f32 %v892_v6, %v1759_v29  ;;  %v897_v9 = vadd.f32 %v893_v7, %v1763_v31 }
 0x85e   :  { %v1358_v12 = vmul.f32 -1.442695, %v896_v8  ;;  %v1359_v13 = vmul.f32 -1.442695, %v897_v9 }
 0x860   :  { %1462 = vpow2.f32 %v1358_v12 }
 0x861   :  { %1464 = vpow2.f32 %v1359_v13  ;;  %v875_v14 = vpop.f32.mrf.mxu2  ;;  %v888_v16 = vpop.f32.mrf.mxu3 }
 0x866   :  { %v1463_v17 = vpop.eup %1462 }
 0x867   :  { %v1465_v18 = vpop.eup %1464  ;;  %v906_v19 = vadd.f32 1.0, %v1463_v17 }
 0x868   :  { %v907_v20 = vadd.f32 1.0, %v1465_v18 }
 0x869   :  { %1466 = vrcp.f32 %v906_v19  ;;  %v919_v26 = vand.u32 2147483648, %v906_v19  ;;  %v917_v40 = vand.u32 2147483647, %v906_v19  ;;  %vm913_vm2 = vweird.f32 %v906_v19 }
 0x86a   :  { %1468 = vrcp.f32 %v907_v20  ;;  %v934_v43 = vand.u32 2147483648, %v907_v20  ;;  %v932_v47 = vand.u32 2147483647, %v907_v20  ;;  %vm928_vm4 = vweird.f32 %v907_v20 }
 0x86b   :  { %1470 = vtanh.f32 %v897_v9  ;;  %v920_v52 = vor.u32 1.1754944e-38, %v919_v26  ;;  %vm918_vm5 = vcmp.eq.f32.partialorder %v917_v40, 8.507059e+37 }
 0x86c   :  { %v935_v4 = vor.u32 1.1754944e-38, %v934_v43  ;;  %vm933_vm8 = vcmp.eq.f32.partialorder %v932_v47, 8.507059e+37 }
 0x86f   :  { %v1467_v21 = vpop.eup %1466 }
 0x870   :  { %v1469_v22 = vpop.eup %1468  ;;  %v909_v23 = vmul.f32 %v1467_v21, %v906_v19  ;;  %vm914_vm15 = vweird.f32 %v1467_v21 }
 0x871   :  { %v924_v24 = vmul.f32 %v1469_v22, %v907_v20  ;;  %vm929_vm0 = vweird.f32 %v1469_v22  ;;  %vm915_vm3 = vmor %vm913_vm2, %vm914_vm15  ;;  %v1471_v49 = vpop.eup %1470  ;;  %vm406_vm2 = vcmask 254976  }
 0x872   :  { %v910_v25 = vsub.f32 1.0, %v909_v23  ;;  %vm930_vm6 = vmor %vm928_vm4, %vm929_vm0  ;;  %vm735_vm4 = vcmask 261126  }
 0x873   :  { %v925_v37 = vsub.f32 1.0, %v924_v24 }
 0x874   :  { %v911_v39 = vmul.f32 %v1467_v21, %v910_v25 }
 0x875   :  { %v926_v44 = vmul.f32 %v1469_v22, %v925_v37 }
 0x876   :  { %v912_v54 = vadd.f32 %v1467_v21, %v911_v39 }
 0x877   :  { %v927_v48 = vadd.f32 %v1469_v22, %v926_v44 }
 0x878   :  { %v916_v61 = vsel %vm915_vm3, %v1467_v21, %v912_v54  ;;  %vm519_vm3 = vcmask 257026  }
 0x879   :  { %v921_v3 = vsel %vm918_vm5, %v920_v52, %v916_v61  ;;  %v931_v50 = vsel %vm930_vm6, %v1469_v22, %v927_v48  ;;  %vm627_vm5 = vcmask 259076  }
 0x87a   :  { %v936_v11 = vsel %vm933_vm8, %v935_v4, %v931_v50  ;;  %v943_v10 = vmul.f32 %v941_v62, %v921_v3 }
 0x87b   :  { %v939_v51 = vsel %vm262_vm7, %v1471_v49, %v936_v11 }
 0x87c   :  { %v944_v53 = vmul.f32 %v939_v51, %v921_v3 }
 0x87e   :  { %946 = vrot.lane.b32.xlu2 %v944_v53, %s1499_s26 }
 0x8d8   :  { %v947_v33 = vpop.permute.xlu2 %946 }
 0x8d9   :  { %v949_v36 = vadd.f32 %v947_v33, %v943_v10 }
 0x8db   :  { %1472 = vtanh.f32 %v949_v36  ;;  %v1048_v26 = vrot.slane %v949_v36, 6 }
 0x8e1   :  { %v1473_v45 = vpop.eup %1472 }
 0x8e2   :  { %v1895_v46 = vmul.f32 %v1473_v45, %v939_v51 }
 0x8e4   :  { %v963_v55 = vpack.c.bf16 %v1895_v46, %v1895_v46 }
 0x8e6   :  { %v965_v56 = vrot.slane %v963_v55, 1 }
 0x8e8   :  { %966 = vrot.lane.b32.xlu0 %v965_v56, %s1499_s26 }
 0x95a   :  { %v967_v57 = vpop.permute.xlu0 %966 }
 0x95b   :  { %1362 = vmatmul.msk.bf16.vlgmr.msra.gmra.mxu0 %vm130_vm1, %v967_v57  ;;  %1363 = vmatmul.msk.bf16.vlgmr.msra.gmra.mxu1 %vm130_vm1, %v967_v57 }
 0x9d8   :  { %v980_v34 = vpop.f32.mrf.mxu0  ;;  %v993_v38 = vpop.f32.mrf.mxu1 }
 0x9d9   :  { %v999_v58 = vrot.slane %v980_v34, 4  ;;  %v1000_v59 = vrot.slane %v993_v38, 4 }
 0x9db   :  { %v1003_v60 = vadd.f32 %v999_v58, %v1761_v30  ;;  %v1004_v63 = vadd.f32 %v1000_v59, %v1765_v32 }
 0x9dd   :  { %v1364_v42 = vmul.f32 -1.442695, %v1003_v60  ;;  %v1365_v1 = vmul.f32 -1.442695, %v1004_v63 }
 0x9df   :  { %1474 = vpow2.f32 %v1364_v42 }
 0x9e0   :  { %1476 = vpow2.f32 %v1365_v1  ;;  %v982_v2 = vpop.f32.mrf.mxu0  ;;  %v995_v5 = vpop.f32.mrf.mxu1 }
 0x9e5   :  { %v1475_v6 = vpop.eup %1474 }
 0x9e6   :  { %v1477_v7 = vpop.eup %1476  ;;  %v1013_v8 = vadd.f32 1.0, %v1475_v6 }
 0x9e7   :  { %v1014_v9 = vadd.f32 1.0, %v1477_v7 }
 0x9e8   :  { %1478 = vrcp.f32 %v1013_v8  ;;  %v1026_v30 = vand.u32 2147483648, %v1013_v8  ;;  %v1024_v19 = vand.u32 2147483647, %v1013_v8  ;;  %vm1020_vm11 = vweird.f32 %v1013_v8 }
 0x9e9   :  { %1480 = vrcp.f32 %v1014_v9  ;;  %v1041_v20 = vand.u32 2147483648, %v1014_v9  ;;  %v1039_v22 = vand.u32 2147483647, %v1014_v9  ;;  %vm1035_vm13 = vweird.f32 %v1014_v9 }
 0x9ea   :  { %1482 = vtanh.f32 %v1004_v63  ;;  %v1027_v24 = vor.u32 1.1754944e-38, %v1026_v30  ;;  %vm1025_vm14 = vcmp.eq.f32.partialorder %v1024_v19, 8.507059e+37 }
 0x9eb   :  { %v1042_v39 = vor.u32 1.1754944e-38, %v1041_v20  ;;  %vm1040_vm0 = vcmp.eq.f32.partialorder %v1039_v22, 8.507059e+37 }
 0x9ee   :  { %v1479_v12 = vpop.eup %1478 }
 0x9ef   :  { %v1481_v13 = vpop.eup %1480  ;;  %v1016_v14 = vmul.f32 %v1479_v12, %v1013_v8  ;;  %vm1021_vm9 = vweird.f32 %v1479_v12 }
 0x9f0   :  { %v1031_v16 = vmul.f32 %v1481_v13, %v1014_v9  ;;  %vm1036_vm10 = vweird.f32 %v1481_v13  ;;  %vm1022_vm12 = vmor %vm1020_vm11, %vm1021_vm9  ;;  %v1483_v40 = vpop.eup %1482 }
 0x9f1   :  { %v1017_v17 = vsub.f32 1.0, %v1016_v14  ;;  %vm1037_vm15 = vmor %vm1035_vm13, %vm1036_vm10 }
 0x9f2   :  { %v1032_v32 = vsub.f32 1.0, %v1031_v16 }
 0x9f3   :  { %v1018_v18 = vmul.f32 %v1479_v12, %v1017_v17 }
 0x9f4   :  { %v1033_v21 = vmul.f32 %v1481_v13, %v1032_v32 }
 0x9f5   :  { %v1019_v23 = vadd.f32 %v1479_v12, %v1018_v18 }
 0x9f6   :  { %v1034_v25 = vadd.f32 %v1481_v13, %v1033_v21 }
 0x9f7   :  { %v1023_v37 = vsel %vm1022_vm12, %v1479_v12, %v1019_v23 }
 0x9f8   :  { %v1028_v43 = vsel %vm1025_vm14, %v1027_v24, %v1023_v37  ;;  %v1038_v44 = vsel %vm1037_vm15, %v1481_v13, %v1034_v25 }
 0x9f9   :  { %v1043_v47 = vsel %vm1040_vm0, %v1042_v39, %v1038_v44  ;;  %v1050_v54 = vmul.f32 %v1048_v26, %v1028_v43 }
 0x9fa   :  { %v1046_v52 = vsel %vm262_vm7, %v1483_v40, %v1043_v47 }
 0x9fb   :  { %v1051_v48 = vmul.f32 %v1046_v52, %v1028_v43 }
 0x9fd   :  { %1053 = vrot.lane.b32.xlu1 %v1051_v48, %s1499_s26 }
 0xa05   :  { %403 = vrot.lane.b32.xlu1 %v1794_v28, %s1499_s26 }
 0xa0d   :  { %521 = vrot.lane.b32.xlu1 %v1826_v35, %s1500_s5 }
 0xa15   :  { %731 = vrot.lane.b32.xlu1 %v1871_v15, %s1499_s26 }
 0xa1d   :  { %846 = vrot.lane.b32.xlu1 %v1883_v41, %s1500_s5 }
 0xa6f   :  { %v1054_v62 = vpop.permute.xlu1 %1053 }
 0xa70   :  { %v1915_v61 = vadd.f32 %v1054_v62, %v1050_v54 }
 0xa72   :  { %1484 = vtanh.f32 %v1915_v61  ;;  %v1155_v23 = vrot.slane %v1915_v61, 6 }
 0xa77   :  { %v404_v4 = vpop.permute.xlu1 %403 }
 0xa78   :  { %v1485_v49 = vpop.eup %1484  ;;  %407 = vst.msk [vmem:[%s2018_s6] sm:$0x3] %vm406_vm2, %v404_v4 }
 0xa79   :  { %v1058_v3 = vmul.f32 %v1485_v49, %v1046_v52 }
 0xa7b   :  { %1060 = vrot.lane.b32.xlu1 %v1058_v3, %s1499_s26  ;;  %v1070_v50 = vpack.c.bf16 %v1058_v3, %v1058_v3 }
 0xa7d   :  { %v1072_v11 = vrot.slane %v1070_v50, 2 }
 0xa7f   :  { %v522_v10 = vpop.permute.xlu1 %521  ;;  %1073 = vrot.lane.b32.xlu2 %v1072_v11, %s1499_s26 }
 0xa80   :  { %1337 = vst.msk [vmem:[%s2019_s7 + $0xa] sm:$0xc] %vm519_vm3, %v522_v10 }
 0xa87   :  { %v732_v51 = vpop.permute.xlu1 %731  ;;  %408 = vrot.lane.b32.xlu2 %v1794_v28, %s1500_s5 }
 0xa88   :  { %1348 = vst.msk [vmem:[%s2018_s6] sm:$0xc0] %vm735_vm4, %v732_v51 }
 0xa8f   :  { %v847_v53 = vpop.permute.xlu1 %846  ;;  %623 = vrot.lane.b32.xlu2 %v1850_v27, %s1499_s26 }
 0xa90   :  { %1355 = vst.msk [vmem:[%s2019_s7 + $0x6] sm:$0x3] %vm406_vm2, %v847_v53 }
 0xa97   :  { %737 = vrot.lane.b32.xlu2 %v1871_v15, %s1500_s5 }
 0xa9f   :  { %953 = vrot.lane.b32.xlu2 %v1895_v46, %s1499_s26 }
 0xaa7   :  { %1065 = vrot.lane.b32.xlu2 %v1058_v3, %s1500_s5 }
 0xad9   :  { %v1074_v28 = vpop.permute.xlu2 %1073 }
 0xada   :  { %1368 = vmatmul.msk.bf16.vlgmr.msra.gmra.mxu2 %vm130_vm1, %v1074_v28  ;;  %1369 = vmatmul.msk.bf16.vlgmr.msra.gmra.mxu3 %vm130_vm1, %v1074_v28 }
 0xae1   :  { %v409_v33 = vpop.permute.xlu2 %408 }
 0xae2   :  { %1331 = vst.msk [vmem:[%s2019_s7 + $0xe] sm:$0x3] %vm406_vm2, %v409_v33 }
 0xae9   :  { %v624_v36 = vpop.permute.xlu2 %623 }
 0xaea   :  { %1342 = vst.msk [vmem:[%s2018_s6] sm:$0x30] %vm627_vm5, %v624_v36 }
 0xaed   :  { %v1061_v15 = vpop.permute.xlu1 %1060 }
 0xaee   :  { %1366 = vst.msk [vmem:[%s2018_s6 + $0x8] sm:$0x30] %vm627_vm5, %v1061_v15 }
 0xaf1   :  { %v738_v45 = vpop.permute.xlu2 %737 }
 0xaf2   :  { %1349 = vst.msk [vmem:[%s2019_s7 + $0x2] sm:$0xc0] %vm735_vm4, %v738_v45 }
 0xaf9   :  { %v954_v55 = vpop.permute.xlu2 %953 }
 0xafa   :  { %1360 = vst.msk [vmem:[%s2018_s6 + $0x8] sm:$0xc] %vm519_vm3, %v954_v55 }
 0xb01   :  { %v1066_v56 = vpop.permute.xlu2 %1065 }
 0xb02   :  { %1367 = vst.msk [vmem:[%s2019_s7 - $0x2] sm:$0x30] %vm627_vm5, %v1066_v56 }
 0xb5d   :  { %v1087_v57 = vpop.f32.mrf.mxu2  ;;  %v1100_v34 = vpop.f32.mrf.mxu3 }
 0xb5e   :  { %v1106_v38 = vrot.slane %v1087_v57, 2  ;;  %v1107_v58 = vrot.slane %v1100_v34, 2 }
 0xb60   :  { %v1110_v59 = vadd.f32 %v1106_v38, %v1759_v29  ;;  %v1111_v60 = vadd.f32 %v1107_v58, %v1763_v31 }
 0xb62   :  { %v1370_v63 = vmul.f32 -1.442695, %v1110_v59  ;;  %v1371_v42 = vmul.f32 -1.442695, %v1111_v60 }
 0xb64   :  { %1486 = vpow2.f32 %v1370_v63 }
 0xb65   :  { %1488 = vpow2.f32 %v1371_v42  ;;  %v1089_v1 = vpop.f32.mrf.mxu2  ;;  %v1102_v2 = vpop.f32.mrf.mxu3 }
 0xb6a   :  { %v1487_v5 = vpop.eup %1486 }
 0xb6b   :  { %v1489_v6 = vpop.eup %1488  ;;  %v1120_v7 = vadd.f32 1.0, %v1487_v5 }
 0xb6c   :  { %v1121_v8 = vadd.f32 1.0, %v1489_v6 }
 0xb6d   :  { %1490 = vrcp.f32 %v1120_v7  ;;  %v1133_v29 = vand.u32 2147483648, %v1120_v7  ;;  %v1131_v30 = vand.u32 2147483647, %v1120_v7  ;;  %vm1127_vm8 = vweird.f32 %v1120_v7 }
 0xb6e   :  { %1492 = vrcp.f32 %v1121_v8  ;;  %v1148_v32 = vand.u32 2147483648, %v1121_v8  ;;  %v1146_v19 = vand.u32 2147483647, %v1121_v8  ;;  %vm1142_vm10 = vweird.f32 %v1121_v8 }
 0xb6f   :  { %1494 = vtanh.f32 %v1111_v60  ;;  %v1134_v21 = vor.u32 1.1754944e-38, %v1133_v29  ;;  %vm1132_vm11 = vcmp.eq.f32.partialorder %v1131_v30, 8.507059e+37 }
 0xb70   :  { %v1149_v25 = vor.u32 1.1754944e-38, %v1148_v32  ;;  %vm1147_vm13 = vcmp.eq.f32.partialorder %v1146_v19, 8.507059e+37 }
 0xb73   :  { %v1491_v9 = vpop.eup %1490 }
 0xb74   :  { %v1493_v12 = vpop.eup %1492  ;;  %v1123_v13 = vmul.f32 %v1491_v9, %v1120_v7  ;;  %vm1128_vm1 = vweird.f32 %v1491_v9 }
 0xb75   :  { %v1138_v14 = vmul.f32 %v1493_v12, %v1121_v8  ;;  %vm1143_vm6 = vweird.f32 %v1493_v12  ;;  %vm1129_vm9 = vmor %vm1127_vm8, %vm1128_vm1  ;;  %v1495_v26 = vpop.eup %1494 }
 0xb76   :  { %v1124_v16 = vsub.f32 1.0, %v1123_v13  ;;  %vm1144_vm12 = vmor %vm1142_vm10, %vm1143_vm6 }
 0xb77   :  { %v1139_v31 = vsub.f32 1.0, %v1138_v14 }
 0xb78   :  { %v1125_v17 = vmul.f32 %v1491_v9, %v1124_v16 }
 0xb79   :  { %v1140_v18 = vmul.f32 %v1493_v12, %v1139_v31 }
 0xb7a   :  { %v1126_v20 = vadd.f32 %v1491_v9, %v1125_v17 }
 0xb7b   :  { %v1141_v22 = vadd.f32 %v1493_v12, %v1140_v18 }
 0xb7c   :  { %v1130_v24 = vsel %vm1129_vm9, %v1491_v9, %v1126_v20 }
 0xb7d   :  { %v1135_v37 = vsel %vm1132_vm11, %v1134_v21, %v1130_v24  ;;  %v1145_v39 = vsel %vm1144_vm12, %v1493_v12, %v1141_v22 }
 0xb7e   :  { %v1150_v40 = vsel %vm1147_vm13, %v1149_v25, %v1145_v39  ;;  %v1157_v43 = vmul.f32 %v1155_v23, %v1135_v37 }
 0xb7f   :  { %v1153_v44 = vsel %vm262_vm7, %v1495_v26, %v1150_v40  ;;  %vm1176_vm7 = vcmask 523270  }
 0xb80   :  { %v1158_v47 = vmul.f32 %v1153_v44, %v1135_v37 }
 0xb82   :  { %1160 = vrot.lane.b32.xlu0 %v1158_v47, %s1499_s26 }
 0xb8a   :  { %515 = vrot.lane.b32.xlu0 %v1826_v35, %s1499_s26 }
 0xb92   :  { %629 = vrot.lane.b32.xlu0 %v1850_v27, %s1500_s5 }
 0xb9a   :  { %841 = vrot.lane.b32.xlu0 %v1883_v41, %s1499_s26 }
 0xba2   :  { %958 = vrot.lane.b32.xlu0 %v1895_v46, %s1500_s5 }
 0xbf4   :  { %v1161_v54 = vpop.permute.xlu0 %1160 }
 0xbf5   :  { %v1163_v52 = vadd.f32 %v1161_v54, %v1157_v43 }
 0xbf7   :  { %1496 = vtanh.f32 %v1163_v52  ;;  %1179 = vrot.lane.b32.xlu2 %v1163_v52, %s1499_s26 }
 0xbfc   :  { %v516_v0 = vpop.permute.xlu0 %515 }
 0xbfd   :  { %v1497_v48 = vpop.eup %1496  ;;  %1336 = vst.msk [vmem:[%s2018_s6] sm:$0xc] %vm519_vm3, %v516_v0 }
 0xbfe   :  { %v1165_v35 = vmul.f32 %v1497_v48, %v1153_v44 }
 0xc00   :  { %1172 = vrot.lane.b32.xlu1 %v1165_v35, %s1500_s5  ;;  %1167 = vrot.lane.b32.xlu0 %v1165_v35, %s1499_s26 }
 0xc04   :  { %v630_v27 = vpop.permute.xlu0 %629 }
 0xc05   :  { %1343 = vst.msk [vmem:[%s2019_s7 + $0x6] sm:$0x30] %vm627_vm5, %v630_v27 }
 0xc0c   :  { %v842_v41 = vpop.permute.xlu0 %841 }
 0xc0d   :  { %1354 = vst.msk [vmem:[%s2018_s6 + $0x8] sm:$0x3] %vm406_vm2, %v842_v41 }
 0xc14   :  { %v959_v46 = vpop.permute.xlu0 %958 }
 0xc15   :  { %1361 = vst.msk [vmem:[%s2019_s7 + $0x2] sm:$0xc] %vm519_vm3, %v959_v46 }
 0xc51   :  { %v1180_v62 = vpop.permute.xlu2 %1179 }
 0xc52   :  { %1182 = vst.msk [vmem:[#allocation3 - $0x6] sm:$0xc0] %vm1176_vm7, %v1180_v62 }
 0xc72   :  { %v1173_v61 = vpop.permute.xlu1 %1172  ;;  %v1168_v4 = vpop.permute.xlu0 %1167 }
 0xc73   :  { %1175 = vst.msk [vmem:[%s2019_s7 - $0x6] sm:$0xc0] %vm735_vm4, %v1173_v61 }
 0xc74   :  { %1372 = vst.msk [vmem:[%s2018_s6 + $0x8] sm:$0xc0] %vm735_vm4, %v1168_v4 }
 0xc75   :  { %1177 = vst.msk [vmem:[#allocation2 - $0x6] sm:$0xc0] %vm1176_vm7, %v1168_v4 }

</bundles_post_ra>
